<compile_context>
chip_gen: v7x
topology: tpu7x:2x2x1
jax: 0.10.0
libtpu: 0.0.40
codegen_flags: <defaults>
</compile_context>

<pallas_src>
import functools

import jax
import jax.numpy as jnp
from jax import lax
from jax.experimental import pallas as pl
from jax.experimental.pallas import tpu as pltpu

KERNEL_SIZE = 11
SIGMA = 1.5
K1, K2 = 0.01, 0.03
MAX_DEPTH = 1000.0 / 10.0   # data_range for SSIM
W1, W2, W3, W4 = 0.1, 1.0, 10.0, 10.0


def _gaussian_1d(kernel_size=KERNEL_SIZE, sigma=SIGMA):
    dist = jnp.arange(kernel_size, dtype=jnp.float32) - (kernel_size - 1) / 2.0
    g = jnp.exp(-(dist / sigma) ** 2 / 2.0)
    return g / jnp.sum(g)


def _band_matrix(full, valid, g):
    # M[i + k, i] = g[k]  ->  1-D "valid" gaussian convolution as a matmul.
    rows = jnp.arange(full)[:, None]
    cols = jnp.arange(valid)[None, :]
    k = rows - cols
    mask = (k >= 0) & (k < KERNEL_SIZE)
    vals = jnp.where(mask, g[jnp.clip(k, 0, KERNEL_SIZE - 1)], 0.0)
    return vals.astype(jnp.float32)  # (full, valid)


def _vmem_capacity_bytes():
    """Per-core VMEM capacity; conservative 64 MiB fallback (safe on v5e/v6e/v7x)."""
    try:
        return int(pltpu.get_tpu_info().vmem_capacity_bytes)
    except Exception:
        return 64 * 1024 * 1024


def _is_two_core_chip():
    """v7x has 2 TensorCores sharing the 'parallel' grid axis."""
    try:
        kind = jax.devices()[0].device_kind.lower()
    except Exception:
        return False
    return "v7" in kind


def _pick_batch(nc, h, w, hv, wv, *, max_vmem_bytes, prefer_even_steps=False, max_b=32):
    """Largest per-step image batch B with legal block shapes that fits VMEM.

    VMEM model (f32): double-buffered input blocks + loaded values + diff/gradient
    temporaries + 5 filtered maps + SSIM combine temporaries + broadcast H-filter
    weights  ~=  18*h*w + hv*h  words per image (conservative).
    """
    per_img = 4 * (18 * h * w + hv * h)
    fixed = 4 * 2 * (w * wv + hv * h) + (1 << 16)
    cands = []
    for b in range(1, min(nc, max_b) + 1):
        if nc % b:
            continue
        # block sublane dim must be a multiple of 8 or equal the full array dim
        if (b * h) % 8 != 0 and b != nc:
            continue
        if fixed + b * per_img > max_vmem_bytes:
            continue
        cands.append(b)
    if not cands:
        # Last resort: one step over everything.  With the quadratic atbig weight
        # removed this is merely a large block (only triggers when h % 8 != 0 or
        # VMEM cannot hold even a single image).
        return nc
    best = max(cands)
    if prefer_even_steps:
        even = [b for b in cands if (nc // b) >= 2 and (nc // b) % 2 == 0]
        if even:
            best = max(even)
    return best


def _depth_loss_kernel(yt_ref, yp_ref, bm_ref, at_ref, out_ref, *, n_img, img_h, img_hv):
    """One grid step = n_img images stacked along the sublane axis: (n_img*H, W).

    Emits a (1, 8, 128) partial-sum tile: row 0 = sum|pred-true|, row 1 = edge
    gradient sum, row 2 = per-window SSIM sum.  Final reduction happens in JAX so
    the grid axis can stay 'parallel' (both TensorCores on v7x).
    """
    yt = yt_ref[...]                      # (B*H, W) y_true
    yp = yp_ref[...]                      # (B*H, W) y_pred
    d = yp - yt

    # --- L1 depth term -------------------------------------------------------
    depth_p = jnp.sum(jnp.abs(d))

    # --- edge term (TF image_gradients: zero last row/col) -------------------
    # d(pred)-d(true) == gradient of (pred-true), so operate on d directly.
    dys = d[1:, :] - d[:-1, :]                                  # (B*H-1, W)
    rows = lax.broadcasted_iota(jnp.int32, dys.shape, 0)
    # zero the cross-image rows (== the zero-padded last row of each image)
    dys = jnp.where((rows % img_h) == (img_h - 1), 0.0, dys)
    dxs = d[:, 1:] - d[:, :-1]                                  # within-row only
    edge_p = jnp.sum(jnp.abs(dys)) + jnp.sum(jnp.abs(dxs))

    # --- SSIM: separable 11x11 gaussian, two MXU matmuls per operand ----------
    # W filter: shared (W, Wv) band matrix; operands kept separate (no concat).
    # H filter: shared (Hv, H) band matrix broadcast over the image batch and
    # applied with ONE batched dot_general per operand (no block-diag weights).
    bm = bm_ref[...]                                            # (W, Wv)
    at_b = jnp.broadcast_to(at_ref[...][None, :, :], (n_img, img_hv, img_h))
    dn = (((2,), (1,)), ((0,), (0,)))                           # batched matmul dims

    def gfilt(x):                                               # x: (B*H, W)
        t = jnp.dot(x, bm, preferred_element_type=jnp.float32)  # (B*H, Wv)
        t3 = t.reshape(n_img, img_h, t.shape[-1])               # (B, H, Wv)
        return lax.dot_general(at_b, t3, dn,
                               preferred_element_type=jnp.float32)  # (B, Hv, Wv)

    mu_t = gfilt(yt)
    mu_p = gfilt(yp)
    e_tt = gfilt(yt * yt)
    e_pp = gfilt(yp * yp)
    e_tp = gfilt(yt * yp)

    s_tt = e_tt - mu_t * mu_t
    s_pp = e_pp - mu_p * mu_p
    s_tp = e_tp - mu_t * mu_p

    c1 = (K1 * MAX_DEPTH) ** 2
    c2 = (K2 * MAX_DEPTH) ** 2
    num = (2.0 * mu_t * mu_p + c1) * (2.0 * s_tp + c2)
    den = (mu_t * mu_t + mu_p * mu_p + c1) * (s_tt + s_pp + c2)
    ssim_p = jnp.sum(num * pl.reciprocal(den, approx=True))

    # --- one lane-dense (8, 128) partial tile per step -------------------------
    r = lax.broadcasted_iota(jnp.int32, (8, 128), 0)
    tile = jnp.where(r == 0, depth_p,
                     jnp.where(r == 1, edge_p,
                               jnp.where(r == 2, ssim_p, 0.0)))
    out_ref[...] = tile[None, :, :]


def depth_loss(score, target):
    """Mirrors DepthLoss.forward(score, target) -> (loss, l_depth, l_edges, l_ssim, l_vnl)."""
    y_pred = score.astype(jnp.float32)   # score  == y_pred
    y_true = target.astype(jnp.float32)  # target == y_true
    n, c, h, w = y_true.shape
    nc = n * c
    hv, wv = h - KERNEL_SIZE + 1, w - KERNEL_SIZE + 1
    assert hv >= 1 and wv >= 1, "SSIM needs H, W >= 11"

    vmem_cap = _vmem_capacity_bytes()
    b = _pick_batch(nc, h, w, hv, wv,
                    max_vmem_bytes=int(0.45 * vmem_cap),
                    prefer_even_steps=_is_two_core_chip())
    steps = nc // b

    g = _gaussian_1d()
    at = _band_matrix(h, hv, g).T                 # (Hv, H)   valid H filter
    bm = _band_matrix(w, wv, g)                   # (W, Wv)   valid W filter

    yt2 = y_true.reshape(nc * h, w)               # free reshape (contiguous collapse)
    yp2 = y_pred.reshape(nc * h, w)

    kernel = functools.partial(_depth_loss_kernel, n_img=b, img_h=h, img_hv=hv)

    partials = pl.pallas_call(
        kernel,
        out_shape=jax.ShapeDtypeStruct((steps, 8, 128), jnp.float32),
        grid_spec=pltpu.PrefetchScalarGridSpec(
            num_scalar_prefetch=0,
            grid=(steps,),
            in_specs=[
                pl.BlockSpec((b * h, w), lambda i: (i, 0)),   # y_true block
                pl.BlockSpec((b * h, w), lambda i: (i, 0)),   # y_pred block
                pl.BlockSpec((w, wv), lambda i: (0, 0)),      # bm (constant)
                pl.BlockSpec((hv, h), lambda i: (0, 0)),      # at (constant)
            ],
            out_specs=pl.BlockSpec((1, 8, 128), lambda i: (i, 0, 0)),
        ),
        compiler_params=pltpu.CompilerParams(
            dimension_semantics=("parallel",),
            vmem_limit_bytes=min(int(0.75 * vmem_cap), vmem_cap - (4 << 20)),
        ),
    )(yt2, yp2, bm, at)

    sums = jnp.sum(partials[:, :3, 0], axis=0)
    total_px = float(nc * h * w)
    l_depth = sums[0] / total_px
    l_edges = sums[1] / total_px
    ssim_mean = sums[2] / float(nc * hv * wv)
    l_ssim = jnp.clip((1.0 - ssim_mean) * 0.5, 0.0, 1.0)
    # TODO(synk): VNL term cannot be implemented (class not defined in source).
    l_vnl = jnp.float32(0.0)

    l_depth_w = W1 * l_depth
    l_edges_w = W2 * l_edges
    l_ssim_w = W3 * l_ssim
    l_vnl_w = W4 * l_vnl
    loss = l_depth_w + l_edges_w + l_ssim_w + l_vnl_w
    return loss, l_depth_w, l_edges_w, l_ssim_w, l_vnl_w


if __name__ == "__main__":
    key = jax.random.PRNGKey(0)
    k1, k2 = jax.random.split(key)
    n, c, h, w = 8, 1, 32, 32
    target = jax.random.uniform(k1, (n, c, h, w), jnp.float32, 0.0, MAX_DEPTH)
    score = jax.random.uniform(k2, (n, c, h, w), jnp.float32, 0.0, MAX_DEPTH)

    outs = jax.jit(depth_loss)(score, target)
    jax.block_until_ready(outs)
    print("KERNEL_OK")
</pallas_src>

<mosaic_0001>
module attributes {stable_mosaic.version = 11 : i64} {
  func.func @_depth_loss_kernel(%arg0: i32, %arg1: memref<256x32xf32, #tpu.memory_space<vmem>>, %arg2: memref<256x32xf32, #tpu.memory_space<vmem>>, %arg3: memref<32x22xf32, #tpu.memory_space<vmem>>, %arg4: memref<22x32xf32, #tpu.memory_space<vmem>>, %arg5: memref<1x8x128xf32, #tpu.memory_space<vmem>>) attributes {dimension_semantics = [#tpu.dimension_semantics<parallel>], iteration_bounds = array<i64: 1>, scalar_prefetch = 0 : i64, scratch_operands = 0 : i64, tpu.core_type = #tpu.core_type<tc>, window_params = [{transform_indices = @transform_0, window_bounds = array<i64: 256, 32>}, {transform_indices = @transform_1, window_bounds = array<i64: 256, 32>}, {pipeline_mode = #tpu.pipeline_mode<synchronous>, transform_indices = @transform_2, window_bounds = array<i64: 32, 22>}, {pipeline_mode = #tpu.pipeline_mode<synchronous>, transform_indices = @transform_3, window_bounds = array<i64: 22, 32>}, {transform_indices = @transform_4, window_bounds = array<i64: 1, 8, 128>}]} {
    %c0 = arith.constant 0 : index
    %c0_0 = arith.constant 0 : index
    %0 = vector.load %arg1[%c0, %c0_0] : memref<256x32xf32, #tpu.memory_space<vmem>>, vector<256x32xf32>
    %c0_1 = arith.constant 0 : index
    %c0_2 = arith.constant 0 : index
    %1 = vector.load %arg2[%c0_1, %c0_2] : memref<256x32xf32, #tpu.memory_space<vmem>>, vector<256x32xf32>
    %2 = arith.subf %1, %0 : vector<256x32xf32>
    %3 = math.absf %2 : vector<256x32xf32>
    %4 = vector.shape_cast %3 : vector<256x32xf32> to vector<1x256x32xf32>
    %cst = arith.constant dense<0.000000e+00> : vector<1xf32>
    %5 = vector.multi_reduction <add>, %4, %cst [1, 2] : vector<1x256x32xf32> to vector<1xf32>
    %6 = vector.shape_cast %5 : vector<1xf32> to vector<1x1x1xf32>
    %7 = vector.extract %6[0, 0, 0] : f32 from vector<1x1x1xf32>
    %8 = vector.extract_strided_slice %2 {offsets = [1, 0], sizes = [255, 32], strides = [1, 1]} : vector<256x32xf32> to vector<255x32xf32>
    %9 = vector.extract_strided_slice %2 {offsets = [0, 0], sizes = [255, 32], strides = [1, 1]} : vector<256x32xf32> to vector<255x32xf32>
    %10 = arith.subf %8, %9 : vector<255x32xf32>
    %11 = tpu.iota {dimensions = array<i32: 0>} : vector<255x32xi32>
    %c32_i32 = arith.constant 32 : i32
    %c0_i32 = arith.constant 0 : i32
    %12 = arith.cmpi eq, %c32_i32, %c0_i32 : i32
    %c1_i32 = arith.constant 1 : i32
    %13 = arith.select %12, %c1_i32, %c32_i32 : i32
    %14 = vector.broadcast %13 : i32 to vector<255x32xi32>
    %15 = arith.remsi %11, %14 : vector<255x32xi32>
    %c0_i32_3 = arith.constant 0 : i32
    %16 = vector.broadcast %c0_i32_3 : i32 to vector<255x32xi32>
    %17 = arith.cmpi ne, %15, %16 : vector<255x32xi32>
    %c0_i32_4 = arith.constant 0 : i32
    %18 = vector.broadcast %c0_i32_4 : i32 to vector<255x32xi32>
    %19 = arith.cmpi slt, %15, %18 : vector<255x32xi32>
    %c0_i32_5 = arith.constant 0 : i32
    %20 = arith.cmpi slt, %13, %c0_i32_5 : i32
    %21 = vector.broadcast %20 : i1 to vector<255x32xi1>
    %22 = vector.broadcast %21 : vector<255x32xi1> to vector<255x32xi1>
    %23 = arith.xori %19, %22 : vector<255x32xi1>
    %24 = arith.andi %23, %17 : vector<255x32xi1>
    %25 = vector.broadcast %13 : i32 to vector<255x32xi32>
    %26 = arith.addi %15, %25 : vector<255x32xi32>
    %27 = arith.select %24, %26, %15 : vector<255x32xi1>, vector<255x32xi32>
    %c31_i32 = arith.constant 31 : i32
    %28 = vector.broadcast %c31_i32 : i32 to vector<255x32xi32>
    %29 = arith.cmpi eq, %27, %28 : vector<255x32xi32>
    %cst_6 = arith.constant 0.000000e+00 : f32
    %30 = vector.broadcast %cst_6 : f32 to vector<255x32xf32>
    %31 = arith.select %29, %30, %10 : vector<255x32xi1>, vector<255x32xf32>
    %32 = vector.extract_strided_slice %2 {offsets = [0, 1], sizes = [256, 31], strides = [1, 1]} : vector<256x32xf32> to vector<256x31xf32>
    %33 = vector.extract_strided_slice %2 {offsets = [0, 0], sizes = [256, 31], strides = [1, 1]} : vector<256x32xf32> to vector<256x31xf32>
    %34 = arith.subf %32, %33 : vector<256x31xf32>
    %35 = math.absf %31 : vector<255x32xf32>
    %36 = vector.shape_cast %35 : vector<255x32xf32> to vector<1x255x32xf32>
    %cst_7 = arith.constant dense<0.000000e+00> : vector<1xf32>
    %37 = vector.multi_reduction <add>, %36, %cst_7 [1, 2] : vector<1x255x32xf32> to vector<1xf32>
    %38 = vector.shape_cast %37 : vector<1xf32> to vector<1x1x1xf32>
    %39 = vector.extract %38[0, 0, 0] : f32 from vector<1x1x1xf32>
    %40 = math.absf %34 : vector<256x31xf32>
    %41 = vector.shape_cast %40 : vector<256x31xf32> to vector<1x256x31xf32>
    %cst_8 = arith.constant dense<0.000000e+00> : vector<1xf32>
    %42 = vector.multi_reduction <add>, %41, %cst_8 [1, 2] : vector<1x256x31xf32> to vector<1xf32>
    %43 = vector.shape_cast %42 : vector<1xf32> to vector<1x1x1xf32>
    %44 = vector.extract %43[0, 0, 0] : f32 from vector<1x1x1xf32>
    %45 = arith.addf %39, %44 : f32
    %c0_9 = arith.constant 0 : index
    %c0_10 = arith.constant 0 : index
    %46 = vector.load %arg3[%c0_9, %c0_10] : memref<32x22xf32, #tpu.memory_space<vmem>>, vector<32x22xf32>
    %c0_11 = arith.constant 0 : index
    %c0_12 = arith.constant 0 : index
    %47 = vector.load %arg4[%c0_11, %c0_12] : memref<22x32xf32, #tpu.memory_space<vmem>>, vector<22x32xf32>
    %48 = vector.shape_cast %47 : vector<22x32xf32> to vector<1x22x32xf32>
    %49 = vector.shape_cast %48 : vector<1x22x32xf32> to vector<1x22x32xf32>
    %50 = vector.broadcast %49 : vector<1x22x32xf32> to vector<8x22x32xf32>
    %cst_13 = arith.constant dense<0.000000e+00> : vector<256x22xf32>
    %51 = tpu.matmul %0, %46, %cst_13 {dimension_numbers = #tpu.dot_dimension_numbers<[1], [0], [0], [1], [0, 0, 1, 1], [], []>} : vector<256x32xf32>, vector<32x22xf32>, vector<256x22xf32> -> vector<256x22xf32>
    %52 = vector.shape_cast %51 : vector<256x22xf32> to vector<8x32x22xf32>
    %cst_14 = arith.constant dense<0.000000e+00> : vector<8x22x22xf32>
    %53 = tpu.matmul %50, %52, %cst_14 {dimension_numbers = #tpu.dot_dimension_numbers<[2], [1], [1], [2], [0, 0, 0, 1, 1, 2], [0], [0]>} : vector<8x22x32xf32>, vector<8x32x22xf32>, vector<8x22x22xf32> -> vector<8x22x22xf32>
    %cst_15 = arith.constant dense<0.000000e+00> : vector<256x22xf32>
    %54 = tpu.matmul %1, %46, %cst_15 {dimension_numbers = #tpu.dot_dimension_numbers<[1], [0], [0], [1], [0, 0, 1, 1], [], []>} : vector<256x32xf32>, vector<32x22xf32>, vector<256x22xf32> -> vector<256x22xf32>
    %55 = vector.shape_cast %54 : vector<256x22xf32> to vector<8x32x22xf32>
    %cst_16 = arith.constant dense<0.000000e+00> : vector<8x22x22xf32>
    %56 = tpu.matmul %50, %55, %cst_16 {dimension_numbers = #tpu.dot_dimension_numbers<[2], [1], [1], [2], [0, 0, 0, 1, 1, 2], [0], [0]>} : vector<8x22x32xf32>, vector<8x32x22xf32>, vector<8x22x22xf32> -> vector<8x22x22xf32>
    %57 = arith.mulf %0, %0 : vector<256x32xf32>
    %cst_17 = arith.constant dense<0.000000e+00> : vector<256x22xf32>
    %58 = tpu.matmul %57, %46, %cst_17 {dimension_numbers = #tpu.dot_dimension_numbers<[1], [0], [0], [1], [0, 0, 1, 1], [], []>} : vector<256x32xf32>, vector<32x22xf32>, vector<256x22xf32> -> vector<256x22xf32>
    %59 = vector.shape_cast %58 : vector<256x22xf32> to vector<8x32x22xf32>
    %cst_18 = arith.constant dense<0.000000e+00> : vector<8x22x22xf32>
    %60 = tpu.matmul %50, %59, %cst_18 {dimension_numbers = #tpu.dot_dimension_numbers<[2], [1], [1], [2], [0, 0, 0, 1, 1, 2], [0], [0]>} : vector<8x22x32xf32>, vector<8x32x22xf32>, vector<8x22x22xf32> -> vector<8x22x22xf32>
    %61 = arith.mulf %1, %1 : vector<256x32xf32>
    %cst_19 = arith.constant dense<0.000000e+00> : vector<256x22xf32>
    %62 = tpu.matmul %61, %46, %cst_19 {dimension_numbers = #tpu.dot_dimension_numbers<[1], [0], [0], [1], [0, 0, 1, 1], [], []>} : vector<256x32xf32>, vector<32x22xf32>, vector<256x22xf32> -> vector<256x22xf32>
    %63 = vector.shape_cast %62 : vector<256x22xf32> to vector<8x32x22xf32>
    %cst_20 = arith.constant dense<0.000000e+00> : vector<8x22x22xf32>
    %64 = tpu.matmul %50, %63, %cst_20 {dimension_numbers = #tpu.dot_dimension_numbers<[2], [1], [1], [2], [0, 0, 0, 1, 1, 2], [0], [0]>} : vector<8x22x32xf32>, vector<8x32x22xf32>, vector<8x22x22xf32> -> vector<8x22x22xf32>
    %65 = arith.mulf %0, %1 : vector<256x32xf32>
    %cst_21 = arith.constant dense<0.000000e+00> : vector<256x22xf32>
    %66 = tpu.matmul %65, %46, %cst_21 {dimension_numbers = #tpu.dot_dimension_numbers<[1], [0], [0], [1], [0, 0, 1, 1], [], []>} : vector<256x32xf32>, vector<32x22xf32>, vector<256x22xf32> -> vector<256x22xf32>
    %67 = vector.shape_cast %66 : vector<256x22xf32> to vector<8x32x22xf32>
    %cst_22 = arith.constant dense<0.000000e+00> : vector<8x22x22xf32>
    %68 = tpu.matmul %50, %67, %cst_22 {dimension_numbers = #tpu.dot_dimension_numbers<[2], [1], [1], [2], [0, 0, 0, 1, 1, 2], [0], [0]>} : vector<8x22x32xf32>, vector<8x32x22xf32>, vector<8x22x22xf32> -> vector<8x22x22xf32>
    %69 = arith.mulf %53, %53 : vector<8x22x22xf32>
    %70 = arith.subf %60, %69 : vector<8x22x22xf32>
    %71 = arith.mulf %56, %56 : vector<8x22x22xf32>
    %72 = arith.subf %64, %71 : vector<8x22x22xf32>
    %73 = arith.mulf %53, %56 : vector<8x22x22xf32>
    %74 = arith.subf %68, %73 : vector<8x22x22xf32>
    %cst_23 = arith.constant 2.000000e+00 : f32
    %75 = vector.broadcast %cst_23 : f32 to vector<8x22x22xf32>
    %76 = arith.mulf %75, %53 : vector<8x22x22xf32>
    %77 = arith.mulf %76, %56 : vector<8x22x22xf32>
    %cst_24 = arith.constant 1.000000e+00 : f32
    %78 = vector.broadcast %cst_24 : f32 to vector<8x22x22xf32>
    %79 = arith.addf %77, %78 : vector<8x22x22xf32>
    %cst_25 = arith.constant 2.000000e+00 : f32
    %80 = vector.broadcast %cst_25 : f32 to vector<8x22x22xf32>
    %81 = arith.mulf %80, %74 : vector<8x22x22xf32>
    %cst_26 = arith.constant 9.000000e+00 : f32
    %82 = vector.broadcast %cst_26 : f32 to vector<8x22x22xf32>
    %83 = arith.addf %81, %82 : vector<8x22x22xf32>
    %84 = arith.mulf %79, %83 : vector<8x22x22xf32>
    %85 = arith.mulf %53, %53 : vector<8x22x22xf32>
    %86 = arith.mulf %56, %56 : vector<8x22x22xf32>
    %87 = arith.addf %85, %86 : vector<8x22x22xf32>
    %cst_27 = arith.constant 1.000000e+00 : f32
    %88 = vector.broadcast %cst_27 : f32 to vector<8x22x22xf32>
    %89 = arith.addf %87, %88 : vector<8x22x22xf32>
    %90 = arith.addf %70, %72 : vector<8x22x22xf32>
    %cst_28 = arith.constant 9.000000e+00 : f32
    %91 = vector.broadcast %cst_28 : f32 to vector<8x22x22xf32>
    %92 = arith.addf %90, %91 : vector<8x22x22xf32>
    %93 = arith.mulf %89, %92 : vector<8x22x22xf32>
    %94 = tpu.reciprocal %93 {approx = true} : vector<8x22x22xf32> -> vector<8x22x22xf32>
    %95 = arith.mulf %84, %94 : vector<8x22x22xf32>
    %96 = vector.shape_cast %95 : vector<8x22x22xf32> to vector<1x8x22x22xf32>
    %cst_29 = arith.constant dense<0.000000e+00> : vector<1xf32>
    %97 = vector.multi_reduction <add>, %96, %cst_29 [1, 2, 3] : vector<1x8x22x22xf32> to vector<1xf32>
    %98 = vector.shape_cast %97 : vector<1xf32> to vector<1x1x1x1xf32>
    %99 = vector.extract %98[0, 0, 0, 0] : f32 from vector<1x1x1x1xf32>
    %100 = tpu.iota {dimensions = array<i32: 0>} : vector<8x128xi32>
    %c0_i32_30 = arith.constant 0 : i32
    %101 = vector.broadcast %c0_i32_30 : i32 to vector<8x128xi32>
    %102 = arith.cmpi eq, %100, %101 : vector<8x128xi32>
    %c1_i32_31 = arith.constant 1 : i32
    %103 = vector.broadcast %c1_i32_31 : i32 to vector<8x128xi32>
    %104 = arith.cmpi eq, %100, %103 : vector<8x128xi32>
    %c2_i32 = arith.constant 2 : i32
    %105 = vector.broadcast %c2_i32 : i32 to vector<8x128xi32>
    %106 = arith.cmpi eq, %100, %105 : vector<8x128xi32>
    %cst_32 = arith.constant 0.000000e+00 : f32
    %107 = vector.broadcast %99 : f32 to vector<8x128xf32>
    %108 = vector.broadcast %cst_32 : f32 to vector<8x128xf32>
    %109 = arith.select %106, %107, %108 : vector<8x128xi1>, vector<8x128xf32>
    %110 = vector.broadcast %45 : f32 to vector<8x128xf32>
    %111 = arith.select %104, %110, %109 : vector<8x128xi1>, vector<8x128xf32>
    %112 = vector.broadcast %7 : f32 to vector<8x128xf32>
    %113 = arith.select %102, %112, %111 : vector<8x128xi1>, vector<8x128xf32>
    %114 = vector.shape_cast %113 : vector<8x128xf32> to vector<1x8x128xf32>
    %c0_33 = arith.constant 0 : index
    %c0_34 = arith.constant 0 : index
    %c0_35 = arith.constant 0 : index
    %115 = vector.load %arg5[%c0_33, %c0_34, %c0_35] : memref<1x8x128xf32, #tpu.memory_space<vmem>>, vector<1x8x128xf32>
    tpu.vector_store %arg5[%c0_33, %c0_34, %c0_35], %114 {strides = array<i32>} : memref<1x8x128xf32, #tpu.memory_space<vmem>>, vector<1x8x128xf32>,
    return
  }
  func.func @transform_0(%arg0: i32) -> (i32, i32) {
    %c0_i32 = arith.constant 0 : i32
    %c0_i32_0 = arith.constant 0 : i32
    return %arg0, %c0_i32 : i32, i32
  }
  func.func @transform_1(%arg0: i32) -> (i32, i32) {
    %c0_i32 = arith.constant 0 : i32
    %c0_i32_0 = arith.constant 0 : i32
    return %arg0, %c0_i32 : i32, i32
  }
  func.func @transform_2(%arg0: i32) -> (i32, i32) {
    %c0_i32 = arith.constant 0 : i32
    %c0_i32_0 = arith.constant 0 : i32
    %c0_i32_1 = arith.constant 0 : i32
    return %c0_i32, %c0_i32_0 : i32, i32
  }
  func.func @transform_3(%arg0: i32) -> (i32, i32) {
    %c0_i32 = arith.constant 0 : i32
    %c0_i32_0 = arith.constant 0 : i32
    %c0_i32_1 = arith.constant 0 : i32
    return %c0_i32, %c0_i32_0 : i32, i32
  }
  func.func @transform_4(%arg0: i32) -> (i32, i32, i32) {
    %c0_i32 = arith.constant 0 : i32
    %c0_i32_0 = arith.constant 0 : i32
    %c0_i32_1 = arith.constant 0 : i32
    return %arg0, %c0_i32, %c0_i32_0 : i32, i32, i32
  }
}

</mosaic_0001>

<bundles_post_ra>
// kernel: depth_loss.1
= control target key start
LH: loop header
LB: loop body
LE: loop exit
PB: predicated region body
PF: predicated region fallthrough
CT: control target
= control target key end

     0   :  { %vm145_vm0 = vcmask 261120   ;;  %v12072_v34 = vmov 0.0|0.0   ;;  %vm9015_vm1 = vmmov 0   ;;  %v12070_v35 = vmov 0.0   ;;  %s9018_s18 = smov 127   ;;  %s12059_s2 = inlined_call_operand.vmem [shape: f32[32,22], index: 2, kind: input, shape index: {}]   ;;  %s12060_s0 = inlined_call_operand.vmem [shape: f32[256,32], index: 0, kind: input, shape index: {}]   ;;  %s12061_s3 = inlined_call_operand.vmem [shape: f32[22,32], index: 3, kind: input, shape index: {}]   ;;  %s12062_s1 = inlined_call_operand.vmem [shape: f32[256,32], index: 1, kind: input, shape index: {}]   ;;  %s12063_s4 = inlined_call_operand.vmem [shape: f32[1,8,128], index: 4, kind: output, shape index: {}]  }
   0x1   :  { %v1454_v0 = vld [vmem:[%s12059_s2] sm:$0xff]  ;;  %v1455_v1 = vld [vmem:[%s12059_s2 + $0x8] sm:$0xff]  ;;  %v1456_v2 = vld [vmem:[%s12059_s2 + $0x10] sm:$0xff]  ;;  %8607 = vmatprep.subr.bf16.mxu1 %v12072_v34  ;;  %7703 = vmatprep.mubr.msk.f32.mxu1 %vm9015_vm1, %v12070_v35  ;;  %vm250_vm2 = vcmask 1040384   ;;  %vm859_vm3 = vcmask 1046528   ;;  %vm1380_vm7 = vcmask 252928  }
   0x2   :  { %v9053_v3 = vpack.c.bf16 %v1455_v1, %v1454_v0  ;;  %v1457_v4 = vld [vmem:[%s12059_s2 + $0x18] sm:$0xff]  ;;  %v9061_v5 = vld [vmem:[%s12060_s0] sm:$0xff]  ;;  %v9074_v7 = vld [vmem:[%s12060_s0 + $0x8] sm:$0xff]  ;;  %vm1208_vm13 = vcmask 260096   ;;  %vm6827_vm14 = vcmask 179200   ;;  %vm6831_vm15 = vcmask 177152  }
   0x3   :  { %v9063_v6 = vpack.c.bf16 %v1457_v4, %v1456_v2  ;;  %7647 = vmatprep.mubr.msk.f32.mxu0 %vm145_vm0, %v9061_v5  ;;  %v9079_v8 = vld [vmem:[%s12060_s0 + $0x10] sm:$0xff]  ;;  %v9088_v9 = vld [vmem:[%s12060_s0 + $0x18] sm:$0xff]  ;;  %v9093_v10 = vld [vmem:[%s12060_s0 + $0x20] sm:$0xff] }
   0x4   :  { %8600 = vmatprep.subr.bf16.mxu0 %v9053_v3  ;;  %v9102_v11 = vld [vmem:[%s12060_s0 + $0x28] sm:$0xff]  ;;  %v9107_v12 = vld [vmem:[%s12060_s0 + $0x30] sm:$0xff]  ;;  %v9116_v13 = vld [vmem:[%s12060_s0 + $0x38] sm:$0xff] }
   0x5   :  { %8602 = vmatpush3.bf16.msra.mxu0 %v9053_v3  ;;  %v9121_v14 = vld [vmem:[%s12060_s0 + $0x40] sm:$0xff]  ;;  %v9130_v15 = vld [vmem:[%s12060_s0 + $0x48] sm:$0xff]  ;;  %v9135_v16 = vld [vmem:[%s12060_s0 + $0x50] sm:$0xff] }
   0x6   :  { %8604 = vmatprep.subr.bf16.mxu0 %v9063_v6  ;;  %v9144_v17 = vld [vmem:[%s12060_s0 + $0x58] sm:$0xff]  ;;  %v9149_v18 = vld [vmem:[%s12060_s0 + $0x60] sm:$0xff]  ;;  %v9158_v19 = vld [vmem:[%s12060_s0 + $0x68] sm:$0xff] }
   0x7   :  { %v9163_v20 = vld [vmem:[%s12060_s0 + $0x70] sm:$0xff]  ;;  %v9172_v21 = vld [vmem:[%s12060_s0 + $0x78] sm:$0xff]  ;;  %v9177_v22 = vld [vmem:[%s12060_s0 + $0x80] sm:$0xff] }
   0x8   :  { %v9186_v23 = vld [vmem:[%s12060_s0 + $0x88] sm:$0xff]  ;;  %v9191_v24 = vld [vmem:[%s12060_s0 + $0x90] sm:$0xff]  ;;  %v9200_v25 = vld [vmem:[%s12060_s0 + $0x98] sm:$0xff] }
   0x9   :  { %8606 = vmatpush3.bf16.msra.mxu0 %v9063_v6  ;;  %v9205_v26 = vld [vmem:[%s12060_s0 + $0xa0] sm:$0xff]  ;;  %v9214_v27 = vld [vmem:[%s12060_s0 + $0xa8] sm:$0xff]  ;;  %v9219_v28 = vld [vmem:[%s12060_s0 + $0xb0] sm:$0xff] }
   0xa   :  { %v9228_v29 = vld [vmem:[%s12060_s0 + $0xb8] sm:$0xff]  ;;  %v9233_v30 = vld [vmem:[%s12060_s0 + $0xc0] sm:$0xff]  ;;  %v9242_v31 = vld [vmem:[%s12060_s0 + $0xc8] sm:$0xff]  ;;  %8643 = vmatprep.subr.bf16.mxu0 %v12072_v34 }
   0xb   :  { %v9247_v32 = vld [vmem:[%s12060_s0 + $0xd0] sm:$0xff]  ;;  %v9256_v33 = vld [vmem:[%s12060_s0 + $0xd8] sm:$0xff]  ;;  %v9267_v36 = vld [vmem:[%s12060_s0 + $0xe0] sm:$0xff] }
   0xc   :  { %7648 = vmatmul.mubr.msk.f32.vlgmr.msra.gmra.mrb[0].mxu0 %vm145_vm0, %v9074_v7  ;;  %v9274_v37 = vld [vmem:[%s12060_s0 + $0xe8] sm:$0xff]  ;;  %v9281_v38 = vld [vmem:[%s12060_s0 + $0xf0] sm:$0xff]  ;;  %v9288_v39 = vld [vmem:[%s12060_s0 + $0xf8] sm:$0xff] }
   0xd   :  { %7650 = vmatprep.mubr.msk.f32.mxu0 %vm145_vm0, %v9079_v8  ;;  %v9298_v47 = vld [vmem:[%s12061_s3] sm:$0xff]  ;;  %v9308_v51 = vld [vmem:[%s12061_s3 + $0x8] sm:$0xff]  ;;  %v9318_v55 = vld [vmem:[%s12061_s3 + $0x10] sm:$0x3f] }
  0x10   :  { %7651 = vmatmul.mubr.msk.f32.gmra.mrb[2].mxu0 %vm145_vm0, %v9088_v9 }
  0x11   :  { %7653 = vmatprep.mubr.msk.f32.mxu0 %vm145_vm0, %v9093_v10 }
  0x14   :  { %7654 = vmatmul.mubr.msk.f32.gmra.mrb[4].mxu0 %vm145_vm0, %v9102_v11 }
  0x15   :  { %7656 = vmatprep.mubr.msk.f32.mxu0 %vm145_vm0, %v9107_v12 }
  0x18   :  { %7657 = vmatmul.mubr.msk.f32.gmra.mrb[6].mxu0 %vm145_vm0, %v9116_v13 }
  0x19   :  { %7659 = vmatprep.mubr.msk.f32.mxu0 %vm145_vm0, %v9121_v14 }
  0x1c   :  { %7660 = vmatmul.mubr.msk.f32.gmra.mrb[8].mxu0 %vm145_vm0, %v9130_v15 }
  0x1d   :  { %7662 = vmatprep.mubr.msk.f32.mxu0 %vm145_vm0, %v9135_v16 }
  0x20   :  { %7663 = vmatmul.mubr.msk.f32.gmra.mrb[10].mxu0 %vm145_vm0, %v9144_v17 }
  0x21   :  { %7665 = vmatprep.mubr.msk.f32.mxu0 %vm145_vm0, %v9149_v18 }
  0x24   :  { %7666 = vmatmul.mubr.msk.f32.gmra.mrb[12].mxu0 %vm145_vm0, %v9158_v19 }
  0x25   :  { %7668 = vmatprep.mubr.msk.f32.mxu0 %vm145_vm0, %v9163_v20 }
  0x28   :  { %7669 = vmatmul.mubr.msk.f32.gmra.mrb[14].mxu0 %vm145_vm0, %v9172_v21 }
  0x29   :  { %7671 = vmatprep.mubr.msk.f32.mxu0 %vm145_vm0, %v9177_v22 }
  0x2c   :  { %7672 = vmatmul.mubr.msk.f32.gmra.mrb[16].mxu0 %vm145_vm0, %v9186_v23 }
  0x2d   :  { %7674 = vmatprep.mubr.msk.f32.mxu0 %vm145_vm0, %v9191_v24 }
  0x30   :  { %7675 = vmatmul.mubr.msk.f32.gmra.mrb[18].mxu0 %vm145_vm0, %v9200_v25 }
  0x31   :  { %7677 = vmatprep.mubr.msk.f32.mxu0 %vm145_vm0, %v9205_v26 }
  0x34   :  { %7678 = vmatmul.mubr.msk.f32.gmra.mrb[20].mxu0 %vm145_vm0, %v9214_v27 }
  0x35   :  { %7680 = vmatprep.mubr.msk.f32.mxu0 %vm145_vm0, %v9219_v28 }
  0x38   :  { %7681 = vmatmul.mubr.msk.f32.gmra.mrb[22].mxu0 %vm145_vm0, %v9228_v29 }
  0x39   :  { %7683 = vmatprep.mubr.msk.f32.mxu0 %vm145_vm0, %v9233_v30 }
  0x3c   :  { %7684 = vmatmul.mubr.msk.f32.gmra.mrb[24].mxu0 %vm145_vm0, %v9242_v31 }
  0x3d   :  { %7686 = vmatprep.mubr.msk.f32.mxu0 %vm145_vm0, %v9247_v32 }
  0x40   :  { %7687 = vmatmul.mubr.msk.f32.gmra.mrb[26].mxu0 %vm145_vm0, %v9256_v33 }
  0x41   :  { %7689 = vmatprep.mubr.msk.f32.mxu0 %vm145_vm0, %v9267_v36 }
  0x44   :  { %7690 = vmatmul.mubr.msk.f32.gmra.mrb[28].mxu0 %vm145_vm0, %v9274_v37 }
  0x45   :  { %7692 = vmatprep.mubr.msk.f32.mxu0 %vm145_vm0, %v9281_v38 }
  0x48   :  { %7693 = vmatmul.mubr.msk.f32.gmra.mrb[30].mxu0 %vm145_vm0, %v9288_v39 }
  0x49   :  { %7805 = vmatprep.mubr.msk.f32.mxu0 %vm9015_vm1, %v12070_v35 }
  0xdf   :  { %v7649_v40 = vpop.f32.mrb[0].mxu0 }
  0xe0   :  { %v1623_v41 = vpop.f32.mrb[1].mxu0 }
  0xe1   :  { %v8608_v42 = vpack.c.bf16 %v7649_v40, %v1623_v41 }
  0xe3   :  { %v7652_v43 = vpop.f32.mrb[2].mxu0  ;;  %8609 = vmatpush3.bf16.msra.mxu1 %v8608_v42 }
  0xe4   :  { %v1633_v44 = vpop.f32.mrb[3].mxu0  ;;  %8610 = vmatprep.subr.bf16.mxu1 %v12072_v34 }
  0xe5   :  { %v8611_v45 = vpack.c.bf16 %v7652_v43, %v1633_v44 }
  0xe7   :  { %v7655_v46 = vpop.f32.mrb[4].mxu0  ;;  %8612 = vmatpush3.bf16.msra.mxu1 %v8611_v45 }
  0xe8   :  { %v1643_v48 = vpop.f32.mrb[5].mxu0  ;;  %8613 = vmatprep.subr.bf16.mxu1 %v12072_v34 }
  0xe9   :  { %v8614_v49 = vpack.c.bf16 %v7655_v46, %v1643_v48 }
  0xea   :  { %7704 = vmatmul.mubr.msk.f32.vlgmr.msra.gmra.mrb[0].mxu1 %vm145_vm0, %v9298_v47 }
  0xeb   :  { %v7658_v50 = vpop.f32.mrb[6].mxu0  ;;  %8615 = vmatpush3.bf16.msra.mxu1 %v8614_v49  ;;  %7706 = vmatprep.mubr.msk.f32.mxu1 %vm9015_vm1, %v12070_v35 }
  0xec   :  { %v1653_v52 = vpop.f32.mrb[7].mxu0  ;;  %8616 = vmatprep.subr.bf16.mxu1 %v12072_v34 }
  0xed   :  { %v8617_v53 = vpack.c.bf16 %v7658_v50, %v1653_v52 }
  0xee   :  { %7707 = vmatmul.mubr.msk.f32.gmra.mrb[2].mxu1 %vm145_vm0, %v9308_v51 }
  0xef   :  { %v7661_v54 = vpop.f32.mrb[8].mxu0  ;;  %8618 = vmatpush3.bf16.msra.mxu1 %v8617_v53  ;;  %7709 = vmatprep.mubr.msk.f32.mxu1 %vm9015_vm1, %v12070_v35 }
  0xf0   :  { %v1663_v56 = vpop.f32.mrb[9].mxu0  ;;  %8619 = vmatprep.subr.bf16.mxu1 %v12072_v34 }
  0xf1   :  { %v8620_v57 = vpack.c.bf16 %v7661_v54, %v1663_v56 }
  0xf2   :  { %7710 = vmatmul.mubr.msk.f32.gmra.mrb[4].mxu1 %vm145_vm0, %v9318_v55 }
  0xf3   :  { %v7664_v58 = vpop.f32.mrb[10].mxu0  ;;  %7720 = vmatprep.mubr.msk.f32.mxu1 %vm9015_vm1, %v12070_v35 }
  0xf4   :  { %v1673_v59 = vpop.f32.mrb[11].mxu0 }
  0xf5   :  { %v8623_v60 = vpack.c.bf16 %v7664_v58, %v1673_v59 }
  0xf6   :  { %7721 = vmatmul.mubr.msk.f32.vlgmr.msra.gmra.mrb[6].mxu1 %vm145_vm0, %v9298_v47 }
  0xf7   :  { %8621 = vmatpush3.bf16.msra.mxu1 %v8620_v57  ;;  %v7667_v61 = vpop.f32.mrb[12].mxu0  ;;  %7723 = vmatprep.mubr.msk.f32.mxu1 %vm9015_vm1, %v12070_v35 }
  0xf8   :  { %v1683_v62 = vpop.f32.mrb[13].mxu0  ;;  %8622 = vmatprep.subr.bf16.mxu1 %v12072_v34 }
  0xf9   :  { %v8626_v63 = vpack.c.bf16 %v7667_v61, %v1683_v62  ;;  %v50_v61 = vld [vmem:[%s12062_s1 + $0x8] sm:$0xff]  ;;  %v51_v62 = vld [vmem:[%s12062_s1 + $0x10] sm:$0xff] }
  0xfa   :  { %7724 = vmatmul.mubr.msk.f32.gmra.mrb[8].mxu1 %vm145_vm0, %v9308_v51 }
  0xfb   :  { %8624 = vmatpush3.bf16.msra.mxu1 %v8623_v60  ;;  %v7670_v0 = vpop.f32.mrb[14].mxu0  ;;  %7726 = vmatprep.mubr.msk.f32.mxu1 %vm9015_vm1, %v12070_v35  ;;  %v49_v60 = vld [vmem:[%s12062_s1] sm:$0xff] }
  0xfc   :  { %v1693_v1 = vpop.f32.mrb[15].mxu0  ;;  %8625 = vmatprep.subr.bf16.mxu1 %v12072_v34 }
  0xfd   :  { %v8629_v2 = vpack.c.bf16 %v7670_v0, %v1693_v1  ;;  %v53_v0 = vld [vmem:[%s12062_s1 + $0x20] sm:$0xff]  ;;  %v54_v1 = vld [vmem:[%s12062_s1 + $0x28] sm:$0xff] }
  0xfe   :  { %7727 = vmatmul.mubr.msk.f32.gmra.mrb[10].mxu1 %vm145_vm0, %v9318_v55 }
  0xff   :  { %v7673_v4 = vpop.f32.mrb[16].mxu0  ;;  %7737 = vmatprep.mubr.msk.f32.mxu1 %vm9015_vm1, %v12070_v35 }
 0x100   :  { %v1703_v40 = vpop.f32.mrb[17].mxu0 }
 0x101   :  { %v8632_v41 = vpack.c.bf16 %v7673_v4, %v1703_v40  ;;  %v56_v4 = vld [vmem:[%s12062_s1 + $0x38] sm:$0xff]  ;;  %v57_v40 = vld [vmem:[%s12062_s1 + $0x40] sm:$0xff] }
 0x102   :  { %7738 = vmatmul.mubr.msk.f32.vlgmr.msra.gmra.mrb[12].mxu1 %vm145_vm0, %v9298_v47 }
 0x103   :  { %8627 = vmatpush3.bf16.msra.mxu1 %v8626_v63  ;;  %v7676_v42 = vpop.f32.mrb[18].mxu0  ;;  %7740 = vmatprep.mubr.msk.f32.mxu1 %vm9015_vm1, %v12070_v35  ;;  %v52_v63 = vld [vmem:[%s12062_s1 + $0x18] sm:$0xff] }
 0x104   :  { %v1713_v43 = vpop.f32.mrb[19].mxu0  ;;  %8628 = vmatprep.subr.bf16.mxu1 %v12072_v34 }
 0x105   :  { %v8635_v44 = vpack.c.bf16 %v7676_v42, %v1713_v43  ;;  %v59_v42 = vld [vmem:[%s12062_s1 + $0x50] sm:$0xff]  ;;  %v60_v43 = vld [vmem:[%s12062_s1 + $0x58] sm:$0xff] }
 0x106   :  { %7741 = vmatmul.mubr.msk.f32.gmra.mrb[14].mxu1 %vm145_vm0, %v9308_v51 }
 0x107   :  { %8630 = vmatpush3.bf16.msra.mxu1 %v8629_v2  ;;  %v7679_v45 = vpop.f32.mrb[20].mxu0  ;;  %7743 = vmatprep.mubr.msk.f32.mxu1 %vm9015_vm1, %v12070_v35  ;;  %v55_v2 = vld [vmem:[%s12062_s1 + $0x30] sm:$0xff] }
 0x108   :  { %v1723_v46 = vpop.f32.mrb[21].mxu0  ;;  %8631 = vmatprep.subr.bf16.mxu1 %v12072_v34 }
 0x109   :  { %v8638_v48 = vpack.c.bf16 %v7679_v45, %v1723_v46  ;;  %v62_v45 = vld [vmem:[%s12062_s1 + $0x68] sm:$0xff]  ;;  %v63_v46 = vld [vmem:[%s12062_s1 + $0x70] sm:$0xff] }
 0x10a   :  { %7744 = vmatmul.mubr.msk.f32.gmra.mrb[16].mxu1 %vm145_vm0, %v9318_v55 }
 0x10b   :  { %v7682_v49 = vpop.f32.mrb[22].mxu0  ;;  %7754 = vmatprep.mubr.msk.f32.mxu1 %vm9015_vm1, %v12070_v35 }
 0x10c   :  { %v1733_v50 = vpop.f32.mrb[23].mxu0 }
 0x10d   :  { %v8641_v52 = vpack.c.bf16 %v7682_v49, %v1733_v50  ;;  %v65_v49 = vld [vmem:[%s12062_s1 + $0x80] sm:$0xff]  ;;  %v66_v50 = vld [vmem:[%s12062_s1 + $0x88] sm:$0xff] }
 0x10e   :  { %7755 = vmatmul.mubr.msk.f32.vlgmr.msra.gmra.mrb[18].mxu1 %vm145_vm0, %v9298_v47 }
 0x10f   :  { %8633 = vmatpush3.bf16.msra.mxu1 %v8632_v41  ;;  %v7685_v53 = vpop.f32.mrb[24].mxu0  ;;  %7757 = vmatprep.mubr.msk.f32.mxu1 %vm9015_vm1, %v12070_v35  ;;  %v58_v41 = vld [vmem:[%s12062_s1 + $0x48] sm:$0xff] }
 0x110   :  { %v1743_v54 = vpop.f32.mrb[25].mxu0  ;;  %8634 = vmatprep.subr.bf16.mxu1 %v12072_v34 }
 0x111   :  { %v8644_v56 = vpack.c.bf16 %v7685_v53, %v1743_v54  ;;  %v68_v53 = vld [vmem:[%s12062_s1 + $0x98] sm:$0xff]  ;;  %v69_v54 = vld [vmem:[%s12062_s1 + $0xa0] sm:$0xff] }
 0x112   :  { %7758 = vmatmul.mubr.msk.f32.gmra.mrb[20].mxu1 %vm145_vm0, %v9308_v51 }
 0x113   :  { %8636 = vmatpush3.bf16.msra.mxu1 %v8635_v44  ;;  %v7688_v57 = vpop.f32.mrb[26].mxu0  ;;  %8645 = vmatpush3.bf16.msra.mxu0 %v8644_v56  ;;  %v61_v44 = vld [vmem:[%s12062_s1 + $0x60] sm:$0xff]  ;;  %v70_v56 = vld [vmem:[%s12062_s1 + $0xa8] sm:$0xff] }
 0x114   :  { %v1753_v58 = vpop.f32.mrb[27].mxu0  ;;  %7760 = vmatprep.mubr.msk.f32.mxu1 %vm9015_vm1, %v12070_v35  ;;  %8646 = vmatprep.subr.bf16.mxu0 %v12072_v34 }
 0x115   :  { %v8647_v59 = vpack.c.bf16 %v7688_v57, %v1753_v58  ;;  %8637 = vmatprep.subr.bf16.mxu1 %v12072_v34  ;;  %v71_v57 = vld [vmem:[%s12062_s1 + $0xb0] sm:$0xff]  ;;  %v72_v58 = vld [vmem:[%s12062_s1 + $0xb8] sm:$0xff] }
 0x116   :  { %7761 = vmatmul.mubr.msk.f32.gmra.mrb[22].mxu1 %vm145_vm0, %v9318_v55 }
 0x117   :  { %8648 = vmatpush3.bf16.msra.mxu0 %v8647_v59  ;;  %7771 = vmatprep.mubr.msk.f32.mxu1 %vm9015_vm1, %v12070_v35  ;;  %v73_v59 = vld [vmem:[%s12062_s1 + $0xc0] sm:$0xff] }
 0x118   :  { %8656 = vmatprep.subr.bf16.mxu0 %v9053_v3 }
 0x11a   :  { %7772 = vmatmul.mubr.msk.f32.vlgmr.msra.gmra.mrb[24].mxu1 %vm145_vm0, %v9298_v47  ;;  %7806 = vmatmul.mubr.msk.f32.vlgmr.msra.gmra.mrb[32].mxu0 %vm145_vm0, %v9298_v47 }
 0x11b   :  { %8639 = vmatpush3.bf16.msra.mxu1 %v8638_v48  ;;  %7808 = vmatprep.mubr.msk.f32.mxu0 %vm9015_vm1, %v12070_v35  ;;  %v64_v48 = vld [vmem:[%s12062_s1 + $0x78] sm:$0xff] }
 0x11c   :  { %8640 = vmatprep.subr.bf16.mxu1 %v12072_v34  ;;  %8658 = vmatpush3.bf16.msra.mxu0 %v9053_v3 }
 0x11d   :  { %8660 = vmatprep.subr.bf16.mxu0 %v9063_v6  ;;  %7774 = vmatprep.mubr.msk.f32.mxu1 %vm9015_vm1, %v12070_v35 }
 0x11e   :  { %7809 = vmatmul.mubr.msk.f32.gmra.mrb[34].mxu0 %vm145_vm0, %v9308_v51  ;;  %7775 = vmatmul.mubr.msk.f32.gmra.mrb[26].mxu1 %vm145_vm0, %v9308_v51 }
 0x11f   :  { %8642 = vmatpush3.bf16.msra.mxu1 %v8641_v52  ;;  %7811 = vmatprep.mubr.msk.f32.mxu0 %vm9015_vm1, %v12070_v35  ;;  %v67_v52 = vld [vmem:[%s12062_s1 + $0x90] sm:$0xff] }
 0x120   :  { %8662 = vmatpush3.bf16.msra.mxu0 %v9063_v6  ;;  %7777 = vmatprep.mubr.msk.f32.mxu1 %vm9015_vm1, %v12070_v35 }
 0x121   :  { %8649 = vmatprep.subr.bf16.mxu1 %v12072_v34  ;;  %8693 = vmatprep.subr.bf16.mxu0 %v12072_v34 }
 0x122   :  { %7812 = vmatmul.mubr.msk.f32.gmra.mrb[36].mxu0 %vm145_vm0, %v9318_v55  ;;  %7778 = vmatmul.mubr.msk.f32.gmra.mrb[28].mxu1 %vm145_vm0, %v9318_v55 }
 0x123   :  { %7839 = vmatprep.mubr.msk.f32.mxu0 %vm145_vm0, %v49_v60  ;;  %7788 = vmatprep.mubr.msk.f32.mxu1 %vm9015_vm1, %v12070_v35  ;;  %v74_v60 = vld [vmem:[%s12062_s1 + $0xc8] sm:$0xff] }
 0x126   :  { %7840 = vmatmul.mubr.msk.f32.vlgmr.msra.gmra.mrb[38].mxu0 %vm145_vm0, %v50_v61  ;;  %7789 = vmatmul.mubr.msk.f32.vlgmr.msra.gmra.mrb[30].mxu1 %vm145_vm0, %v9298_v47  ;;  %v75_v61 = vld [vmem:[%s12062_s1 + $0xd0] sm:$0xff] }
 0x127   :  { %7842 = vmatprep.mubr.msk.f32.mxu0 %vm145_vm0, %v51_v62  ;;  %7791 = vmatprep.mubr.msk.f32.mxu1 %vm9015_vm1, %v12070_v35  ;;  %v76_v62 = vld [vmem:[%s12062_s1 + $0xd8] sm:$0xff] }
 0x12a   :  { %7843 = vmatmul.mubr.msk.f32.gmra.mrb[40].mxu0 %vm145_vm0, %v52_v63  ;;  %7792 = vmatmul.mubr.msk.f32.gmra.mrb[32].mxu1 %vm145_vm0, %v9308_v51  ;;  %v77_v63 = vld [vmem:[%s12062_s1 + $0xe0] sm:$0xff] }
 0x12b   :  { %7845 = vmatprep.mubr.msk.f32.mxu0 %vm145_vm0, %v53_v0  ;;  %7794 = vmatprep.mubr.msk.f32.mxu1 %vm9015_vm1, %v12070_v35  ;;  %v78_v0 = vld [vmem:[%s12062_s1 + $0xe8] sm:$0xff] }
 0x12e   :  { %7846 = vmatmul.mubr.msk.f32.gmra.mrb[42].mxu0 %vm145_vm0, %v54_v1  ;;  %7795 = vmatmul.mubr.msk.f32.gmra.mrb[34].mxu1 %vm145_vm0, %v9318_v55  ;;  %v79_v1 = vld [vmem:[%s12062_s1 + $0xf0] sm:$0xff] }
 0x12f   :  { %7848 = vmatprep.mubr.msk.f32.mxu0 %vm145_vm0, %v55_v2  ;;  %7822 = vmatprep.mubr.msk.f32.mxu1 %vm9015_vm1, %v12070_v35  ;;  %v80_v2 = vld [vmem:[%s12062_s1 + $0xf8] sm:$0xff] }
 0x132   :  { %7849 = vmatmul.mubr.msk.f32.gmra.mrb[44].mxu0 %vm145_vm0, %v56_v4  ;;  %v7691_v4 = vpop.f32.mrb[28].mxu0 }
 0x133   :  { %7851 = vmatprep.mubr.msk.f32.mxu0 %vm145_vm0, %v57_v40  ;;  %v1763_v40 = vpop.f32.mrb[29].mxu0 }
 0x136   :  { %7852 = vmatmul.mubr.msk.f32.gmra.mrb[46].mxu0 %vm145_vm0, %v58_v41  ;;  %v8650_v41 = vpack.c.bf16 %v7691_v4, %v1763_v40 }
 0x137   :  { %7854 = vmatprep.mubr.msk.f32.mxu0 %vm145_vm0, %v59_v42  ;;  %v7694_v42 = vpop.f32.mrb[30].mxu0 }
 0x138   :  { %8651 = vmatpush3.bf16.msra.mxu1 %v8650_v41 }
 0x139   :  { %8652 = vmatprep.subr.bf16.mxu1 %v12072_v34 }
 0x13a   :  { %7855 = vmatmul.mubr.msk.f32.gmra.mrb[48].mxu0 %vm145_vm0, %v60_v43  ;;  %v1773_v43 = vpop.f32.mrb[31].mxu0 }
 0x13b   :  { %7857 = vmatprep.mubr.msk.f32.mxu0 %vm145_vm0, %v61_v44  ;;  %v8653_v44 = vpack.c.bf16 %v7694_v42, %v1773_v43 }
 0x13d   :  { %8654 = vmatpush3.bf16.msra.mxu1 %v8653_v44 }
 0x13e   :  { %7858 = vmatmul.mubr.msk.f32.gmra.mrb[50].mxu0 %vm145_vm0, %v62_v45  ;;  %8663 = vmatprep.subr.bf16.mxu1 %v12072_v34 }
 0x13f   :  { %7860 = vmatprep.mubr.msk.f32.mxu0 %vm145_vm0, %v63_v46 }
 0x140   :  { %7823 = vmatmul.mubr.msk.f32.vlgmr.msra.gmra.mrb[36].mxu1 %vm145_vm0, %v9298_v47 }
 0x141   :  { %7825 = vmatprep.mubr.msk.f32.mxu1 %vm9015_vm1, %v12070_v35 }
 0x142   :  { %7861 = vmatmul.mubr.msk.f32.gmra.mrb[52].mxu0 %vm145_vm0, %v64_v48 }
 0x143   :  { %7863 = vmatprep.mubr.msk.f32.mxu0 %vm145_vm0, %v65_v49 }
 0x144   :  { %7826 = vmatmul.mubr.msk.f32.gmra.mrb[38].mxu1 %vm145_vm0, %v9308_v51 }
 0x145   :  { %7828 = vmatprep.mubr.msk.f32.mxu1 %vm9015_vm1, %v12070_v35 }
 0x146   :  { %7864 = vmatmul.mubr.msk.f32.gmra.mrb[54].mxu0 %vm145_vm0, %v66_v50 }
 0x147   :  { %7866 = vmatprep.mubr.msk.f32.mxu0 %vm145_vm0, %v67_v52 }
 0x148   :  { %7829 = vmatmul.mubr.msk.f32.gmra.mrb[40].mxu1 %vm145_vm0, %v9318_v55 }
 0x149   :  { %7895 = vmatprep.mubr.msk.f32.mxu1 %vm9015_vm1, %v12070_v35 }
 0x14a   :  { %7867 = vmatmul.mubr.msk.f32.gmra.mrb[56].mxu0 %vm145_vm0, %v68_v53 }
 0x14b   :  { %7869 = vmatprep.mubr.msk.f32.mxu0 %vm145_vm0, %v69_v54 }
 0x14e   :  { %7870 = vmatmul.mubr.msk.f32.gmra.mrb[58].mxu0 %vm145_vm0, %v70_v56 }
 0x14f   :  { %7872 = vmatprep.mubr.msk.f32.mxu0 %vm145_vm0, %v71_v57 }
 0x152   :  { %7873 = vmatmul.mubr.msk.f32.gmra.mrb[60].mxu0 %vm145_vm0, %v72_v58 }
 0x153   :  { %7875 = vmatprep.mubr.msk.f32.mxu0 %vm145_vm0, %v73_v59 }
 0x156   :  { %7876 = vmatmul.mubr.msk.f32.gmra.mrb[62].mxu0 %vm145_vm0, %v74_v60 }
 0x157   :  { %7878 = vmatprep.mubr.msk.f32.mxu0 %vm145_vm0, %v75_v61 }
 0x15a   :  { %7879 = vmatmul.mubr.msk.f32.gmra.mrb[64].mxu0 %vm145_vm0, %v76_v62 }
 0x15b   :  { %7881 = vmatprep.mubr.msk.f32.mxu0 %vm145_vm0, %v77_v63 }
 0x15e   :  { %7882 = vmatmul.mubr.msk.f32.gmra.mrb[66].mxu0 %vm145_vm0, %v78_v0 }
 0x15f   :  { %7884 = vmatprep.mubr.msk.f32.mxu0 %vm145_vm0, %v79_v1 }
 0x162   :  { %7885 = vmatmul.mubr.msk.f32.gmra.mrb[68].mxu0 %vm145_vm0, %v80_v2 }
 0x163   :  { %7980 = vmatprep.mubr.msk.f32.mxu0 %vm9015_vm1, %v12070_v35 }
 0x1bd   :  { %v9563_v63 = vpop.f32.mrb[0].mxu1 }
 0x1be   :  { %v7705_v1 = vpop.f32.mrb[1].mxu1 }
 0x1c1   :  { %v9570_v40 = vpop.f32.mrb[2].mxu1 }
 0x1c2   :  { %v7708_v42 = vpop.f32.mrb[3].mxu1 }
 0x1c5   :  { %v9575_v44 = vpop.f32.mrb[4].mxu1 }
 0x1ed   :  { %v9553_v45 = vpop.f32.mrb[32].mxu0 }
 0x1ee   :  { %12171 = vst [vmem:[#allocation2_spill] sm:$0xff] %v9553_v45  ;;  %v7807_v46 = vpop.f32.mrb[33].mxu0 }
 0x1f1   :  { %v9555_v48 = vpop.f32.mrb[34].mxu0 }
 0x1f2   :  { %12172 = vst [vmem:[#allocation3_spill] sm:$0xff] %v9555_v48  ;;  %v7810_v49 = vpop.f32.mrb[35].mxu0 }
 0x1f3   :  { %v7711_v49 = vpop.f32.mrb[5].mxu1 }
 0x1f5   :  { %v9557_v50 = vpop.f32.mrb[36].mxu0 }
 0x1f6   :  { %12173 = vst [vmem:[#allocation4_spill] sm:$0xff] %v9557_v50  ;;  %v7813_v52 = vpop.f32.mrb[37].mxu0 }
 0x1f7   :  { %v9579_v52 = vpop.f32.mrb[6].mxu1 }
 0x1f9   :  { %v7841_v53 = vpop.f32.mrb[38].mxu0 }
 0x1fa   :  { %v2593_v54 = vpop.f32.mrb[39].mxu0 }
 0x1fb   :  { %v8664_v56 = vpack.c.bf16 %v7841_v53, %v2593_v54  ;;  %v7722_v54 = vpop.f32.mrb[7].mxu1 }
 0x1fd   :  { %v7844_v57 = vpop.f32.mrb[40].mxu0  ;;  %8665 = vmatpush3.bf16.msra.mxu1 %v8664_v56 }
 0x1fe   :  { %v2603_v58 = vpop.f32.mrb[41].mxu0  ;;  %8666 = vmatprep.subr.bf16.mxu1 %v12072_v34 }
 0x1ff   :  { %v8667_v59 = vpack.c.bf16 %v7844_v57, %v2603_v58  ;;  %v9583_v57 = vpop.f32.mrb[8].mxu1 }
 0x201   :  { %8668 = vmatpush3.bf16.msra.mxu1 %v8667_v59  ;;  %v7847_v60 = vpop.f32.mrb[42].mxu0  ;;  %v7725_v59 = vpop.f32.mrb[9].mxu1 }
 0x202   :  { %v2613_v61 = vpop.f32.mrb[43].mxu0  ;;  %8669 = vmatprep.subr.bf16.mxu1 %v12072_v34 }
 0x203   :  { %v8670_v62 = vpack.c.bf16 %v7847_v60, %v2613_v61  ;;  %v9587_v60 = vpop.f32.mrb[10].mxu1 }
 0x204   :  { %7896 = vmatmul.mubr.msk.f32.vlgmr.msra.gmra.mrb[42].mxu1 %vm145_vm0, %v9298_v47 }
 0x205   :  { %7898 = vmatprep.mubr.msk.f32.mxu1 %vm9015_vm1, %v12070_v35  ;;  %v7850_v0 = vpop.f32.mrb[44].mxu0  ;;  %8671 = vmatpush3.bf16.msra.mxu1 %v8670_v62  ;;  %v7728_v62 = vpop.f32.mrb[11].mxu1 }
 0x206   :  { %v2623_v2 = vpop.f32.mrb[45].mxu0  ;;  %8672 = vmatprep.subr.bf16.mxu1 %v12072_v34  ;;  %v9592_v1 = vpop.f32.mrb[12].mxu1 }
 0x207   :  { %v8673_v4 = vpack.c.bf16 %v7850_v0, %v2623_v2 }
 0x208   :  { %7899 = vmatmul.mubr.msk.f32.gmra.mrb[44].mxu1 %vm145_vm0, %v9308_v51 }
 0x209   :  { %7901 = vmatprep.mubr.msk.f32.mxu1 %vm9015_vm1, %v12070_v35  ;;  %8674 = vmatpush3.bf16.msra.mxu1 %v8673_v4  ;;  %v7853_v41 = vpop.f32.mrb[46].mxu0  ;;  %v7739_v4 = vpop.f32.mrb[13].mxu1 }
 0x20a   :  { %v2633_v43 = vpop.f32.mrb[47].mxu0  ;;  %8675 = vmatprep.subr.bf16.mxu1 %v12072_v34 }
 0x20b   :  { %v8676_v46 = vpack.c.bf16 %v7853_v41, %v2633_v43  ;;  %v9596_v41 = vpop.f32.mrb[14].mxu1 }
 0x20c   :  { %7902 = vmatmul.mubr.msk.f32.gmra.mrb[46].mxu1 %vm145_vm0, %v9318_v55  ;;  %v7742_v43 = vpop.f32.mrb[15].mxu1 }
 0x20d   :  { %7912 = vmatprep.mubr.msk.f32.mxu1 %vm9015_vm1, %v12070_v35  ;;  %v7856_v53 = vpop.f32.mrb[48].mxu0  ;;  %v9601_v49 = vpop.f32.mrb[16].mxu1 }
 0x20e   :  { %v2643_v56 = vpop.f32.mrb[49].mxu0  ;;  %v7745_v54 = vpop.f32.mrb[17].mxu1 }
 0x20f   :  { %v8679_v58 = vpack.c.bf16 %v7856_v53, %v2643_v56  ;;  %v9605_v56 = vpop.f32.mrb[18].mxu1 }
 0x210   :  { %7913 = vmatmul.mubr.msk.f32.vlgmr.msra.gmra.mrb[48].mxu1 %vm145_vm0, %v9298_v47 }
 0x211   :  { %7915 = vmatprep.mubr.msk.f32.mxu1 %vm9015_vm1, %v12070_v35  ;;  %8677 = vmatpush3.bf16.msra.mxu1 %v8676_v46  ;;  %v7859_v61 = vpop.f32.mrb[50].mxu0 }
 0x212   :  { %8678 = vmatprep.subr.bf16.mxu1 %v12072_v34  ;;  %v2653_v0 = vpop.f32.mrb[51].mxu0 }
 0x213   :  { %v8682_v2 = vpack.c.bf16 %v7859_v61, %v2653_v0  ;;  %v7756_v61 = vpop.f32.mrb[19].mxu1 }
 0x214   :  { %7916 = vmatmul.mubr.msk.f32.gmra.mrb[50].mxu1 %vm145_vm0, %v9308_v51  ;;  %v9609_v62 = vpop.f32.mrb[20].mxu1 }
 0x215   :  { %7918 = vmatprep.mubr.msk.f32.mxu1 %vm9015_vm1, %v12070_v35  ;;  %8680 = vmatpush3.bf16.msra.mxu1 %v8679_v58  ;;  %v7862_v42 = vpop.f32.mrb[52].mxu0  ;;  %v7759_v4 = vpop.f32.mrb[21].mxu1 }
 0x216   :  { %v2663_v46 = vpop.f32.mrb[53].mxu0  ;;  %8681 = vmatprep.subr.bf16.mxu1 %v12072_v34 }
 0x217   :  { %v8685_v53 = vpack.c.bf16 %v7862_v42, %v2663_v46  ;;  %v9613_v42 = vpop.f32.mrb[22].mxu1 }
 0x218   :  { %7919 = vmatmul.mubr.msk.f32.gmra.mrb[52].mxu1 %vm145_vm0, %v9318_v55  ;;  %v7762_v46 = vpop.f32.mrb[23].mxu1 }
 0x219   :  { %7929 = vmatprep.mubr.msk.f32.mxu1 %vm9015_vm1, %v12070_v35  ;;  %v7865_v59 = vpop.f32.mrb[54].mxu0  ;;  %v9618_v61 = vpop.f32.mrb[24].mxu1 }
 0x21a   :  { %v2673_v58 = vpop.f32.mrb[55].mxu0  ;;  %12174 = vst [vmem:[#allocation5_spill] sm:$0xff] %v9618_v61  ;;  %v7773_v48 = vpop.f32.mrb[25].mxu1 }
 0x21b   :  { %v8688_v0 = vpack.c.bf16 %v7865_v59, %v2673_v58  ;;  %v9622_v59 = vpop.f32.mrb[26].mxu1 }
 0x21c   :  { %7930 = vmatmul.mubr.msk.f32.vlgmr.msra.gmra.mrb[54].mxu1 %vm145_vm0, %v9298_v47  ;;  %12175 = vst [vmem:[#allocation6_spill] sm:$0xff] %v9622_v59  ;;  %v7776_v4 = vpop.f32.mrb[27].mxu1 }
 0x21d   :  { %v7868_v43 = vpop.f32.mrb[56].mxu0  ;;  %7932 = vmatprep.mubr.msk.f32.mxu1 %vm9015_vm1, %v12070_v35  ;;  %8683 = vmatpush3.bf16.msra.mxu1 %v8682_v2  ;;  %v9627_v46 = vpop.f32.mrb[28].mxu1 }
 0x21e   :  { %v2683_v54 = vpop.f32.mrb[57].mxu0  ;;  %8684 = vmatprep.subr.bf16.mxu1 %v12072_v34  ;;  %12176 = vst [vmem:[#allocation7_spill] sm:$0xff] %v9627_v46  ;;  %v7779_v61 = vpop.f32.mrb[29].mxu1 }
 0x21f   :  { %v8691_v50 = vpack.c.bf16 %v7868_v43, %v2683_v54  ;;  %v9631_v48 = vpop.f32.mrb[30].mxu1 }
 0x220   :  { %7933 = vmatmul.mubr.msk.f32.gmra.mrb[56].mxu1 %vm145_vm0, %v9308_v51  ;;  %v7790_v54 = vpop.f32.mrb[31].mxu1 }
 0x221   :  { %v7871_v58 = vpop.f32.mrb[58].mxu0  ;;  %7935 = vmatprep.mubr.msk.f32.mxu1 %vm9015_vm1, %v12070_v35  ;;  %8686 = vmatpush3.bf16.msra.mxu1 %v8685_v53  ;;  %v9636_v4 = vpop.f32.mrb[32].mxu1 }
 0x222   :  { %v2693_v2 = vpop.f32.mrb[59].mxu0  ;;  %8687 = vmatprep.subr.bf16.mxu1 %v12072_v34  ;;  %v7793_v46 = vpop.f32.mrb[33].mxu1 }
 0x223   :  { %v8694_v45 = vpack.c.bf16 %v7871_v58, %v2693_v2  ;;  %v9640_v61 = vpop.f32.mrb[34].mxu1 }
 0x224   :  { %7936 = vmatmul.mubr.msk.f32.gmra.mrb[58].mxu1 %vm145_vm0, %v9318_v55  ;;  %v7796_v58 = vpop.f32.mrb[35].mxu1 }
 0x225   :  { %v7874_v43 = vpop.f32.mrb[60].mxu0  ;;  %8695 = vmatpush3.bf16.msra.mxu0 %v8694_v45  ;;  %7946 = vmatprep.mubr.msk.f32.mxu1 %vm9015_vm1, %v12070_v35 }
 0x226   :  { %v2703_v53 = vpop.f32.mrb[61].mxu0  ;;  %8696 = vmatprep.subr.bf16.mxu0 %v12072_v34 }
 0x227   :  { %v8697_v59 = vpack.c.bf16 %v7874_v43, %v2703_v53 }
 0x228   :  { %7947 = vmatmul.mubr.msk.f32.vlgmr.msra.gmra.mrb[60].mxu1 %vm145_vm0, %v9298_v47 }
 0x229   :  { %8698 = vmatpush3.bf16.msra.mxu0 %v8697_v59  ;;  %7949 = vmatprep.mubr.msk.f32.mxu1 %vm9015_vm1, %v12070_v35  ;;  %v7877_v45 = vpop.f32.mrb[62].mxu0 }
 0x22a   :  { %8689 = vmatpush3.bf16.msra.mxu1 %v8688_v0  ;;  %v2713_v2 = vpop.f32.mrb[63].mxu0  ;;  %8705 = vmatprep.subr.bf16.mxu0 %v12072_v34 }
 0x22b   :  { %v8700_v54 = vpack.c.bf16 %v7877_v45, %v2713_v2  ;;  %8690 = vmatprep.subr.bf16.mxu1 %v12072_v34 }
 0x22c   :  { %7950 = vmatmul.mubr.msk.f32.gmra.mrb[62].mxu1 %vm145_vm0, %v9308_v51  ;;  %7981 = vmatmul.mubr.msk.f32.vlgmr.msra.gmra.mrb[70].mxu0 %vm145_vm0, %v9298_v47 }
 0x22d   :  { %v7880_v46 = vpop.f32.mrb[64].mxu0  ;;  %7952 = vmatprep.mubr.msk.f32.mxu1 %vm9015_vm1, %v12070_v35  ;;  %7983 = vmatprep.mubr.msk.f32.mxu0 %vm9015_vm1, %v12070_v35 }
 0x22e   :  { %v2723_v0 = vpop.f32.mrb[65].mxu0  ;;  %8692 = vmatpush3.bf16.msra.mxu1 %v8691_v50 }
 0x22f   :  { %v8703_v59 = vpack.c.bf16 %v7880_v46, %v2723_v0  ;;  %8699 = vmatprep.subr.bf16.mxu1 %v12072_v34  ;;  %v3392_v46 = vmul.f32 %v9061_v5, %v9061_v5  ;;  %v3394_v5 = vmul.f32 %v9079_v8, %v9079_v8  ;;  %v3398_v8 = vmul.f32 %v9107_v12, %v9107_v12 }
 0x230   :  { %7953 = vmatmul.mubr.msk.f32.gmra.mrb[64].mxu1 %vm145_vm0, %v9318_v55  ;;  %7984 = vmatmul.mubr.msk.f32.gmra.mrb[72].mxu0 %vm145_vm0, %v9308_v51  ;;  %v3402_v12 = vmul.f32 %v9135_v16, %v9135_v16  ;;  %v3406_v16 = vmul.f32 %v9163_v20, %v9163_v20  ;;  %v3410_v20 = vmul.f32 %v9191_v24, %v9191_v24 }
 0x231   :  { %v7883_v43 = vpop.f32.mrb[66].mxu0  ;;  %7963 = vmatprep.mubr.msk.f32.mxu1 %vm9015_vm1, %v12070_v35  ;;  %7986 = vmatprep.mubr.msk.f32.mxu0 %vm9015_vm1, %v12070_v35  ;;  %v3414_v24 = vmul.f32 %v9219_v28, %v9219_v28  ;;  %v3418_v28 = vmul.f32 %v9247_v32, %v9247_v32  ;;  %v3422_v32 = vmul.f32 %v9281_v38, %v9281_v38 }
 0x232   :  { %v2733_v53 = vpop.f32.mrb[67].mxu0  ;;  %v9818_v38 = vmul.f32 %v9563_v63, %v9563_v63 }
 0x233   :  { %v8706_v45 = vpack.c.bf16 %v7883_v43, %v2733_v53  ;;  %v3395_v53 = vmul.f32 %v9088_v9, %v9088_v9  ;;  %v3399_v9 = vmul.f32 %v9116_v13, %v9116_v13  ;;  %v3403_v13 = vmul.f32 %v9144_v17, %v9144_v17 }
 0x234   :  { %7964 = vmatmul.mubr.msk.f32.vlgmr.msra.gmra.mrb[66].mxu1 %vm145_vm0, %v9298_v47  ;;  %7987 = vmatmul.mubr.msk.f32.gmra.mrb[74].mxu0 %vm145_vm0, %v9318_v55  ;;  %v3407_v17 = vmul.f32 %v9172_v21, %v9172_v21  ;;  %v3411_v21 = vmul.f32 %v9200_v25, %v9200_v25  ;;  %v3415_v25 = vmul.f32 %v9228_v29, %v9228_v29 }
 0x235   :  { %v7886_v50 = vpop.f32.mrb[68].mxu0  ;;  %8707 = vmatpush3.bf16.msra.mxu0 %v8706_v45  ;;  %7966 = vmatprep.mubr.msk.f32.mxu1 %vm9015_vm1, %v12070_v35  ;;  %v3419_v29 = vmul.f32 %v9256_v33, %v9256_v33  ;;  %v3423_v33 = vmul.f32 %v9288_v39, %v9288_v39  ;;  %12178 = vst [vmem:[#allocation9_spill] sm:$0xff] %v9818_v38 }
 0x236   :  { %v2743_v58 = vpop.f32.mrb[69].mxu0  ;;  %8708 = vmatprep.subr.bf16.mxu0 %v12072_v34  ;;  %8701 = vmatpush3.bf16.msra.mxu1 %v8700_v54  ;;  %v9697_v54 = vpop.f32.mrb[36].mxu1 }
 0x237   :  { %v8709_v2 = vpack.c.bf16 %v7886_v50, %v2743_v58  ;;  %8014 = vmatprep.mubr.msk.f32.mxu0 %vm9015_vm1, %v12070_v35  ;;  %8702 = vmatprep.subr.bf16.mxu1 %v12072_v34 }
 0x238   :  { %7967 = vmatmul.mubr.msk.f32.gmra.mrb[68].mxu1 %vm145_vm0, %v9308_v51 }
 0x239   :  { %8710 = vmatpush3.bf16.msra.mxu0 %v8709_v2  ;;  %7969 = vmatprep.mubr.msk.f32.mxu1 %vm9015_vm1, %v12070_v35 }
 0x23a   :  { %8704 = vmatpush3.bf16.msra.mxu1 %v8703_v59  ;;  %8719 = vmatprep.subr.bf16.mxu0 %v12072_v34 }
 0x23b   :  { %8712 = vmatprep.subr.bf16.mxu1 %v9053_v3 }
 0x23c   :  { %7970 = vmatmul.mubr.msk.f32.gmra.mrb[70].mxu1 %vm145_vm0, %v9318_v55  ;;  %8015 = vmatmul.mubr.msk.f32.vlgmr.msra.gmra.mrb[76].mxu0 %vm145_vm0, %v9298_v47 }
 0x23d   :  { %7997 = vmatprep.mubr.msk.f32.mxu1 %vm9015_vm1, %v12070_v35  ;;  %8017 = vmatprep.mubr.msk.f32.mxu0 %vm9015_vm1, %v12070_v35 }
 0x240   :  { %7998 = vmatmul.mubr.msk.f32.vlgmr.msra.gmra.mrb[72].mxu1 %vm145_vm0, %v9298_v47  ;;  %8018 = vmatmul.mubr.msk.f32.gmra.mrb[78].mxu0 %vm145_vm0, %v9308_v51  ;;  %v7824_v47 = vpop.f32.mrb[37].mxu1 }
 0x241   :  { %8000 = vmatprep.mubr.msk.f32.mxu1 %vm9015_vm1, %v12070_v35  ;;  %8020 = vmatprep.mubr.msk.f32.mxu0 %vm9015_vm1, %v12070_v35  ;;  %v9710_v0 = vpop.f32.mrb[38].mxu1  ;;  %v6516_v47 = vmul.f32 2.0, %v9570_v40 }
 0x242   :  { %8714 = vmatpush3.bf16.msra.mxu1 %v9053_v3  ;;  %v7827_v59 = vpop.f32.mrb[39].mxu1 }
 0x243   :  { %8716 = vmatprep.subr.bf16.mxu1 %v9063_v6  ;;  %v9720_v43 = vpop.f32.mrb[40].mxu1 }
 0x244   :  { %8001 = vmatmul.mubr.msk.f32.gmra.mrb[74].mxu1 %vm145_vm0, %v9308_v51  ;;  %8021 = vmatmul.mubr.msk.f32.gmra.mrb[80].mxu0 %vm145_vm0, %v9318_v55  ;;  %v3393_v51 = vmul.f32 %v9074_v7, %v9074_v7  ;;  %v7830_v45 = vpop.f32.mrb[41].mxu1  ;;  %v3396_v7 = vmul.f32 %v9093_v10, %v9093_v10  ;;  %v3400_v10 = vmul.f32 %v9121_v14, %v9121_v14 }
 0x245   :  { %8003 = vmatprep.mubr.msk.f32.mxu1 %vm9015_vm1, %v12070_v35  ;;  %8087 = vmatprep.mubr.msk.f32.mxu0 %vm9015_vm1, %v12070_v35  ;;  %v3404_v14 = vmul.f32 %v9149_v18, %v9149_v18  ;;  %v3408_v18 = vmul.f32 %v9177_v22, %v9177_v22  ;;  %v3412_v22 = vmul.f32 %v9205_v26, %v9205_v26 }
 0x246   :  { %8718 = vmatpush3.bf16.msra.mxu1 %v9063_v6  ;;  %v3416_v26 = vmul.f32 %v9233_v30, %v9233_v30  ;;  %v3420_v30 = vmul.f32 %v9267_v36, %v9267_v36  ;;  %v6515_v36 = vmul.f32 2.0, %v9563_v63 }
 0x247   :  { %8749 = vmatprep.subr.bf16.mxu1 %v12072_v34 }
 0x248   :  { %8004 = vmatmul.mubr.msk.f32.gmra.mrb[76].mxu1 %vm145_vm0, %v9318_v55  ;;  %v3397_v55 = vmul.f32 %v9102_v11, %v9102_v11  ;;  %v3401_v11 = vmul.f32 %v9130_v15, %v9130_v15  ;;  %v3405_v15 = vmul.f32 %v9158_v19, %v9158_v19  ;;  %v3409_v19 = vmul.f32 %v9186_v23, %v9186_v23 }
 0x249   :  { %8031 = vmatprep.mubr.msk.f32.mxu1 %vm145_vm0, %v3392_v46  ;;  %v3413_v23 = vmul.f32 %v9214_v27, %v9214_v27  ;;  %v3417_v27 = vmul.f32 %v9242_v31, %v9242_v31  ;;  %v3421_v31 = vmul.f32 %v9274_v37, %v9274_v37 }
 0x24c   :  { %8032 = vmatmul.mubr.msk.f32.vlgmr.msra.gmra.mrb[78].mxu1 %vm145_vm0, %v3393_v51 }
 0x24d   :  { %8034 = vmatprep.mubr.msk.f32.mxu1 %vm145_vm0, %v3394_v5 }
 0x250   :  { %8035 = vmatmul.mubr.msk.f32.gmra.mrb[80].mxu1 %vm145_vm0, %v3395_v53  ;;  %v9834_v53 = vmul.f32 %v9570_v40, %v9570_v40 }
 0x251   :  { %8037 = vmatprep.mubr.msk.f32.mxu1 %vm145_vm0, %v3396_v7 }
 0x252   :  { %12183 = vst [vmem:[#allocation14_spill] sm:$0xff] %v9834_v53 }
 0x254   :  { %8038 = vmatmul.mubr.msk.f32.gmra.mrb[82].mxu1 %vm145_vm0, %v3397_v55 }
 0x255   :  { %8040 = vmatprep.mubr.msk.f32.mxu1 %vm145_vm0, %v3398_v8 }
 0x258   :  { %8041 = vmatmul.mubr.msk.f32.gmra.mrb[84].mxu1 %vm145_vm0, %v3399_v9 }
 0x259   :  { %8043 = vmatprep.mubr.msk.f32.mxu1 %vm145_vm0, %v3400_v10 }
 0x25c   :  { %8044 = vmatmul.mubr.msk.f32.gmra.mrb[86].mxu1 %vm145_vm0, %v3401_v11  ;;  %v9850_v11 = vmul.f32 %v9575_v44, %v9575_v44 }
 0x25d   :  { %8046 = vmatprep.mubr.msk.f32.mxu1 %vm145_vm0, %v3402_v12 }
 0x25e   :  { %12188 = vst [vmem:[#allocation19_spill] sm:$0xff] %v9850_v11 }
 0x260   :  { %8047 = vmatmul.mubr.msk.f32.gmra.mrb[88].mxu1 %vm145_vm0, %v3403_v13 }
 0x261   :  { %8049 = vmatprep.mubr.msk.f32.mxu1 %vm145_vm0, %v3404_v14 }
 0x264   :  { %8050 = vmatmul.mubr.msk.f32.gmra.mrb[90].mxu1 %vm145_vm0, %v3405_v15 }
 0x265   :  { %8052 = vmatprep.mubr.msk.f32.mxu1 %vm145_vm0, %v3406_v16 }
 0x268   :  { %8053 = vmatmul.mubr.msk.f32.gmra.mrb[92].mxu1 %vm145_vm0, %v3407_v17 }
 0x269   :  { %8055 = vmatprep.mubr.msk.f32.mxu1 %vm145_vm0, %v3408_v18  ;;  %v9866_v18 = vmul.f32 %v9579_v52, %v9579_v52 }
 0x26b   :  { %12193 = vst [vmem:[#allocation24_spill] sm:$0xff] %v9866_v18 }
 0x26c   :  { %8056 = vmatmul.mubr.msk.f32.gmra.mrb[94].mxu1 %vm145_vm0, %v3409_v19 }
 0x26d   :  { %8058 = vmatprep.mubr.msk.f32.mxu1 %vm145_vm0, %v3410_v20 }
 0x270   :  { %8059 = vmatmul.mubr.msk.f32.gmra.mrb[96].mxu1 %vm145_vm0, %v3411_v21 }
 0x271   :  { %8061 = vmatprep.mubr.msk.f32.mxu1 %vm145_vm0, %v3412_v22 }
 0x274   :  { %8062 = vmatmul.mubr.msk.f32.gmra.mrb[98].mxu1 %vm145_vm0, %v3413_v23 }
 0x275   :  { %8064 = vmatprep.mubr.msk.f32.mxu1 %vm145_vm0, %v3414_v24 }
 0x278   :  { %8065 = vmatmul.mubr.msk.f32.gmra.mrb[100].mxu1 %vm145_vm0, %v3415_v25  ;;  %v9882_v25 = vmul.f32 %v9583_v57, %v9583_v57 }
 0x279   :  { %8067 = vmatprep.mubr.msk.f32.mxu1 %vm145_vm0, %v3416_v26 }
 0x27a   :  { %12198 = vst [vmem:[#allocation29_spill] sm:$0xff] %v9882_v25 }
 0x27c   :  { %8068 = vmatmul.mubr.msk.f32.gmra.mrb[102].mxu1 %vm145_vm0, %v3417_v27 }
 0x27d   :  { %8070 = vmatprep.mubr.msk.f32.mxu1 %vm145_vm0, %v3418_v28 }
 0x280   :  { %8071 = vmatmul.mubr.msk.f32.gmra.mrb[104].mxu1 %vm145_vm0, %v3419_v29 }
 0x281   :  { %8073 = vmatprep.mubr.msk.f32.mxu1 %vm145_vm0, %v3420_v30 }
 0x284   :  { %8074 = vmatmul.mubr.msk.f32.gmra.mrb[106].mxu1 %vm145_vm0, %v3421_v31 }
 0x285   :  { %8076 = vmatprep.mubr.msk.f32.mxu1 %vm145_vm0, %v3422_v32  ;;  %v9898_v32 = vmul.f32 %v9587_v60, %v9587_v60 }
 0x287   :  { %12203 = vst [vmem:[#allocation34_spill] sm:$0xff] %v9898_v32 }
 0x288   :  { %8077 = vmatmul.mubr.msk.f32.gmra.mrb[108].mxu1 %vm145_vm0, %v3423_v33 }
 0x289   :  { %8172 = vmatprep.mubr.msk.f32.mxu1 %vm9015_vm1, %v12070_v35 }
 0x2d7   :  { %v2818_v37 = vpop.f32.mrb[42].mxu1 }
 0x2d8   :  { %v9814_v50 = vmul.f32 %v6515_v36, %v2818_v37  ;;  %v7897_v58 = vpop.f32.mrb[43].mxu1  ;;  %v9820_v2 = vmul.f32 %v2818_v37, %v2818_v37  ;;  %v9823_v39 = vmul.f32 %v2818_v37, %v9563_v63  ;;  %v6517_v63 = vmul.f32 2.0, %v9575_v44 }
 0x2da   :  { %12177 = vst [vmem:[#allocation8_spill] sm:$0xff] %v9814_v50  ;;  %12179 = vst [vmem:[#allocation10_spill] sm:$0xff] %v9820_v2  ;;  %v9828_v46 = vadd.f32 %v9820_v2, %v9818_v38 }
 0x2db   :  { %12180 = vst [vmem:[#allocation11_spill] sm:$0xff] %v9823_v39  ;;  %v2823_v51 = vpop.f32.mrb[44].mxu1 }
 0x2dc   :  { %12181 = vst [vmem:[#allocation12_spill] sm:$0xff] %v9828_v46  ;;  %v9830_v59 = vmul.f32 %v6516_v47, %v2823_v51  ;;  %v7900_v5 = vpop.f32.mrb[45].mxu1  ;;  %v9836_v45 = vmul.f32 %v2823_v51, %v2823_v51  ;;  %v9839_v7 = vmul.f32 %v2823_v51, %v9570_v40  ;;  %v6518_v40 = vmul.f32 2.0, %v9579_v52 }
 0x2dd   :  { %v9914_v5 = vmul.f32 %v9592_v1, %v9592_v1 }
 0x2de   :  { %12182 = vst [vmem:[#allocation13_spill] sm:$0xff] %v9830_v59  ;;  %12184 = vst [vmem:[#allocation15_spill] sm:$0xff] %v9836_v45  ;;  %v9844_v55 = vadd.f32 %v9836_v45, %v9834_v53 }
 0x2df   :  { %12185 = vst [vmem:[#allocation16_spill] sm:$0xff] %v9839_v7  ;;  %v2828_v8 = vpop.f32.mrb[46].mxu1  ;;  %12208 = vst [vmem:[#allocation39_spill] sm:$0xff] %v9914_v5 }
 0x2e0   :  { %12186 = vst [vmem:[#allocation17_spill] sm:$0xff] %v9844_v55  ;;  %v9846_v9 = vmul.f32 %v6517_v63, %v2828_v8  ;;  %v7903_v10 = vpop.f32.mrb[47].mxu1  ;;  %v9852_v12 = vmul.f32 %v2828_v8, %v2828_v8  ;;  %v9855_v13 = vmul.f32 %v2828_v8, %v9575_v44  ;;  %v6519_v44 = vmul.f32 2.0, %v9583_v57 }
 0x2e2   :  { %12187 = vst [vmem:[#allocation18_spill] sm:$0xff] %v9846_v9  ;;  %12189 = vst [vmem:[#allocation20_spill] sm:$0xff] %v9852_v12  ;;  %v9860_v14 = vadd.f32 %v9852_v12, %v9850_v11 }
 0x2e3   :  { %12190 = vst [vmem:[#allocation21_spill] sm:$0xff] %v9855_v13  ;;  %v2898_v15 = vpop.f32.mrb[48].mxu1 }
 0x2e4   :  { %12191 = vst [vmem:[#allocation22_spill] sm:$0xff] %v9860_v14  ;;  %v9862_v16 = vmul.f32 %v6518_v40, %v2898_v15  ;;  %v7914_v17 = vpop.f32.mrb[49].mxu1  ;;  %v9868_v19 = vmul.f32 %v2898_v15, %v2898_v15  ;;  %v9871_v20 = vmul.f32 %v2898_v15, %v9579_v52  ;;  %v6520_v52 = vmul.f32 2.0, %v9587_v60 }
 0x2e6   :  { %12192 = vst [vmem:[#allocation23_spill] sm:$0xff] %v9862_v16  ;;  %12194 = vst [vmem:[#allocation25_spill] sm:$0xff] %v9868_v19  ;;  %v9876_v21 = vadd.f32 %v9868_v19, %v9866_v18 }
 0x2e7   :  { %12195 = vst [vmem:[#allocation26_spill] sm:$0xff] %v9871_v20  ;;  %v2903_v22 = vpop.f32.mrb[50].mxu1 }
 0x2e8   :  { %12196 = vst [vmem:[#allocation27_spill] sm:$0xff] %v9876_v21  ;;  %v9878_v23 = vmul.f32 %v6519_v44, %v2903_v22  ;;  %v7917_v24 = vpop.f32.mrb[51].mxu1  ;;  %v9884_v26 = vmul.f32 %v2903_v22, %v2903_v22  ;;  %v9887_v27 = vmul.f32 %v2903_v22, %v9583_v57  ;;  %v6521_v57 = vmul.f32 2.0, %v9592_v1 }
 0x2e9   :  { %v9930_v44 = vmul.f32 %v9596_v41, %v9596_v41 }
 0x2ea   :  { %12197 = vst [vmem:[#allocation28_spill] sm:$0xff] %v9878_v23  ;;  %12199 = vst [vmem:[#allocation30_spill] sm:$0xff] %v9884_v26  ;;  %v9892_v28 = vadd.f32 %v9884_v26, %v9882_v25 }
 0x2eb   :  { %12200 = vst [vmem:[#allocation31_spill] sm:$0xff] %v9887_v27  ;;  %v2908_v29 = vpop.f32.mrb[52].mxu1  ;;  %12213 = vst [vmem:[#allocation44_spill] sm:$0xff] %v9930_v44 }
 0x2ec   :  { %12201 = vst [vmem:[#allocation32_spill] sm:$0xff] %v9892_v28  ;;  %v9894_v30 = vmul.f32 %v6520_v52, %v2908_v29  ;;  %v7920_v31 = vpop.f32.mrb[53].mxu1  ;;  %v9900_v33 = vmul.f32 %v2908_v29, %v2908_v29  ;;  %v9903_v36 = vmul.f32 %v2908_v29, %v9587_v60  ;;  %v6522_v60 = vmul.f32 2.0, %v9596_v41 }
 0x2ee   :  { %12202 = vst [vmem:[#allocation33_spill] sm:$0xff] %v9894_v30  ;;  %12204 = vst [vmem:[#allocation35_spill] sm:$0xff] %v9900_v33  ;;  %v9908_v37 = vadd.f32 %v9900_v33, %v9898_v32 }
 0x2ef   :  { %12205 = vst [vmem:[#allocation36_spill] sm:$0xff] %v9903_v36  ;;  %v2978_v58 = vpop.f32.mrb[54].mxu1 }
 0x2f0   :  { %12206 = vst [vmem:[#allocation37_spill] sm:$0xff] %v9908_v37  ;;  %v9910_v47 = vmul.f32 %v6521_v57, %v2978_v58  ;;  %v7931_v51 = vpop.f32.mrb[55].mxu1  ;;  %v9916_v63 = vmul.f32 %v2978_v58, %v2978_v58  ;;  %v9919_v8 = vmul.f32 %v2978_v58, %v9592_v1  ;;  %v6523_v1 = vmul.f32 2.0, %v9601_v49 }
 0x2f1   :  { %v9946_v58 = vmul.f32 %v9601_v49, %v9601_v49 }
 0x2f2   :  { %12207 = vst [vmem:[#allocation38_spill] sm:$0xff] %v9910_v47  ;;  %12209 = vst [vmem:[#allocation40_spill] sm:$0xff] %v9916_v63  ;;  %v9924_v10 = vadd.f32 %v9916_v63, %v9914_v5 }
 0x2f3   :  { %12210 = vst [vmem:[#allocation41_spill] sm:$0xff] %v9919_v8  ;;  %v2983_v40 = vpop.f32.mrb[56].mxu1  ;;  %12218 = vst [vmem:[#allocation49_spill] sm:$0xff] %v9946_v58 }
 0x2f4   :  { %12211 = vst [vmem:[#allocation42_spill] sm:$0xff] %v9924_v10  ;;  %v9926_v15 = vmul.f32 %v6522_v60, %v2983_v40  ;;  %v7934_v17 = vpop.f32.mrb[57].mxu1  ;;  %v9932_v22 = vmul.f32 %v2983_v40, %v2983_v40  ;;  %v9935_v24 = vmul.f32 %v2983_v40, %v9596_v41  ;;  %v6524_v41 = vmul.f32 2.0, %v9605_v56 }
 0x2f6   :  { %12212 = vst [vmem:[#allocation43_spill] sm:$0xff] %v9926_v15  ;;  %12214 = vst [vmem:[#allocation45_spill] sm:$0xff] %v9932_v22  ;;  %v9940_v52 = vadd.f32 %v9932_v22, %v9930_v44 }
 0x2f7   :  { %12215 = vst [vmem:[#allocation46_spill] sm:$0xff] %v9935_v24  ;;  %v2988_v29 = vpop.f32.mrb[58].mxu1 }
 0x2f8   :  { %12216 = vst [vmem:[#allocation47_spill] sm:$0xff] %v9940_v52  ;;  %v9942_v31 = vmul.f32 %v6523_v1, %v2988_v29  ;;  %v7937_v57 = vpop.f32.mrb[59].mxu1  ;;  %v9948_v51 = vmul.f32 %v2988_v29, %v2988_v29  ;;  %v9951_v60 = vmul.f32 %v2988_v29, %v9601_v49  ;;  %v6525_v49 = vmul.f32 2.0, %v9609_v62 }
 0x2f9   :  { %v9962_v57 = vmul.f32 %v9605_v56, %v9605_v56  ;;  %v6530_v29 = vmul.f32 2.0, %v9631_v48 }
 0x2fa   :  { %12217 = vst [vmem:[#allocation48_spill] sm:$0xff] %v9942_v31  ;;  %12219 = vst [vmem:[#allocation50_spill] sm:$0xff] %v9948_v51  ;;  %v9956_v40 = vadd.f32 %v9948_v51, %v9946_v58 }
 0x2fb   :  { %12220 = vst [vmem:[#allocation51_spill] sm:$0xff] %v9951_v60  ;;  %v3058_v17 = vpop.f32.mrb[60].mxu1  ;;  %12223 = vst [vmem:[#allocation54_spill] sm:$0xff] %v9962_v57 }
 0x2fc   :  { %12221 = vst [vmem:[#allocation52_spill] sm:$0xff] %v9956_v40  ;;  %v9958_v35 = vmul.f32 %v6524_v41, %v3058_v17  ;;  %v7948_v1 = vpop.f32.mrb[61].mxu1  ;;  %v9964_v34 = vmul.f32 %v3058_v17, %v3058_v17  ;;  %v9967_v31 = vmul.f32 %v3058_v17, %v9605_v56  ;;  %v9981_v56 = vmul.f32 %v9609_v62, %v9609_v62 }
 0x2fe   :  { %12222 = vst [vmem:[#allocation53_spill] sm:$0xff] %v9958_v35  ;;  %12224 = vst [vmem:[#allocation55_spill] sm:$0xff] %v9964_v34  ;;  %v9973_v60 = vadd.f32 %v9964_v34, %v9962_v57 }
 0x2ff   :  { %12225 = vst [vmem:[#allocation56_spill] sm:$0xff] %v9967_v31  ;;  %v3063_v41 = vpop.f32.mrb[62].mxu1  ;;  %v3218_v35 = vpop.f32.mrb[70].mxu0  ;;  %12229 = vst [vmem:[#allocation60_spill] sm:$0xff] %v9981_v56  ;;  %v9987_v31 = vmul.f32 %v9631_v48, %v9631_v48 }
 0x300   :  { %12226 = vst [vmem:[#allocation57_spill] sm:$0xff] %v9973_v60  ;;  %v9975_v1 = vmul.f32 %v6525_v49, %v3063_v41  ;;  %v9977_v15 = vmul.f32 %v6530_v29, %v3218_v35  ;;  %v7951_v24 = vpop.f32.mrb[63].mxu1  ;;  %v7982_v47 = vpop.f32.mrb[71].mxu0  ;;  %v9983_v17 = vmul.f32 %v3063_v41, %v3063_v41  ;;  %v9989_v8 = vmul.f32 %v3218_v35, %v3218_v35 }
 0x301   :  { %12231 = vst [vmem:[#allocation62_spill] sm:$0xff] %v9987_v31  ;;  %v9992_v30 = vmul.f32 %v3063_v41, %v9609_v62  ;;  %v9995_v49 = vmul.f32 %v3218_v35, %v9631_v48  ;;  %v6526_v47 = vmul.f32 2.0, %v9613_v42  ;;  %v6531_v24 = vmul.f32 2.0, %v9636_v4 }
 0x302   :  { %12227 = vst [vmem:[#allocation58_spill] sm:$0xff] %v9975_v1  ;;  %12228 = vst [vmem:[#allocation59_spill] sm:$0xff] %v9977_v15  ;;  %v10001_v29 = vadd.f32 %v9983_v17, %v9981_v56  ;;  %v10005_v36 = vadd.f32 %v9989_v8, %v9987_v31  ;;  %v10013_v41 = vmul.f32 %v9613_v42, %v9613_v42 }
 0x303   :  { %12230 = vst [vmem:[#allocation61_spill] sm:$0xff] %v9983_v17  ;;  %12232 = vst [vmem:[#allocation63_spill] sm:$0xff] %v9989_v8  ;;  %v3068_v15 = vpop.f32.mrb[64].mxu1  ;;  %v3223_v1 = vpop.f32.mrb[72].mxu0 }
 0x304   :  { %12233 = vst [vmem:[#allocation64_spill] sm:$0xff] %v9992_v30  ;;  %12234 = vst [vmem:[#allocation65_spill] sm:$0xff] %v9995_v49  ;;  %v10007_v23 = vmul.f32 %v6526_v47, %v3068_v15  ;;  %v10009_v62 = vmul.f32 %v6531_v24, %v3223_v1  ;;  %v7954_v35 = vpop.f32.mrb[65].mxu1  ;;  %v7985_v48 = vpop.f32.mrb[73].mxu0  ;;  %v10015_v49 = vmul.f32 %v3068_v15, %v3068_v15  ;;  %v12245_v24 = vld [vmem:[#allocation5_spill] sm:$0xff] }
 0x305   :  { %12235 = vst [vmem:[#allocation66_spill] sm:$0xff] %v10001_v29  ;;  %12236 = vst [vmem:[#allocation67_spill] sm:$0xff] %v10005_v36  ;;  %v10019_v30 = vmul.f32 %v9636_v4, %v9636_v4  ;;  %v10021_v27 = vmul.f32 %v3223_v1, %v3223_v1  ;;  %v10024_v16 = vmul.f32 %v3068_v15, %v9613_v42  ;;  %v6527_v35 = vmul.f32 2.0, %v12245_v24 }
 0x306   :  { %12237 = vst [vmem:[#allocation68_spill] sm:$0xff] %v10007_v23  ;;  %12238 = vst [vmem:[#allocation69_spill] sm:$0xff] %v10009_v62  ;;  %v10027_v47 = vmul.f32 %v3223_v1, %v9636_v4  ;;  %v6532_v48 = vmul.f32 2.0, %v9640_v61  ;;  %v10033_v62 = vadd.f32 %v10015_v49, %v10013_v41  ;;  %v10045_v1 = vmul.f32 %v12245_v24, %v12245_v24 }
 0x307   :  { %12239 = vst [vmem:[#allocation70_spill] sm:$0xff] %v10013_v41  ;;  %12240 = vst [vmem:[#allocation71_spill] sm:$0xff] %v10015_v49  ;;  %v3138_v23 = vpop.f32.mrb[66].mxu1  ;;  %v3228_v20 = vpop.f32.mrb[74].mxu0  ;;  %v10037_v9 = vadd.f32 %v10021_v27, %v10019_v30 }
 0x308   :  { %12241 = vst [vmem:[#allocation72_spill] sm:$0xff] %v10019_v30  ;;  %12242 = vst [vmem:[#allocation73_spill] sm:$0xff] %v10021_v27  ;;  %v10039_v13 = vmul.f32 %v6527_v35, %v3138_v23  ;;  %v10041_v42 = vmul.f32 %v6532_v48, %v3228_v20  ;;  %v7965_v4 = vpop.f32.mrb[67].mxu1  ;;  %v7988_v15 = vpop.f32.mrb[75].mxu0  ;;  %v10053_v59 = vmul.f32 %v3228_v20, %v3228_v20  ;;  %v12256_v48 = vld [vmem:[#allocation6_spill] sm:$0xff] }
 0x309   :  { %12243 = vst [vmem:[#allocation74_spill] sm:$0xff] %v10024_v16  ;;  %12244 = vst [vmem:[#allocation75_spill] sm:$0xff] %v10027_v47  ;;  %v10047_v47 = vmul.f32 %v3138_v23, %v3138_v23  ;;  %v10051_v16 = vmul.f32 %v9640_v61, %v9640_v61  ;;  %v10056_v7 = vmul.f32 %v3138_v23, %v12245_v24  ;;  %v6528_v4 = vmul.f32 2.0, %v12256_v48  ;;  %v12263_v24 = vld [vmem:[#allocation7_spill] sm:$0xff] }
 0x30a   :  { %12246 = vst [vmem:[#allocation5_spill] sm:$0xff] %v10033_v62  ;;  %12247 = vst [vmem:[#allocation76_spill] sm:$0xff] %v10037_v9  ;;  %v10059_v35 = vmul.f32 %v3228_v20, %v9640_v61  ;;  %v10074_v23 = vmul.f32 %v12256_v48, %v12256_v48 }
 0x30b   :  { %12248 = vst [vmem:[#allocation77_spill] sm:$0xff] %v10039_v13  ;;  %12249 = vst [vmem:[#allocation78_spill] sm:$0xff] %v10041_v42  ;;  %v10064_v15 = vadd.f32 %v10047_v47, %v10045_v1  ;;  %v3143_v42 = vpop.f32.mrb[68].mxu1  ;;  %v10068_v13 = vadd.f32 %v10053_v59, %v10051_v16 }
 0x30c   :  { %12250 = vst [vmem:[#allocation79_spill] sm:$0xff] %v10045_v1  ;;  %12251 = vst [vmem:[#allocation80_spill] sm:$0xff] %v10047_v47  ;;  %v10070_v50 = vmul.f32 %v6528_v4, %v3143_v42  ;;  %v7968_v39 = vpop.f32.mrb[69].mxu1  ;;  %v10076_v61 = vmul.f32 %v3143_v42, %v3143_v42  ;;  %v10079_v20 = vmul.f32 %v3143_v42, %v12256_v48 }
 0x30d   :  { %12252 = vst [vmem:[#allocation81_spill] sm:$0xff] %v10051_v16  ;;  %12253 = vst [vmem:[#allocation82_spill] sm:$0xff] %v10053_v59  ;;  %v10093_v42 = vmul.f32 %v12263_v24, %v12263_v24 }
 0x30e   :  { %12254 = vst [vmem:[#allocation83_spill] sm:$0xff] %v10056_v7  ;;  %12255 = vst [vmem:[#allocation84_spill] sm:$0xff] %v10059_v35  ;;  %v6529_v35 = vmul.f32 2.0, %v12263_v24  ;;  %v6536_v7 = vmul.f32 2.0, %v9697_v54 }
 0x30f   :  { %12257 = vst [vmem:[#allocation6_spill] sm:$0xff] %v10064_v15  ;;  %12258 = vst [vmem:[#allocation85_spill] sm:$0xff] %v10068_v13  ;;  %v10085_v15 = vadd.f32 %v10076_v61, %v10074_v23  ;;  %v3148_v4 = vpop.f32.mrb[70].mxu1 }
 0x310   :  { %12259 = vst [vmem:[#allocation86_spill] sm:$0xff] %v10070_v50  ;;  %12260 = vst [vmem:[#allocation87_spill] sm:$0xff] %v10074_v23  ;;  %v3378_v50 = vpop.f32.mrb[76].mxu0  ;;  %v10087_v39 = vmul.f32 %v6529_v35, %v3148_v4  ;;  %v7971_v9 = vpop.f32.mrb[71].mxu1  ;;  %v10095_v48 = vmul.f32 %v3148_v4, %v3148_v4  ;;  %v6537_v35 = vmul.f32 2.0, %v9710_v0 }
 0x311   :  { %12261 = vst [vmem:[#allocation88_spill] sm:$0xff] %v10076_v61  ;;  %12262 = vst [vmem:[#allocation89_spill] sm:$0xff] %v10079_v20  ;;  %v10089_v13 = vmul.f32 %v6536_v7, %v3378_v50  ;;  %v8016_v59 = vpop.f32.mrb[77].mxu0  ;;  %v10099_v20 = vmul.f32 %v9697_v54, %v9697_v54  ;;  %v10101_v61 = vmul.f32 %v3378_v50, %v3378_v50  ;;  %v12273_v9 = vld [vmem:[#allocation2_spill] sm:$0xff] }
 0x312   :  { %12264 = vst [vmem:[#allocation7_spill] sm:$0xff] %v10085_v15  ;;  %12265 = vst [vmem:[#allocation90_spill] sm:$0xff] %v10087_v39  ;;  %v10104_v15 = vmul.f32 %v3148_v4, %v12263_v24  ;;  %v10107_v7 = vmul.f32 %v3378_v50, %v9697_v54  ;;  %v6533_v59 = vmul.f32 2.0, %v12273_v9  ;;  %v10125_v4 = vmul.f32 %v12273_v9, %v12273_v9 }
 0x313   :  { %12266 = vst [vmem:[#allocation91_spill] sm:$0xff] %v10089_v13  ;;  %12267 = vst [vmem:[#allocation92_spill] sm:$0xff] %v10093_v42  ;;  %v10113_v13 = vadd.f32 %v10095_v48, %v10093_v42  ;;  %v3298_v39 = vpop.f32.mrb[72].mxu1  ;;  %v3383_v47 = vpop.f32.mrb[78].mxu0  ;;  %v10117_v62 = vadd.f32 %v10101_v61, %v10099_v20 }
 0x314   :  { %12268 = vst [vmem:[#allocation93_spill] sm:$0xff] %v10095_v48  ;;  %12269 = vst [vmem:[#allocation94_spill] sm:$0xff] %v10099_v20  ;;  %v10119_v27 = vmul.f32 %v6533_v59, %v3298_v39  ;;  %v10121_v24 = vmul.f32 %v6537_v35, %v3383_v47  ;;  %v7999_v54 = vpop.f32.mrb[73].mxu1  ;;  %v8019_v50 = vpop.f32.mrb[79].mxu0  ;;  %v10139_v59 = vmul.f32 %v3298_v39, %v12273_v9  ;;  %v12284_v35 = vld [vmem:[#allocation3_spill] sm:$0xff] }
 0x315   :  { %12270 = vst [vmem:[#allocation95_spill] sm:$0xff] %v10101_v61  ;;  %12271 = vst [vmem:[#allocation96_spill] sm:$0xff] %v10104_v15  ;;  %v10131_v15 = vmul.f32 %v9710_v0, %v9710_v0  ;;  %v6534_v54 = vmul.f32 2.0, %v12284_v35  ;;  %v6538_v50 = vmul.f32 2.0, %v9720_v43  ;;  %v10157_v9 = vmul.f32 %v12284_v35, %v12284_v35 }
 0x316   :  { %12272 = vst [vmem:[#allocation97_spill] sm:$0xff] %v10107_v7  ;;  %12274 = vst [vmem:[#allocation2_spill] sm:$0xff] %v10113_v13  ;;  %v10127_v7 = vmul.f32 %v3298_v39, %v3298_v39  ;;  %v10133_v13 = vmul.f32 %v3383_v47, %v3383_v47 }
 0x317   :  { %12275 = vst [vmem:[#allocation98_spill] sm:$0xff] %v10117_v62  ;;  %12276 = vst [vmem:[#allocation99_spill] sm:$0xff] %v10119_v27  ;;  %v10136_v62 = vmul.f32 %v3383_v47, %v9710_v0  ;;  %v3388_v61 = vpop.f32.mrb[80].mxu0 }
 0x318   :  { %12277 = vst [vmem:[#allocation100_spill] sm:$0xff] %v10121_v24  ;;  %12278 = vst [vmem:[#allocation101_spill] sm:$0xff] %v10125_v4  ;;  %v10145_v27 = vadd.f32 %v10127_v7, %v10125_v4  ;;  %v3303_v24 = vpop.f32.mrb[74].mxu1  ;;  %v10149_v48 = vadd.f32 %v10133_v13, %v10131_v15  ;;  %v10153_v0 = vmul.f32 %v6538_v50, %v3388_v61  ;;  %v8022_v39 = vpop.f32.mrb[81].mxu0  ;;  %v12295_v50 = vld [vmem:[#allocation4_spill] sm:$0xff] }
 0x319   :  { %12279 = vst [vmem:[#allocation102_spill] sm:$0xff] %v10127_v7  ;;  %12280 = vst [vmem:[#allocation103_spill] sm:$0xff] %v10131_v15  ;;  %v10151_v49 = vmul.f32 %v6534_v54, %v3303_v24  ;;  %v8002_v47 = vpop.f32.mrb[75].mxu1  ;;  %v10171_v54 = vmul.f32 %v3303_v24, %v12284_v35 }
 0x31a   :  { %12281 = vst [vmem:[#allocation104_spill] sm:$0xff] %v10133_v13  ;;  %12282 = vst [vmem:[#allocation105_spill] sm:$0xff] %v10136_v62  ;;  %v10163_v62 = vmul.f32 %v9720_v43, %v9720_v43  ;;  %v6535_v47 = vmul.f32 2.0, %v12295_v50 }
 0x31b   :  { %12283 = vst [vmem:[#allocation106_spill] sm:$0xff] %v10139_v59  ;;  %12285 = vst [vmem:[#allocation3_spill] sm:$0xff] %v10145_v27  ;;  %v10159_v59 = vmul.f32 %v3303_v24, %v3303_v24  ;;  %v10165_v27 = vmul.f32 %v3388_v61, %v3388_v61 }
 0x31c   :  { %12286 = vst [vmem:[#allocation107_spill] sm:$0xff] %v10149_v48  ;;  %12287 = vst [vmem:[#allocation108_spill] sm:$0xff] %v10151_v49  ;;  %v10168_v48 = vmul.f32 %v3388_v61, %v9720_v43  ;;  %v3308_v49 = vpop.f32.mrb[76].mxu1  ;;  %v10186_v43 = vmul.f32 %v12295_v50, %v12295_v50 }
 0x31d   :  { %12288 = vst [vmem:[#allocation109_spill] sm:$0xff] %v10153_v0  ;;  %12289 = vst [vmem:[#allocation110_spill] sm:$0xff] %v10157_v9  ;;  %v10176_v39 = vadd.f32 %v10159_v59, %v10157_v9  ;;  %v10180_v0 = vadd.f32 %v10165_v27, %v10163_v62  ;;  %v10182_v13 = vmul.f32 %v6535_v47, %v3308_v49  ;;  %v8005_v7 = vpop.f32.mrb[77].mxu1 }
 0x31e   :  { %12290 = vst [vmem:[#allocation111_spill] sm:$0xff] %v10159_v59  ;;  %12291 = vst [vmem:[#allocation112_spill] sm:$0xff] %v10163_v62  ;;  %v10188_v61 = vmul.f32 %v3308_v49, %v3308_v49  ;;  %v10191_v24 = vmul.f32 %v3308_v49, %v12295_v50  ;;  %v12303_v7 = vmov 0.0|0.0   ;;  %v10202_v50 = vld [vmem:[%s12061_s3] sm:$0xff] }
 0x31f   :  { %12292 = vst [vmem:[#allocation113_spill] sm:$0xff] %v10165_v27  ;;  %12293 = vst [vmem:[#allocation114_spill] sm:$0xff] %v10168_v48 }
 0x320   :  { %12294 = vst [vmem:[#allocation115_spill] sm:$0xff] %v10171_v54  ;;  %12296 = vst [vmem:[#allocation4_spill] sm:$0xff] %v10176_v39  ;;  %v10195_v35 = vadd.f32 %v10188_v61, %v10186_v43  ;;  %v8033_v54 = vpop.f32.mrb[78].mxu1 }
 0x321   :  { %12297 = vst [vmem:[#allocation116_spill] sm:$0xff] %v10180_v0  ;;  %12298 = vst [vmem:[#allocation117_spill] sm:$0xff] %v10182_v13  ;;  %v3586_v48 = vpop.f32.mrb[79].mxu1 }
 0x322   :  { %12299 = vst [vmem:[#allocation118_spill] sm:$0xff] %v10186_v43  ;;  %12300 = vst [vmem:[#allocation119_spill] sm:$0xff] %v10188_v61  ;;  %v8720_v39 = vpack.c.bf16 %v8033_v54, %v3586_v48  ;;  %v12304_v48 = vmov 0.0  }
 0x323   :  { %12301 = vst [vmem:[#allocation120_spill] sm:$0xff] %v10191_v24  ;;  %12302 = vst [vmem:[#allocation121_spill] sm:$0xff] %v10195_v35  ;;  %v8036_v0 = vpop.f32.mrb[80].mxu1 }
 0x324   :  { %8721 = vmatpush3.bf16.msra.mxu0 %v8720_v39  ;;  %v3596_v47 = vpop.f32.mrb[81].mxu1 }
 0x325   :  { %8722 = vmatprep.subr.bf16.mxu0 %v12303_v7  ;;  %v8723_v13 = vpack.c.bf16 %v8036_v0, %v3596_v47 }
 0x327   :  { %v8039_v27 = vpop.f32.mrb[82].mxu1 }
 0x328   :  { %8724 = vmatpush3.bf16.msra.mxu0 %v8723_v13  ;;  %v3606_v59 = vpop.f32.mrb[83].mxu1 }
 0x329   :  { %8725 = vmatprep.subr.bf16.mxu0 %v12303_v7  ;;  %v8726_v49 = vpack.c.bf16 %v8039_v27, %v3606_v59  ;;  %v10212_v27 = vld [vmem:[%s12061_s3 + $0x8] sm:$0xff] }
 0x32b   :  { %8088 = vmatmul.mubr.msk.f32.vlgmr.msra.gmra.mrb[82].mxu0 %vm145_vm0, %v10202_v50  ;;  %v8042_v54 = vpop.f32.mrb[84].mxu1 }
 0x32c   :  { %8090 = vmatprep.mubr.msk.f32.mxu0 %vm9015_vm1, %v12304_v48  ;;  %8727 = vmatpush3.bf16.msra.mxu0 %v8726_v49  ;;  %v3616_v0 = vpop.f32.mrb[85].mxu1  ;;  %v10222_v49 = vld [vmem:[%s12061_s3 + $0x10] sm:$0x3f] }
 0x32d   :  { %8728 = vmatprep.subr.bf16.mxu0 %v12303_v7  ;;  %v8729_v13 = vpack.c.bf16 %v8042_v54, %v3616_v0 }
 0x32f   :  { %8091 = vmatmul.mubr.msk.f32.gmra.mrb[84].mxu0 %vm145_vm0, %v10212_v27  ;;  %v8045_v59 = vpop.f32.mrb[86].mxu1 }
 0x330   :  { %8093 = vmatprep.mubr.msk.f32.mxu0 %vm9015_vm1, %v12304_v48  ;;  %8730 = vmatpush3.bf16.msra.mxu0 %v8729_v13  ;;  %v3626_v39 = vpop.f32.mrb[87].mxu1 }
 0x331   :  { %8731 = vmatprep.subr.bf16.mxu0 %v12303_v7  ;;  %v8732_v47 = vpack.c.bf16 %v8045_v59, %v3626_v39 }
 0x333   :  { %8094 = vmatmul.mubr.msk.f32.gmra.mrb[86].mxu0 %vm145_vm0, %v10222_v49  ;;  %v8048_v54 = vpop.f32.mrb[88].mxu1 }
 0x334   :  { %8104 = vmatprep.mubr.msk.f32.mxu0 %vm9015_vm1, %v12304_v48  ;;  %v3636_v0 = vpop.f32.mrb[89].mxu1 }
 0x335   :  { %v8735_v24 = vpack.c.bf16 %v8048_v54, %v3636_v0 }
 0x337   :  { %8105 = vmatmul.mubr.msk.f32.vlgmr.msra.gmra.mrb[88].mxu0 %vm145_vm0, %v10202_v50  ;;  %v8051_v13 = vpop.f32.mrb[90].mxu1 }
 0x338   :  { %8107 = vmatprep.mubr.msk.f32.mxu0 %vm9015_vm1, %v12304_v48  ;;  %8733 = vmatpush3.bf16.msra.mxu0 %v8732_v47  ;;  %v3646_v59 = vpop.f32.mrb[91].mxu1 }
 0x339   :  { %8734 = vmatprep.subr.bf16.mxu0 %v12303_v7  ;;  %v8738_v39 = vpack.c.bf16 %v8051_v13, %v3646_v59 }
 0x33b   :  { %8108 = vmatmul.mubr.msk.f32.gmra.mrb[90].mxu0 %vm145_vm0, %v10212_v27  ;;  %v8054_v54 = vpop.f32.mrb[92].mxu1 }
 0x33c   :  { %8110 = vmatprep.mubr.msk.f32.mxu0 %vm9015_vm1, %v12304_v48  ;;  %8736 = vmatpush3.bf16.msra.mxu0 %v8735_v24  ;;  %v3656_v0 = vpop.f32.mrb[93].mxu1 }
 0x33d   :  { %8737 = vmatprep.subr.bf16.mxu0 %v12303_v7  ;;  %v8741_v35 = vpack.c.bf16 %v8054_v54, %v3656_v0 }
 0x33f   :  { %8111 = vmatmul.mubr.msk.f32.gmra.mrb[92].mxu0 %vm145_vm0, %v10222_v49  ;;  %v8057_v47 = vpop.f32.mrb[94].mxu1 }
 0x340   :  { %8121 = vmatprep.mubr.msk.f32.mxu0 %vm9015_vm1, %v12304_v48  ;;  %v3666_v13 = vpop.f32.mrb[95].mxu1 }
 0x341   :  { %v8744_v59 = vpack.c.bf16 %v8057_v47, %v3666_v13 }
 0x343   :  { %8122 = vmatmul.mubr.msk.f32.vlgmr.msra.gmra.mrb[94].mxu0 %vm145_vm0, %v10202_v50  ;;  %v8060_v61 = vpop.f32.mrb[96].mxu1 }
 0x344   :  { %8124 = vmatprep.mubr.msk.f32.mxu0 %vm9015_vm1, %v12304_v48  ;;  %8739 = vmatpush3.bf16.msra.mxu0 %v8738_v39  ;;  %v3676_v24 = vpop.f32.mrb[97].mxu1 }
 0x345   :  { %8740 = vmatprep.subr.bf16.mxu0 %v12303_v7  ;;  %v8747_v54 = vpack.c.bf16 %v8060_v61, %v3676_v24 }
 0x347   :  { %8125 = vmatmul.mubr.msk.f32.gmra.mrb[96].mxu0 %vm145_vm0, %v10212_v27  ;;  %v8063_v0 = vpop.f32.mrb[98].mxu1 }
 0x348   :  { %8127 = vmatprep.mubr.msk.f32.mxu0 %vm9015_vm1, %v12304_v48  ;;  %8742 = vmatpush3.bf16.msra.mxu0 %v8741_v35  ;;  %v3686_v47 = vpop.f32.mrb[99].mxu1 }
 0x349   :  { %8743 = vmatprep.subr.bf16.mxu0 %v12303_v7  ;;  %v8750_v13 = vpack.c.bf16 %v8063_v0, %v3686_v47 }
 0x34b   :  { %8128 = vmatmul.mubr.msk.f32.gmra.mrb[98].mxu0 %vm145_vm0, %v10222_v49  ;;  %v8066_v39 = vpop.f32.mrb[100].mxu1  ;;  %8751 = vmatpush3.bf16.msra.mxu1 %v8750_v13 }
 0x34c   :  { %8138 = vmatprep.mubr.msk.f32.mxu0 %vm9015_vm1, %v12304_v48  ;;  %v3696_v61 = vpop.f32.mrb[101].mxu1  ;;  %8752 = vmatprep.subr.bf16.mxu1 %v12303_v7 }
 0x34d   :  { %v8753_v24 = vpack.c.bf16 %v8066_v39, %v3696_v61 }
 0x34f   :  { %8139 = vmatmul.mubr.msk.f32.vlgmr.msra.gmra.mrb[100].mxu0 %vm145_vm0, %v10202_v50  ;;  %8754 = vmatpush3.bf16.msra.mxu1 %v8753_v24  ;;  %v8069_v35 = vpop.f32.mrb[102].mxu1 }
 0x350   :  { %8141 = vmatprep.mubr.msk.f32.mxu0 %vm9015_vm1, %v12304_v48  ;;  %8745 = vmatpush3.bf16.msra.mxu0 %v8744_v59  ;;  %v3706_v0 = vpop.f32.mrb[103].mxu1 }
 0x351   :  { %8761 = vmatprep.subr.bf16.mxu1 %v12303_v7  ;;  %v8756_v47 = vpack.c.bf16 %v8069_v35, %v3706_v0  ;;  %8746 = vmatprep.subr.bf16.mxu0 %v12303_v7 }
 0x352   :  { %8173 = vmatmul.mubr.msk.f32.vlgmr.msra.gmra.mrb[110].mxu1 %vm145_vm0, %v10202_v50 }
 0x353   :  { %8142 = vmatmul.mubr.msk.f32.gmra.mrb[102].mxu0 %vm145_vm0, %v10212_v27  ;;  %v8072_v13 = vpop.f32.mrb[104].mxu1  ;;  %8175 = vmatprep.mubr.msk.f32.mxu1 %vm9015_vm1, %v12304_v48 }
 0x354   :  { %8144 = vmatprep.mubr.msk.f32.mxu0 %vm9015_vm1, %v12304_v48  ;;  %v3716_v59 = vpop.f32.mrb[105].mxu1  ;;  %8748 = vmatpush3.bf16.msra.mxu0 %v8747_v54 }
 0x355   :  { %v8759_v39 = vpack.c.bf16 %v8072_v13, %v3716_v59  ;;  %8755 = vmatprep.subr.bf16.mxu0 %v12303_v7 }
 0x356   :  { %8176 = vmatmul.mubr.msk.f32.gmra.mrb[112].mxu1 %vm145_vm0, %v10212_v27 }
 0x357   :  { %8145 = vmatmul.mubr.msk.f32.gmra.mrb[104].mxu0 %vm145_vm0, %v10222_v49  ;;  %v8075_v61 = vpop.f32.mrb[106].mxu1  ;;  %8178 = vmatprep.mubr.msk.f32.mxu1 %vm9015_vm1, %v12304_v48 }
 0x358   :  { %8155 = vmatprep.mubr.msk.f32.mxu0 %vm9015_vm1, %v12304_v48  ;;  %v3726_v24 = vpop.f32.mrb[107].mxu1 }
 0x359   :  { %v8762_v35 = vpack.c.bf16 %v8075_v61, %v3726_v24  ;;  %v10344_v24 = vld [vmem:[%s12062_s1 + $0x10] sm:$0xff] }
 0x35a   :  { %8179 = vmatmul.mubr.msk.f32.gmra.mrb[114].mxu1 %vm145_vm0, %v10222_v49 }
 0x35b   :  { %8156 = vmatmul.mubr.msk.f32.vlgmr.msra.gmra.mrb[106].mxu0 %vm145_vm0, %v10202_v50  ;;  %v8078_v54 = vpop.f32.mrb[108].mxu1  ;;  %8763 = vmatpush3.bf16.msra.mxu1 %v8762_v35  ;;  %v4387_v35 = vmul.f32 %v10344_v24, %v10344_v24 }
 0x35c   :  { %8158 = vmatprep.mubr.msk.f32.mxu0 %vm9015_vm1, %v12304_v48  ;;  %v3736_v0 = vpop.f32.mrb[109].mxu1  ;;  %8764 = vmatprep.subr.bf16.mxu1 %v12303_v7 }
 0x35d   :  { %8757 = vmatpush3.bf16.msra.mxu0 %v8756_v47  ;;  %v8765_v13 = vpack.c.bf16 %v8078_v54, %v3736_v0  ;;  %8206 = vmatprep.mubr.msk.f32.mxu1 %vm9015_vm1, %v12304_v48  ;;  %v10323_v47 = vld [vmem:[%s12062_s1] sm:$0xff]  ;;  %v10352_v54 = vld [vmem:[%s12062_s1 + $0x18] sm:$0xff] }
 0x35e   :  { %8758 = vmatprep.subr.bf16.mxu0 %v12303_v7  ;;  %v4385_v59 = vmul.f32 %v10323_v47, %v10323_v47  ;;  %v4388_v0 = vmul.f32 %v10352_v54, %v10352_v54 }
 0x35f   :  { %8159 = vmatmul.mubr.msk.f32.gmra.mrb[108].mxu0 %vm145_vm0, %v10212_v27  ;;  %8766 = vmatpush3.bf16.msra.mxu1 %v8765_v13  ;;  %v10360_v13 = vld [vmem:[%s12062_s1 + $0x20] sm:$0xff] }
 0x360   :  { %8161 = vmatprep.mubr.msk.f32.mxu0 %vm9015_vm1, %v12304_v48  ;;  %8775 = vmatprep.subr.bf16.mxu1 %v12303_v7 }
 0x361   :  { %8760 = vmatpush3.bf16.msra.mxu0 %v8759_v39  ;;  %v10334_v39 = vld [vmem:[%s12062_s1 + $0x8] sm:$0xff] }
 0x362   :  { %8768 = vmatprep.subr.bf16.mxu0 %v9053_v3  ;;  %8207 = vmatmul.mubr.msk.f32.vlgmr.msra.gmra.mrb[116].mxu1 %vm145_vm0, %v10202_v50  ;;  %v4386_v61 = vmul.f32 %v10334_v39, %v10334_v39 }
 0x363   :  { %8162 = vmatmul.mubr.msk.f32.gmra.mrb[110].mxu0 %vm145_vm0, %v10222_v49  ;;  %8209 = vmatprep.mubr.msk.f32.mxu1 %vm9015_vm1, %v12304_v48 }
 0x364   :  { %8189 = vmatprep.mubr.msk.f32.mxu0 %vm9015_vm1, %v12304_v48 }
 0x366   :  { %8210 = vmatmul.mubr.msk.f32.gmra.mrb[118].mxu1 %vm145_vm0, %v10212_v27 }
 0x367   :  { %8190 = vmatmul.mubr.msk.f32.vlgmr.msra.gmra.mrb[112].mxu0 %vm145_vm0, %v10202_v50  ;;  %8212 = vmatprep.mubr.msk.f32.mxu1 %vm9015_vm1, %v12304_v48 }
 0x368   :  { %8192 = vmatprep.mubr.msk.f32.mxu0 %vm9015_vm1, %v12304_v48  ;;  %8770 = vmatpush3.bf16.msra.mxu0 %v9053_v3 }
 0x369   :  { %8772 = vmatprep.subr.bf16.mxu0 %v9063_v6 }
 0x36a   :  { %8213 = vmatmul.mubr.msk.f32.gmra.mrb[120].mxu1 %vm145_vm0, %v10222_v49 }
 0x36b   :  { %8193 = vmatmul.mubr.msk.f32.gmra.mrb[114].mxu0 %vm145_vm0, %v10212_v27  ;;  %8279 = vmatprep.mubr.msk.f32.mxu1 %vm9015_vm1, %v12304_v48 }
 0x36c   :  { %8195 = vmatprep.mubr.msk.f32.mxu0 %vm9015_vm1, %v12304_v48  ;;  %8774 = vmatpush3.bf16.msra.mxu0 %v9063_v6 }
 0x36d   :  { %8805 = vmatprep.subr.bf16.mxu0 %v12303_v7 }
 0x36f   :  { %8196 = vmatmul.mubr.msk.f32.gmra.mrb[116].mxu0 %vm145_vm0, %v10222_v49 }
 0x370   :  { %8223 = vmatprep.mubr.msk.f32.mxu0 %vm145_vm0, %v4385_v59  ;;  %v4389_v59 = vmul.f32 %v10360_v13, %v10360_v13 }
 0x373   :  { %8224 = vmatmul.mubr.msk.f32.vlgmr.msra.gmra.mrb[118].mxu0 %vm145_vm0, %v4386_v61  ;;  %v10368_v61 = vld [vmem:[%s12062_s1 + $0x28] sm:$0xff] }
 0x374   :  { %8226 = vmatprep.mubr.msk.f32.mxu0 %vm145_vm0, %v4387_v35  ;;  %v4390_v36 = vmul.f32 %v10368_v61, %v10368_v61  ;;  %v10376_v35 = vld [vmem:[%s12062_s1 + $0x30] sm:$0xff] }
 0x375   :  { %v4391_v29 = vmul.f32 %v10376_v35, %v10376_v35 }
 0x377   :  { %8227 = vmatmul.mubr.msk.f32.gmra.mrb[120].mxu0 %vm145_vm0, %v4388_v0  ;;  %v10384_v0 = vld [vmem:[%s12062_s1 + $0x38] sm:$0xff] }
 0x378   :  { %8229 = vmatprep.mubr.msk.f32.mxu0 %vm145_vm0, %v4389_v59  ;;  %v4392_v8 = vmul.f32 %v10384_v0, %v10384_v0  ;;  %v10392_v59 = vld [vmem:[%s12062_s1 + $0x40] sm:$0xff] }
 0x379   :  { %v4393_v17 = vmul.f32 %v10392_v59, %v10392_v59 }
 0x37b   :  { %8230 = vmatmul.mubr.msk.f32.gmra.mrb[122].mxu0 %vm145_vm0, %v4390_v36  ;;  %v10400_v36 = vld [vmem:[%s12062_s1 + $0x48] sm:$0xff] }
 0x37c   :  { %8232 = vmatprep.mubr.msk.f32.mxu0 %vm145_vm0, %v4391_v29  ;;  %v4394_v60 = vmul.f32 %v10400_v36, %v10400_v36  ;;  %v10408_v29 = vld [vmem:[%s12062_s1 + $0x50] sm:$0xff] }
 0x37d   :  { %v4395_v34 = vmul.f32 %v10408_v29, %v10408_v29 }
 0x37f   :  { %8233 = vmatmul.mubr.msk.f32.gmra.mrb[124].mxu0 %vm145_vm0, %v4392_v8  ;;  %v10416_v8 = vld [vmem:[%s12062_s1 + $0x58] sm:$0xff] }
 0x380   :  { %8235 = vmatprep.mubr.msk.f32.mxu0 %vm145_vm0, %v4393_v17  ;;  %v4396_v40 = vmul.f32 %v10416_v8, %v10416_v8  ;;  %v10424_v17 = vld [vmem:[%s12062_s1 + $0x60] sm:$0xff] }
 0x381   :  { %v4397_v51 = vmul.f32 %v10424_v17, %v10424_v17 }
 0x383   :  { %8236 = vmatmul.mubr.msk.f32.gmra.mrb[126].mxu0 %vm145_vm0, %v4394_v60  ;;  %v10432_v60 = vld [vmem:[%s12062_s1 + $0x68] sm:$0xff] }
 0x384   :  { %8238 = vmatprep.mubr.msk.f32.mxu0 %vm145_vm0, %v4395_v34  ;;  %v4398_v52 = vmul.f32 %v10432_v60, %v10432_v60  ;;  %v10440_v34 = vld [vmem:[%s12062_s1 + $0x70] sm:$0xff] }
 0x385   :  { %v4399_v22 = vmul.f32 %v10440_v34, %v10440_v34 }
 0x387   :  { %8239 = vmatmul.mubr.msk.f32.gmra.mrb[128].mxu0 %vm145_vm0, %v4396_v40  ;;  %v10448_v40 = vld [vmem:[%s12062_s1 + $0x78] sm:$0xff] }
 0x388   :  { %8241 = vmatprep.mubr.msk.f32.mxu0 %vm145_vm0, %v4397_v51  ;;  %v4400_v10 = vmul.f32 %v10448_v40, %v10448_v40  ;;  %v10456_v51 = vld [vmem:[%s12062_s1 + $0x80] sm:$0xff] }
 0x389   :  { %v4401_v63 = vmul.f32 %v10456_v51, %v10456_v51 }
 0x38b   :  { %8242 = vmatmul.mubr.msk.f32.gmra.mrb[130].mxu0 %vm145_vm0, %v4398_v52  ;;  %v10464_v52 = vld [vmem:[%s12062_s1 + $0x88] sm:$0xff] }
 0x38c   :  { %8244 = vmatprep.mubr.msk.f32.mxu0 %vm145_vm0, %v4399_v22  ;;  %v4402_v37 = vmul.f32 %v10464_v52, %v10464_v52  ;;  %v10472_v22 = vld [vmem:[%s12062_s1 + $0x90] sm:$0xff] }
 0x38d   :  { %v4403_v33 = vmul.f32 %v10472_v22, %v10472_v22 }
 0x38f   :  { %8245 = vmatmul.mubr.msk.f32.gmra.mrb[132].mxu0 %vm145_vm0, %v4400_v10  ;;  %v10480_v10 = vld [vmem:[%s12062_s1 + $0x98] sm:$0xff] }
 0x390   :  { %8247 = vmatprep.mubr.msk.f32.mxu0 %vm145_vm0, %v4401_v63  ;;  %v4404_v28 = vmul.f32 %v10480_v10, %v10480_v10  ;;  %v10488_v63 = vld [vmem:[%s12062_s1 + $0xa0] sm:$0xff] }
 0x391   :  { %v4405_v26 = vmul.f32 %v10488_v63, %v10488_v63 }
 0x393   :  { %8248 = vmatmul.mubr.msk.f32.gmra.mrb[134].mxu0 %vm145_vm0, %v4402_v37  ;;  %v10496_v37 = vld [vmem:[%s12062_s1 + $0xa8] sm:$0xff] }
 0x394   :  { %8250 = vmatprep.mubr.msk.f32.mxu0 %vm145_vm0, %v4403_v33  ;;  %12305 = vst [vmem:[#allocation122_spill] sm:$0xff] %v10496_v37  ;;  %v4406_v21 = vmul.f32 %v10496_v37, %v10496_v37  ;;  %v10504_v33 = vld [vmem:[%s12062_s1 + $0xb0] sm:$0xff] }
 0x395   :  { %12306 = vst [vmem:[#allocation123_spill] sm:$0xff] %v10504_v33  ;;  %v4407_v19 = vmul.f32 %v10504_v33, %v10504_v33 }
 0x397   :  { %8251 = vmatmul.mubr.msk.f32.gmra.mrb[136].mxu0 %vm145_vm0, %v4404_v28  ;;  %v10512_v28 = vld [vmem:[%s12062_s1 + $0xb8] sm:$0xff] }
 0x398   :  { %8253 = vmatprep.mubr.msk.f32.mxu0 %vm145_vm0, %v4405_v26  ;;  %12307 = vst [vmem:[#allocation124_spill] sm:$0xff] %v10512_v28  ;;  %v4408_v14 = vmul.f32 %v10512_v28, %v10512_v28  ;;  %v10520_v26 = vld [vmem:[%s12062_s1 + $0xc0] sm:$0xff] }
 0x399   :  { %12308 = vst [vmem:[#allocation125_spill] sm:$0xff] %v10520_v26  ;;  %v4409_v12 = vmul.f32 %v10520_v26, %v10520_v26 }
 0x39b   :  { %8254 = vmatmul.mubr.msk.f32.gmra.mrb[138].mxu0 %vm145_vm0, %v4406_v21  ;;  %v10528_v21 = vld [vmem:[%s12062_s1 + $0xc8] sm:$0xff] }
 0x39c   :  { %8256 = vmatprep.mubr.msk.f32.mxu0 %vm145_vm0, %v4407_v19  ;;  %12309 = vst [vmem:[#allocation126_spill] sm:$0xff] %v10528_v21  ;;  %v4410_v55 = vmul.f32 %v10528_v21, %v10528_v21  ;;  %v10536_v19 = vld [vmem:[%s12062_s1 + $0xd0] sm:$0xff] }
 0x39d   :  { %12310 = vst [vmem:[#allocation127_spill] sm:$0xff] %v10536_v19  ;;  %v4411_v45 = vmul.f32 %v10536_v19, %v10536_v19 }
 0x39f   :  { %8257 = vmatmul.mubr.msk.f32.gmra.mrb[140].mxu0 %vm145_vm0, %v4408_v14  ;;  %v10544_v14 = vld [vmem:[%s12062_s1 + $0xd8] sm:$0xff]  ;;  %v12342_v41 = vld [vmem:[#allocation124_spill] sm:$0xff] }
 0x3a0   :  { %8259 = vmatprep.mubr.msk.f32.mxu0 %vm145_vm0, %v4409_v12  ;;  %12311 = vst [vmem:[#allocation128_spill] sm:$0xff] %v10544_v14  ;;  %v4412_v46 = vmul.f32 %v10544_v14, %v10544_v14  ;;  %v10552_v12 = vld [vmem:[%s12062_s1 + $0xe0] sm:$0xff]  ;;  %v12343_v56 = vld [vmem:[#allocation125_spill] sm:$0xff] }
 0x3a1   :  { %12312 = vst [vmem:[#allocation129_spill] sm:$0xff] %v10552_v12  ;;  %v4413_v2 = vmul.f32 %v10552_v12, %v10552_v12 }
 0x3a3   :  { %8260 = vmatmul.mubr.msk.f32.gmra.mrb[142].mxu0 %vm145_vm0, %v4410_v55  ;;  %v10560_v55 = vld [vmem:[%s12062_s1 + $0xe8] sm:$0xff] }
 0x3a4   :  { %8262 = vmatprep.mubr.msk.f32.mxu0 %vm145_vm0, %v4411_v45  ;;  %12313 = vst [vmem:[#allocation130_spill] sm:$0xff] %v10560_v55  ;;  %v4414_v14 = vmul.f32 %v10560_v55, %v10560_v55  ;;  %v10568_v45 = vld [vmem:[%s12062_s1 + $0xf0] sm:$0xff] }
 0x3a5   :  { %12314 = vst [vmem:[#allocation131_spill] sm:$0xff] %v10568_v45  ;;  %v4415_v12 = vmul.f32 %v10568_v45, %v10568_v45 }
 0x3a7   :  { %8263 = vmatmul.mubr.msk.f32.gmra.mrb[144].mxu0 %vm145_vm0, %v4412_v46  ;;  %v10576_v46 = vld [vmem:[%s12062_s1 + $0xf8] sm:$0xff] }
 0x3a8   :  { %8265 = vmatprep.mubr.msk.f32.mxu0 %vm145_vm0, %v4413_v2  ;;  %12315 = vst [vmem:[#allocation132_spill] sm:$0xff] %v10576_v46  ;;  %v4416_v55 = vmul.f32 %v10576_v46, %v10576_v46 }
 0x3ab   :  { %8266 = vmatmul.mubr.msk.f32.gmra.mrb[146].mxu0 %vm145_vm0, %v4414_v14 }
 0x3ac   :  { %8268 = vmatprep.mubr.msk.f32.mxu0 %vm145_vm0, %v4415_v12 }
 0x3af   :  { %8269 = vmatmul.mubr.msk.f32.gmra.mrb[148].mxu0 %vm145_vm0, %v4416_v55 }
 0x3b0   :  { %8364 = vmatprep.mubr.msk.f32.mxu0 %vm9015_vm1, %v12304_v48 }
 0x3fe   :  { %v10584_v2 = vpop.f32.mrb[82].mxu0 }
 0x3ff   :  { %12316 = vst [vmem:[#allocation133_spill] sm:$0xff] %v10584_v2  ;;  %v8089_v45 = vpop.f32.mrb[83].mxu0  ;;  %v12350_v2 = vld [vmem:[#allocation130_spill] sm:$0xff] }
 0x402   :  { %v10588_v19 = vpop.f32.mrb[84].mxu0 }
 0x403   :  { %12317 = vst [vmem:[#allocation134_spill] sm:$0xff] %v10588_v19  ;;  %v8092_v26 = vpop.f32.mrb[85].mxu0 }
 0x406   :  { %v10592_v46 = vpop.f32.mrb[86].mxu0 }
 0x407   :  { %12318 = vst [vmem:[#allocation135_spill] sm:$0xff] %v10592_v46  ;;  %v8095_v55 = vpop.f32.mrb[87].mxu0  ;;  %v12349_v46 = vld [vmem:[#allocation129_spill] sm:$0xff] }
 0x40a   :  { %v10596_v28 = vpop.f32.mrb[88].mxu0 }
 0x40b   :  { %12319 = vst [vmem:[#allocation136_spill] sm:$0xff] %v10596_v28  ;;  %v8106_v37 = vpop.f32.mrb[89].mxu0 }
 0x40e   :  { %v10600_v14 = vpop.f32.mrb[90].mxu0 }
 0x40f   :  { %12320 = vst [vmem:[#allocation137_spill] sm:$0xff] %v10600_v14  ;;  %v8109_v38 = vpop.f32.mrb[91].mxu0  ;;  %v12347_v14 = vld [vmem:[#allocation128_spill] sm:$0xff] }
 0x412   :  { %v10604_v21 = vpop.f32.mrb[92].mxu0 }
 0x413   :  { %12321 = vst [vmem:[#allocation138_spill] sm:$0xff] %v10604_v21  ;;  %v8112_v53 = vpop.f32.mrb[93].mxu0 }
 0x416   :  { %v10608_v12 = vpop.f32.mrb[94].mxu0 }
 0x417   :  { %12322 = vst [vmem:[#allocation139_spill] sm:$0xff] %v10608_v12  ;;  %v8123_v11 = vpop.f32.mrb[95].mxu0  ;;  %v12345_v12 = vld [vmem:[#allocation127_spill] sm:$0xff] }
 0x41a   :  { %v10612_v33 = vpop.f32.mrb[96].mxu0 }
 0x41b   :  { %12323 = vst [vmem:[#allocation140_spill] sm:$0xff] %v10612_v33  ;;  %v8126_v18 = vpop.f32.mrb[97].mxu0 }
 0x41e   :  { %v10616_v45 = vpop.f32.mrb[98].mxu0 }
 0x41f   :  { %12324 = vst [vmem:[#allocation141_spill] sm:$0xff] %v10616_v45  ;;  %v8129_v25 = vpop.f32.mrb[99].mxu0  ;;  %v12344_v45 = vld [vmem:[#allocation126_spill] sm:$0xff] }
 0x422   :  { %v10620_v26 = vpop.f32.mrb[100].mxu0 }
 0x423   :  { %12325 = vst [vmem:[#allocation142_spill] sm:$0xff] %v10620_v26  ;;  %v8140_v32 = vpop.f32.mrb[101].mxu0 }
 0x425   :  { %v10626_v11 = vpop.f32.mrb[110].mxu1 }
 0x426   :  { %v10624_v55 = vpop.f32.mrb[102].mxu0  ;;  %12327 = vst [vmem:[#allocation144_spill] sm:$0xff] %v10626_v11  ;;  %v8174_v33 = vpop.f32.mrb[111].mxu1 }
 0x427   :  { %12326 = vst [vmem:[#allocation143_spill] sm:$0xff] %v10624_v55  ;;  %v8143_v44 = vpop.f32.mrb[103].mxu0 }
 0x429   :  { %v10634_v25 = vpop.f32.mrb[112].mxu1 }
 0x42a   :  { %v10632_v38 = vpop.f32.mrb[104].mxu0  ;;  %12329 = vst [vmem:[#allocation146_spill] sm:$0xff] %v10634_v25  ;;  %v8177_v26 = vpop.f32.mrb[113].mxu1 }
 0x42b   :  { %12328 = vst [vmem:[#allocation145_spill] sm:$0xff] %v10632_v38  ;;  %v8146_v57 = vpop.f32.mrb[105].mxu0 }
 0x42d   :  { %v10642_v37 = vpop.f32.mrb[114].mxu1 }
 0x42e   :  { %v10640_v58 = vpop.f32.mrb[106].mxu0  ;;  %12331 = vst [vmem:[#allocation148_spill] sm:$0xff] %v10642_v37  ;;  %v8180_v31 = vpop.f32.mrb[115].mxu1 }
 0x42f   :  { %12330 = vst [vmem:[#allocation147_spill] sm:$0xff] %v10640_v58  ;;  %v8157_v18 = vpop.f32.mrb[107].mxu0  ;;  %v12341_v58 = vld [vmem:[#allocation123_spill] sm:$0xff] }
 0x432   :  { %v10648_v11 = vpop.f32.mrb[108].mxu0 }
 0x433   :  { %12332 = vst [vmem:[#allocation149_spill] sm:$0xff] %v10648_v11  ;;  %v8160_v32 = vpop.f32.mrb[109].mxu0 }
 0x435   :  { %v10654_v26 = vpop.f32.mrb[116].mxu1 }
 0x436   :  { %v10652_v57 = vpop.f32.mrb[110].mxu0  ;;  %12334 = vst [vmem:[#allocation151_spill] sm:$0xff] %v10654_v26  ;;  %v8208_v33 = vpop.f32.mrb[117].mxu1 }
 0x437   :  { %12333 = vst [vmem:[#allocation150_spill] sm:$0xff] %v10652_v57  ;;  %v8163_v1 = vpop.f32.mrb[111].mxu0  ;;  %v12340_v57 = vld [vmem:[#allocation122_spill] sm:$0xff] }
 0x439   :  { %v10662_v31 = vpop.f32.mrb[118].mxu1 }
 0x43a   :  { %v10660_v18 = vpop.f32.mrb[112].mxu0  ;;  %12336 = vst [vmem:[#allocation153_spill] sm:$0xff] %v10662_v31  ;;  %v8211_v11 = vpop.f32.mrb[119].mxu1 }
 0x43b   :  { %12335 = vst [vmem:[#allocation152_spill] sm:$0xff] %v10660_v18  ;;  %v8191_v23 = vpop.f32.mrb[113].mxu0 }
 0x43d   :  { %v10670_v30 = vpop.f32.mrb[120].mxu1 }
 0x43e   :  { %v10668_v16 = vpop.f32.mrb[114].mxu0  ;;  %12338 = vst [vmem:[#allocation155_spill] sm:$0xff] %v10670_v30  ;;  %v8214_v20 = vpop.f32.mrb[121].mxu1 }
 0x43f   :  { %12337 = vst [vmem:[#allocation154_spill] sm:$0xff] %v10668_v16  ;;  %v8194_v44 = vpop.f32.mrb[115].mxu0 }
 0x442   :  { %v10676_v26 = vpop.f32.mrb[116].mxu0 }
 0x443   :  { %12339 = vst [vmem:[#allocation156_spill] sm:$0xff] %v10676_v26  ;;  %v8197_v32 = vpop.f32.mrb[117].mxu0 }
 0x446   :  { %v8225_v23 = vpop.f32.mrb[118].mxu0 }
 0x447   :  { %v4579_v11 = vpop.f32.mrb[119].mxu0 }
 0x448   :  { %v8776_v15 = vpack.c.bf16 %v8225_v23, %v4579_v11 }
 0x44a   :  { %v8228_v31 = vpop.f32.mrb[120].mxu0  ;;  %8777 = vmatpush3.bf16.msra.mxu1 %v8776_v15 }
 0x44b   :  { %v4589_v4 = vpop.f32.mrb[121].mxu0  ;;  %8778 = vmatprep.subr.bf16.mxu1 %v12303_v7 }
 0x44c   :  { %v8779_v1 = vpack.c.bf16 %v8228_v31, %v4589_v4 }
 0x44e   :  { %8780 = vmatpush3.bf16.msra.mxu1 %v8779_v1  ;;  %v8231_v9 = vpop.f32.mrb[122].mxu0 }
 0x44f   :  { %v4599_v33 = vpop.f32.mrb[123].mxu0  ;;  %8781 = vmatprep.subr.bf16.mxu1 %v12303_v7 }
 0x450   :  { %v8782_v20 = vpack.c.bf16 %v8231_v9, %v4599_v33 }
 0x451   :  { %8280 = vmatmul.mubr.msk.f32.vlgmr.msra.gmra.mrb[122].mxu1 %vm145_vm0, %v10202_v50 }
 0x452   :  { %8282 = vmatprep.mubr.msk.f32.mxu1 %vm9015_vm1, %v12304_v48  ;;  %v8234_v44 = vpop.f32.mrb[124].mxu0  ;;  %8783 = vmatpush3.bf16.msra.mxu1 %v8782_v20 }
 0x453   :  { %v4609_v32 = vpop.f32.mrb[125].mxu0  ;;  %8784 = vmatprep.subr.bf16.mxu1 %v12303_v7 }
 0x454   :  { %v8785_v15 = vpack.c.bf16 %v8234_v44, %v4609_v32 }
 0x455   :  { %8283 = vmatmul.mubr.msk.f32.gmra.mrb[124].mxu1 %vm145_vm0, %v10212_v27 }
 0x456   :  { %8285 = vmatprep.mubr.msk.f32.mxu1 %vm9015_vm1, %v12304_v48  ;;  %8786 = vmatpush3.bf16.msra.mxu1 %v8785_v15  ;;  %v8237_v4 = vpop.f32.mrb[126].mxu0 }
 0x457   :  { %v4619_v9 = vpop.f32.mrb[127].mxu0  ;;  %8787 = vmatprep.subr.bf16.mxu1 %v12303_v7 }
 0x458   :  { %v8788_v31 = vpack.c.bf16 %v8237_v4, %v4619_v9 }
 0x459   :  { %8286 = vmatmul.mubr.msk.f32.gmra.mrb[126].mxu1 %vm145_vm0, %v10222_v49 }
 0x45a   :  { %8296 = vmatprep.mubr.msk.f32.mxu1 %vm9015_vm1, %v12304_v48  ;;  %v8240_v1 = vpop.f32.mrb[128].mxu0 }
 0x45b   :  { %v4629_v33 = vpop.f32.mrb[129].mxu0 }
 0x45c   :  { %v8791_v23 = vpack.c.bf16 %v8240_v1, %v4629_v33 }
 0x45d   :  { %8297 = vmatmul.mubr.msk.f32.vlgmr.msra.gmra.mrb[128].mxu1 %vm145_vm0, %v10202_v50 }
 0x45e   :  { %8299 = vmatprep.mubr.msk.f32.mxu1 %vm9015_vm1, %v12304_v48  ;;  %8789 = vmatpush3.bf16.msra.mxu1 %v8788_v31  ;;  %v8243_v11 = vpop.f32.mrb[130].mxu0 }
 0x45f   :  { %8790 = vmatprep.subr.bf16.mxu1 %v12303_v7  ;;  %v4639_v20 = vpop.f32.mrb[131].mxu0 }
 0x460   :  { %v8794_v44 = vpack.c.bf16 %v8243_v11, %v4639_v20 }
 0x461   :  { %8300 = vmatmul.mubr.msk.f32.gmra.mrb[130].mxu1 %vm145_vm0, %v10212_v27 }
 0x462   :  { %8302 = vmatprep.mubr.msk.f32.mxu1 %vm9015_vm1, %v12304_v48  ;;  %8792 = vmatpush3.bf16.msra.mxu1 %v8791_v23  ;;  %v8246_v32 = vpop.f32.mrb[132].mxu0 }
 0x463   :  { %v4649_v15 = vpop.f32.mrb[133].mxu0  ;;  %8793 = vmatprep.subr.bf16.mxu1 %v12303_v7 }
 0x464   :  { %v8797_v4 = vpack.c.bf16 %v8246_v32, %v4649_v15 }
 0x465   :  { %8303 = vmatmul.mubr.msk.f32.gmra.mrb[132].mxu1 %vm145_vm0, %v10222_v49 }
 0x466   :  { %8313 = vmatprep.mubr.msk.f32.mxu1 %vm9015_vm1, %v12304_v48  ;;  %v8249_v9 = vpop.f32.mrb[134].mxu0 }
 0x467   :  { %v4659_v31 = vpop.f32.mrb[135].mxu0 }
 0x468   :  { %v8800_v1 = vpack.c.bf16 %v8249_v9, %v4659_v31 }
 0x469   :  { %8314 = vmatmul.mubr.msk.f32.vlgmr.msra.gmra.mrb[134].mxu1 %vm145_vm0, %v10202_v50 }
 0x46a   :  { %v8252_v33 = vpop.f32.mrb[136].mxu0  ;;  %8316 = vmatprep.mubr.msk.f32.mxu1 %vm9015_vm1, %v12304_v48  ;;  %8795 = vmatpush3.bf16.msra.mxu1 %v8794_v44 }
 0x46b   :  { %v4669_v23 = vpop.f32.mrb[137].mxu0  ;;  %8796 = vmatprep.subr.bf16.mxu1 %v12303_v7 }
 0x46c   :  { %v8803_v11 = vpack.c.bf16 %v8252_v33, %v4669_v23 }
 0x46d   :  { %8317 = vmatmul.mubr.msk.f32.gmra.mrb[136].mxu1 %vm145_vm0, %v10212_v27 }
 0x46e   :  { %v8255_v20 = vpop.f32.mrb[138].mxu0  ;;  %8319 = vmatprep.mubr.msk.f32.mxu1 %vm9015_vm1, %v12304_v48  ;;  %8798 = vmatpush3.bf16.msra.mxu1 %v8797_v4 }
 0x46f   :  { %v4679_v32 = vpop.f32.mrb[139].mxu0  ;;  %8799 = vmatprep.subr.bf16.mxu1 %v12303_v7 }
 0x470   :  { %v8806_v15 = vpack.c.bf16 %v8255_v20, %v4679_v32 }
 0x471   :  { %8320 = vmatmul.mubr.msk.f32.gmra.mrb[138].mxu1 %vm145_vm0, %v10222_v49 }
 0x472   :  { %v8258_v44 = vpop.f32.mrb[140].mxu0  ;;  %8807 = vmatpush3.bf16.msra.mxu0 %v8806_v15  ;;  %8330 = vmatprep.mubr.msk.f32.mxu1 %vm9015_vm1, %v12304_v48 }
 0x473   :  { %v4689_v9 = vpop.f32.mrb[141].mxu0  ;;  %8808 = vmatprep.subr.bf16.mxu0 %v12303_v7 }
 0x474   :  { %v8809_v31 = vpack.c.bf16 %v8258_v44, %v4689_v9 }
 0x475   :  { %8331 = vmatmul.mubr.msk.f32.vlgmr.msra.gmra.mrb[140].mxu1 %vm145_vm0, %v10202_v50 }
 0x476   :  { %8810 = vmatpush3.bf16.msra.mxu0 %v8809_v31  ;;  %8333 = vmatprep.mubr.msk.f32.mxu1 %vm9015_vm1, %v12304_v48  ;;  %v8261_v4 = vpop.f32.mrb[142].mxu0 }
 0x477   :  { %8801 = vmatpush3.bf16.msra.mxu1 %v8800_v1  ;;  %v4699_v33 = vpop.f32.mrb[143].mxu0  ;;  %8817 = vmatprep.subr.bf16.mxu0 %v12303_v7 }
 0x478   :  { %v8812_v23 = vpack.c.bf16 %v8261_v4, %v4699_v33  ;;  %8802 = vmatprep.subr.bf16.mxu1 %v12303_v7 }
 0x479   :  { %8334 = vmatmul.mubr.msk.f32.gmra.mrb[142].mxu1 %vm145_vm0, %v10212_v27  ;;  %8365 = vmatmul.mubr.msk.f32.vlgmr.msra.gmra.mrb[150].mxu0 %vm145_vm0, %v10202_v50 }
 0x47a   :  { %v8264_v20 = vpop.f32.mrb[144].mxu0  ;;  %8336 = vmatprep.mubr.msk.f32.mxu1 %vm9015_vm1, %v12304_v48  ;;  %8367 = vmatprep.mubr.msk.f32.mxu0 %vm9015_vm1, %v12304_v48 }
 0x47b   :  { %v4709_v1 = vpop.f32.mrb[145].mxu0  ;;  %8804 = vmatpush3.bf16.msra.mxu1 %v8803_v11 }
 0x47c   :  { %v8815_v32 = vpack.c.bf16 %v8264_v20, %v4709_v1  ;;  %8811 = vmatprep.subr.bf16.mxu1 %v12303_v7  ;;  %v10820_v20 = vld [vmem:[%s12060_s0 + $0x18] sm:$0xff]  ;;  %v10828_v1 = vld [vmem:[%s12060_s0 + $0x20] sm:$0xff] }
 0x47d   :  { %8337 = vmatmul.mubr.msk.f32.gmra.mrb[144].mxu1 %vm145_vm0, %v10222_v49  ;;  %8368 = vmatmul.mubr.msk.f32.gmra.mrb[152].mxu0 %vm145_vm0, %v10212_v27 }
 0x47e   :  { %v8267_v15 = vpop.f32.mrb[146].mxu0  ;;  %8347 = vmatprep.mubr.msk.f32.mxu1 %vm9015_vm1, %v12304_v48  ;;  %8370 = vmatprep.mubr.msk.f32.mxu0 %vm9015_vm1, %v12304_v48 }
 0x47f   :  { %v4719_v44 = vpop.f32.mrb[147].mxu0 }
 0x480   :  { %v8818_v9 = vpack.c.bf16 %v8267_v15, %v4719_v44  ;;  %v10836_v15 = vld [vmem:[%s12060_s0 + $0x28] sm:$0xff] }
 0x481   :  { %8348 = vmatmul.mubr.msk.f32.vlgmr.msra.gmra.mrb[146].mxu1 %vm145_vm0, %v10202_v50  ;;  %8371 = vmatmul.mubr.msk.f32.gmra.mrb[154].mxu0 %vm145_vm0, %v10222_v49  ;;  %v5383_v44 = vmul.f32 %v10836_v15, %v10368_v61 }
 0x482   :  { %v8270_v11 = vpop.f32.mrb[148].mxu0  ;;  %8819 = vmatpush3.bf16.msra.mxu0 %v8818_v9  ;;  %8350 = vmatprep.mubr.msk.f32.mxu1 %vm9015_vm1, %v12304_v48  ;;  %v10844_v9 = vld [vmem:[%s12060_s0 + $0x30] sm:$0xff] }
 0x483   :  { %v4729_v31 = vpop.f32.mrb[149].mxu0  ;;  %8820 = vmatprep.subr.bf16.mxu0 %v12303_v7  ;;  %8813 = vmatpush3.bf16.msra.mxu1 %v8812_v23  ;;  %v10812_v23 = vld [vmem:[%s12060_s0 + $0x10] sm:$0xff] }
 0x484   :  { %v8821_v4 = vpack.c.bf16 %v8270_v11, %v4729_v31  ;;  %8398 = vmatprep.mubr.msk.f32.mxu0 %vm9015_vm1, %v12304_v48  ;;  %8814 = vmatprep.subr.bf16.mxu1 %v12303_v7  ;;  %v5384_v11 = vmul.f32 %v10844_v9, %v10376_v35  ;;  %v10852_v31 = vld [vmem:[%s12060_s0 + $0x38] sm:$0xff] }
 0x485   :  { %8351 = vmatmul.mubr.msk.f32.gmra.mrb[148].mxu1 %vm145_vm0, %v10212_v27 }
 0x486   :  { %8822 = vmatpush3.bf16.msra.mxu0 %v8821_v4  ;;  %8353 = vmatprep.mubr.msk.f32.mxu1 %vm9015_vm1, %v12304_v48  ;;  %v5385_v4 = vmul.f32 %v10852_v31, %v10384_v0 }
 0x487   :  { %8816 = vmatpush3.bf16.msra.mxu1 %v8815_v32  ;;  %8831 = vmatprep.subr.bf16.mxu0 %v12303_v7  ;;  %v5382_v32 = vmul.f32 %v10828_v1, %v10360_v13 }
 0x488   :  { %8824 = vmatprep.subr.bf16.mxu1 %v9053_v3 }
 0x489   :  { %8354 = vmatmul.mubr.msk.f32.gmra.mrb[150].mxu1 %vm145_vm0, %v10222_v49  ;;  %8399 = vmatmul.mubr.msk.f32.vlgmr.msra.gmra.mrb[156].mxu0 %vm145_vm0, %v10202_v50 }
 0x48a   :  { %8381 = vmatprep.mubr.msk.f32.mxu1 %vm9015_vm1, %v12304_v48  ;;  %8401 = vmatprep.mubr.msk.f32.mxu0 %vm9015_vm1, %v12304_v48 }
 0x48d   :  { %8382 = vmatmul.mubr.msk.f32.vlgmr.msra.gmra.mrb[152].mxu1 %vm145_vm0, %v10202_v50  ;;  %8402 = vmatmul.mubr.msk.f32.gmra.mrb[158].mxu0 %vm145_vm0, %v10212_v27  ;;  %v10791_v50 = vld [vmem:[%s12060_s0] sm:$0xff] }
 0x48e   :  { %8384 = vmatprep.mubr.msk.f32.mxu1 %vm9015_vm1, %v12304_v48  ;;  %8404 = vmatprep.mubr.msk.f32.mxu0 %vm9015_vm1, %v12304_v48  ;;  %v5378_v33 = vmul.f32 %v10791_v50, %v10323_v47 }
 0x48f   :  { %8826 = vmatpush3.bf16.msra.mxu1 %v9053_v3  ;;  %v10802_v3 = vld [vmem:[%s12060_s0 + $0x8] sm:$0xff] }
 0x490   :  { %8828 = vmatprep.subr.bf16.mxu1 %v9063_v6 }
 0x491   :  { %8385 = vmatmul.mubr.msk.f32.gmra.mrb[154].mxu1 %vm145_vm0, %v10212_v27  ;;  %8405 = vmatmul.mubr.msk.f32.gmra.mrb[160].mxu0 %vm145_vm0, %v10222_v49  ;;  %v5379_v27 = vmul.f32 %v10802_v3, %v10334_v39 }
 0x492   :  { %8387 = vmatprep.mubr.msk.f32.mxu1 %vm9015_vm1, %v12304_v48  ;;  %8471 = vmatprep.mubr.msk.f32.mxu0 %vm9015_vm1, %v12304_v48 }
 0x493   :  { %8830 = vmatpush3.bf16.msra.mxu1 %v9063_v6  ;;  %v5380_v6 = vmul.f32 %v10812_v23, %v10344_v24 }
 0x494   :  { %8861 = vmatprep.subr.bf16.mxu1 %v12303_v7 }
 0x495   :  { %8388 = vmatmul.mubr.msk.f32.gmra.mrb[156].mxu1 %vm145_vm0, %v10222_v49  ;;  %v5381_v49 = vmul.f32 %v10820_v20, %v10352_v54 }
 0x496   :  { %8415 = vmatprep.mubr.msk.f32.mxu1 %vm145_vm0, %v5378_v33  ;;  %v10860_v33 = vld [vmem:[%s12060_s0 + $0x40] sm:$0xff] }
 0x499   :  { %8416 = vmatmul.mubr.msk.f32.vlgmr.msra.gmra.mrb[158].mxu1 %vm145_vm0, %v5379_v27  ;;  %v5386_v27 = vmul.f32 %v10860_v33, %v10392_v59 }
 0x49a   :  { %8418 = vmatprep.mubr.msk.f32.mxu1 %vm145_vm0, %v5380_v6  ;;  %v10868_v6 = vld [vmem:[%s12060_s0 + $0x48] sm:$0xff] }
 0x49d   :  { %8419 = vmatmul.mubr.msk.f32.gmra.mrb[160].mxu1 %vm145_vm0, %v5381_v49  ;;  %v5387_v49 = vmul.f32 %v10868_v6, %v10400_v36 }
 0x49e   :  { %8421 = vmatprep.mubr.msk.f32.mxu1 %vm145_vm0, %v5382_v32  ;;  %v10876_v32 = vld [vmem:[%s12060_s0 + $0x50] sm:$0xff] }
 0x4a1   :  { %8422 = vmatmul.mubr.msk.f32.gmra.mrb[162].mxu1 %vm145_vm0, %v5383_v44  ;;  %v5388_v44 = vmul.f32 %v10876_v32, %v10408_v29 }
 0x4a2   :  { %8424 = vmatprep.mubr.msk.f32.mxu1 %vm145_vm0, %v5384_v11  ;;  %v10884_v11 = vld [vmem:[%s12060_s0 + $0x58] sm:$0xff] }
 0x4a5   :  { %8425 = vmatmul.mubr.msk.f32.gmra.mrb[164].mxu1 %vm145_vm0, %v5385_v4  ;;  %v5389_v4 = vmul.f32 %v10884_v11, %v10416_v8 }
 0x4a6   :  { %8427 = vmatprep.mubr.msk.f32.mxu1 %vm145_vm0, %v5386_v27  ;;  %v10892_v27 = vld [vmem:[%s12060_s0 + $0x60] sm:$0xff] }
 0x4a7   :  { %v5390_v53 = vmul.f32 %v10892_v27, %v10424_v17 }
 0x4a9   :  { %8428 = vmatmul.mubr.msk.f32.gmra.mrb[166].mxu1 %vm145_vm0, %v5387_v49  ;;  %v10900_v49 = vld [vmem:[%s12060_s0 + $0x68] sm:$0xff] }
 0x4aa   :  { %8430 = vmatprep.mubr.msk.f32.mxu1 %vm145_vm0, %v5388_v44  ;;  %v5391_v7 = vmul.f32 %v10900_v49, %v10432_v60  ;;  %v10908_v44 = vld [vmem:[%s12060_s0 + $0x70] sm:$0xff] }
 0x4ab   :  { %v5392_v43 = vmul.f32 %v10908_v44, %v10440_v34 }
 0x4ad   :  { %8431 = vmatmul.mubr.msk.f32.gmra.mrb[168].mxu1 %vm145_vm0, %v5389_v4  ;;  %v10916_v4 = vld [vmem:[%s12060_s0 + $0x78] sm:$0xff] }
 0x4ae   :  { %8433 = vmatprep.mubr.msk.f32.mxu1 %vm145_vm0, %v5390_v53  ;;  %v5393_v26 = vmul.f32 %v10916_v4, %v10448_v40  ;;  %v10924_v53 = vld [vmem:[%s12060_s0 + $0x80] sm:$0xff] }
 0x4af   :  { %v5394_v62 = vmul.f32 %v10924_v53, %v10456_v51 }
 0x4b1   :  { %8434 = vmatmul.mubr.msk.f32.gmra.mrb[170].mxu1 %vm145_vm0, %v5391_v7  ;;  %v10932_v7 = vld [vmem:[%s12060_s0 + $0x88] sm:$0xff] }
 0x4b2   :  { %8436 = vmatprep.mubr.msk.f32.mxu1 %vm145_vm0, %v5392_v43  ;;  %v5395_v30 = vmul.f32 %v10932_v7, %v10464_v52  ;;  %v10940_v43 = vld [vmem:[%s12060_s0 + $0x90] sm:$0xff] }
 0x4b3   :  { %v5396_v16 = vmul.f32 %v10940_v43, %v10472_v22 }
 0x4b5   :  { %8437 = vmatmul.mubr.msk.f32.gmra.mrb[172].mxu1 %vm145_vm0, %v5393_v26  ;;  %v10948_v26 = vld [vmem:[%s12060_s0 + $0x98] sm:$0xff] }
 0x4b6   :  { %8439 = vmatprep.mubr.msk.f32.mxu1 %vm145_vm0, %v5394_v62  ;;  %v5397_v18 = vmul.f32 %v10948_v26, %v10480_v10  ;;  %v10956_v62 = vld [vmem:[%s12060_s0 + $0xa0] sm:$0xff] }
 0x4b7   :  { %v5398_v42 = vmul.f32 %v10956_v62, %v10488_v63 }
 0x4b9   :  { %8440 = vmatmul.mubr.msk.f32.gmra.mrb[174].mxu1 %vm145_vm0, %v5395_v30  ;;  %v10964_v30 = vld [vmem:[%s12060_s0 + $0xa8] sm:$0xff] }
 0x4ba   :  { %8442 = vmatprep.mubr.msk.f32.mxu1 %vm145_vm0, %v5396_v16  ;;  %v5399_v37 = vmul.f32 %v10964_v30, %v12340_v57  ;;  %v10972_v16 = vld [vmem:[%s12060_s0 + $0xb0] sm:$0xff] }
 0x4bb   :  { %v5400_v25 = vmul.f32 %v10972_v16, %v12341_v58 }
 0x4bd   :  { %8443 = vmatmul.mubr.msk.f32.gmra.mrb[176].mxu1 %vm145_vm0, %v5397_v18  ;;  %v10980_v18 = vld [vmem:[%s12060_s0 + $0xb8] sm:$0xff] }
 0x4be   :  { %8445 = vmatprep.mubr.msk.f32.mxu1 %vm145_vm0, %v5398_v42  ;;  %v5401_v38 = vmul.f32 %v10980_v18, %v12342_v41  ;;  %v10988_v42 = vld [vmem:[%s12060_s0 + $0xc0] sm:$0xff] }
 0x4bf   :  { %v5402_v55 = vmul.f32 %v10988_v42, %v12343_v56 }
 0x4c1   :  { %8446 = vmatmul.mubr.msk.f32.gmra.mrb[178].mxu1 %vm145_vm0, %v5399_v37  ;;  %v10996_v37 = vld [vmem:[%s12060_s0 + $0xc8] sm:$0xff] }
 0x4c2   :  { %8448 = vmatprep.mubr.msk.f32.mxu1 %vm145_vm0, %v5400_v25  ;;  %v5403_v5 = vmul.f32 %v10996_v37, %v12344_v45  ;;  %v11004_v25 = vld [vmem:[%s12060_s0 + $0xd0] sm:$0xff] }
 0x4c3   :  { %v5404_v21 = vmul.f32 %v11004_v25, %v12345_v12 }
 0x4c5   :  { %8449 = vmatmul.mubr.msk.f32.gmra.mrb[180].mxu1 %vm145_vm0, %v5401_v38  ;;  %v11012_v38 = vld [vmem:[%s12060_s0 + $0xd8] sm:$0xff] }
 0x4c6   :  { %8451 = vmatprep.mubr.msk.f32.mxu1 %vm145_vm0, %v5402_v55  ;;  %12346 = vst [vmem:[#allocation122_spill] sm:$0xff] %v11012_v38  ;;  %v5405_v28 = vmul.f32 %v11012_v38, %v12347_v14  ;;  %v11020_v55 = vld [vmem:[%s12060_s0 + $0xe0] sm:$0xff]  ;;  %v12351_v38 = vld [vmem:[#allocation131_spill] sm:$0xff] }
 0x4c7   :  { %12348 = vst [vmem:[#allocation123_spill] sm:$0xff] %v11020_v55  ;;  %v5406_v19 = vmul.f32 %v11020_v55, %v12349_v46  ;;  %v12352_v55 = vld [vmem:[#allocation132_spill] sm:$0xff] }
 0x4c9   :  { %8452 = vmatmul.mubr.msk.f32.gmra.mrb[182].mxu1 %vm145_vm0, %v5403_v5  ;;  %v11028_v5 = vld [vmem:[%s12060_s0 + $0xe8] sm:$0xff] }
 0x4ca   :  { %8454 = vmatprep.mubr.msk.f32.mxu1 %vm145_vm0, %v5404_v21  ;;  %v5407_v14 = vmul.f32 %v11028_v5, %v12350_v2  ;;  %v11036_v21 = vld [vmem:[%s12060_s0 + $0xf0] sm:$0xff] }
 0x4cb   :  { %v5408_v46 = vmul.f32 %v11036_v21, %v12351_v38  ;;  %v11062_v38 = vsub.f32 %v10334_v39, %v10802_v3  ;;  %v11086_v39 = vsub.f32 %v10376_v35, %v10844_v9  ;;  %v11110_v35 = vsub.f32 %v10408_v29, %v10876_v32  ;;  %v12360_v32 = vld [vmem:[#allocation133_spill] sm:$0xff] }
 0x4cc   :  { %v11134_v29 = vsub.f32 %v10440_v34, %v10908_v44  ;;  %v11158_v34 = vsub.f32 %v10472_v22, %v10940_v43  ;;  %v11182_v22 = vsub.f32 %v12341_v58, %v10972_v16  ;;  %v11206_v58 = vsub.f32 %v12345_v12, %v11004_v25  ;;  %v12358_v12 = vld [vmem:[#allocation131_spill] sm:$0xff]  ;;  %v12365_v16 = vld [vmem:[#allocation134_spill] sm:$0xff] }
 0x4cd   :  { %8455 = vmatmul.mubr.msk.f32.gmra.mrb[184].mxu1 %vm145_vm0, %v5405_v28  ;;  %v11044_v28 = vld [vmem:[%s12060_s0 + $0xf8] sm:$0xff]  ;;  %s9017_s0 = smov 1   ;;  %v12364_v43 = vld [vmem:[#allocation15_spill] sm:$0xff] }
 0x4ce   :  { %8457 = vmatprep.mubr.msk.f32.mxu1 %vm145_vm0, %v5406_v19  ;;  %v5409_v2 = vmul.f32 %v11044_v28, %v12352_v55  ;;  %v11054_v19 = vsub.f32 %v10323_v47, %v10791_v50  ;;  %v11074_v47 = vsub.f32 %v10360_v13, %v10828_v1  ;;  %v11098_v13 = vsub.f32 %v10392_v59, %v10860_v33 }
 0x4cf   :  { %v11122_v59 = vsub.f32 %v10424_v17, %v10892_v27  ;;  %v11146_v17 = vsub.f32 %v10456_v51, %v10924_v53  ;;  %v11170_v51 = vsub.f32 %v10488_v63, %v10956_v62  ;;  %v11194_v63 = vsub.f32 %v12343_v56, %v10988_v42  ;;  %v12355_v56 = vld [vmem:[#allocation123_spill] sm:$0xff] }
 0x4d0   :  { %987 = vrot.lane.b32.xlu0 %v11054_v19, %s9017_s0  ;;  %v11230_v1 = vsub.f32 %v12358_v12, %v11036_v21 }
 0x4d1   :  { %8458 = vmatmul.mubr.msk.f32.gmra.mrb[186].mxu1 %vm145_vm0, %v5407_v14  ;;  %v11058_v14 = vsub.f32 %v10344_v24, %v10812_v23  ;;  %v11078_v24 = vsub.f32 %v10368_v61, %v10836_v15  ;;  %v11102_v61 = vsub.f32 %v10400_v36, %v10868_v6  ;;  %v11126_v36 = vsub.f32 %v10432_v60, %v10900_v49  ;;  %v12357_v23 = vld [vmem:[#allocation130_spill] sm:$0xff] }
 0x4d2   :  { %8460 = vmatprep.mubr.msk.f32.mxu1 %vm145_vm0, %v5408_v46  ;;  %v11066_v46 = vsub.f32 %v10352_v54, %v10820_v20  ;;  %v11090_v54 = vsub.f32 %v10384_v0, %v10852_v31  ;;  %v11114_v0 = vsub.f32 %v10416_v8, %v10884_v11  ;;  %v11138_v8 = vsub.f32 %v10448_v40, %v10916_v4  ;;  %v12359_v31 = vld [vmem:[#allocation10_spill] sm:$0xff]  ;;  %v12361_v11 = vld [vmem:[#allocation9_spill] sm:$0xff]  ;;  %v12363_v4 = vld [vmem:[#allocation12_spill] sm:$0xff] }
 0x4d3   :  { %991 = vrot.lane.b32.xlu1 %v11058_v14, %s9017_s0  ;;  %v11150_v60 = vsub.f32 %v10464_v52, %v10932_v7  ;;  %v11162_v40 = vsub.f32 %v10480_v10, %v10948_v26  ;;  %v11174_v52 = vsub.f32 %v12340_v57, %v10964_v30  ;;  %v11186_v10 = vsub.f32 %v12342_v41, %v10980_v18  ;;  %v12353_v41 = vld [vmem:[#allocation122_spill] sm:$0xff]  ;;  %v12354_v57 = vld [vmem:[#allocation128_spill] sm:$0xff] }
 0x4d4   :  { %989 = vrot.lane.b32.xlu0 %v11062_v38, %s9017_s0  ;;  %v11210_v50 = vsub.f32 %v12354_v57, %v12353_v41  ;;  %v11222_v20 = vsub.f32 %v12357_v23, %v11028_v5  ;;  %v11234_v15 = vsub.f32 %v12352_v55, %v11044_v28  ;;  %v12362_v27 = vsub.f32 %v12360_v32, %v12361_v11  ;;  %v12366_v18 = vld [vmem:[#allocation14_spill] sm:$0xff]  ;;  %v12368_v55 = vld [vmem:[#allocation17_spill] sm:$0xff]  ;;  %v12369_v28 = vld [vmem:[#allocation20_spill] sm:$0xff] }
 0x4d5   :  { %8461 = vmatmul.mubr.msk.f32.gmra.mrb[188].mxu1 %vm145_vm0, %v5409_v2  ;;  %v11198_v2 = vsub.f32 %v12344_v45, %v10996_v37  ;;  %v12356_v45 = vld [vmem:[#allocation129_spill] sm:$0xff]  ;;  %v6683_v53 = vadd.f32 1.0, %v12363_v4  ;;  %v12367_v42 = vsub.f32 %v12365_v16, %v12366_v18  ;;  %v6684_v5 = vadd.f32 1.0, %v12368_v55  ;;  %v12371_v23 = vld [vmem:[#allocation19_spill] sm:$0xff]  ;;  %v12375_v4 = vld [vmem:[#allocation136_spill] sm:$0xff] }
 0x4d6   :  { %8556 = vmatprep.mubr.msk.f32.mxu1 %vm9015_vm1, %v12304_v48  ;;  %v11218_v3 = vsub.f32 %v12356_v45, %v12355_v56  ;;  %v12370_v45 = vld [vmem:[#allocation135_spill] sm:$0xff]  ;;  %v12374_v11 = vld [vmem:[#allocation25_spill] sm:$0xff] }
 0x4d7   :  { %993 = vrot.lane.b32.xlu1 %v11066_v46, %s9017_s0  ;;  %v12372_v12 = vsub.f32 %v12370_v45, %v12371_v23  ;;  %v12384_v45 = vld [vmem:[#allocation32_spill] sm:$0xff] }
 0x4d8   :  { %995 = vrot.lane.b32.xlu0 %v11074_v47, %s9017_s0  ;;  %v6687_v23 = vadd.f32 1.0, %v12384_v45  ;;  %v12397_v45 = vld [vmem:[#allocation45_spill] sm:$0xff] }
 0x4db   :  { %997 = vrot.lane.b32.xlu1 %v11078_v24, %s9017_s0 }
 0x4dc   :  { %999 = vrot.lane.b32.xlu0 %v11086_v39, %s9017_s0 }
 0x4df   :  { %1001 = vrot.lane.b32.xlu1 %v11090_v54, %s9017_s0 }
 0x4e0   :  { %1003 = vrot.lane.b32.xlu0 %v11098_v13, %s9017_s0 }
 0x4e3   :  { %1005 = vrot.lane.b32.xlu1 %v11102_v61, %s9017_s0 }
 0x4e4   :  { %1007 = vrot.lane.b32.xlu0 %v11110_v35, %s9017_s0 }
 0x4e7   :  { %1009 = vrot.lane.b32.xlu1 %v11114_v0, %s9017_s0 }
 0x4e8   :  { %1011 = vrot.lane.b32.xlu0 %v11122_v59, %s9017_s0 }
 0x4eb   :  { %1013 = vrot.lane.b32.xlu1 %v11126_v36, %s9017_s0 }
 0x4ec   :  { %1015 = vrot.lane.b32.xlu0 %v11134_v29, %s9017_s0 }
 0x4ef   :  { %1017 = vrot.lane.b32.xlu1 %v11138_v8, %s9017_s0 }
 0x4f0   :  { %1019 = vrot.lane.b32.xlu0 %v11146_v17, %s9017_s0 }
 0x4f3   :  { %1021 = vrot.lane.b32.xlu1 %v11150_v60, %s9017_s0 }
 0x4f4   :  { %1023 = vrot.lane.b32.xlu0 %v11158_v34, %s9017_s0 }
 0x4f7   :  { %1025 = vrot.lane.b32.xlu1 %v11162_v40, %s9017_s0 }
 0x4f8   :  { %1027 = vrot.lane.b32.xlu0 %v11170_v51, %s9017_s0 }
 0x4fb   :  { %1029 = vrot.lane.b32.xlu1 %v11174_v52, %s9017_s0 }
 0x4fc   :  { %1031 = vrot.lane.b32.xlu0 %v11182_v22, %s9017_s0 }
 0x4ff   :  { %1033 = vrot.lane.b32.xlu1 %v11186_v10, %s9017_s0 }
 0x500   :  { %1035 = vrot.lane.b32.xlu0 %v11194_v63, %s9017_s0 }
 0x503   :  { %1037 = vrot.lane.b32.xlu1 %v11198_v2, %s9017_s0 }
 0x504   :  { %1039 = vrot.lane.b32.xlu0 %v11206_v58, %s9017_s0 }
 0x507   :  { %1041 = vrot.lane.b32.xlu1 %v11210_v50, %s9017_s0 }
 0x508   :  { %1043 = vrot.lane.b32.xlu0 %v11218_v3, %s9017_s0 }
 0x50b   :  { %1045 = vrot.lane.b32.xlu1 %v11222_v20, %s9017_s0 }
 0x50c   :  { %1047 = vrot.lane.b32.xlu0 %v11230_v1, %s9017_s0 }
 0x50f   :  { %1049 = vrot.lane.b32.xlu1 %v11234_v15, %s9017_s0 }
 0x524   :  { %v4804_v9 = vpop.f32.mrb[122].mxu1 }
 0x525   :  { %v6443_v33 = vsub.f32 %v4804_v9, %v12359_v31  ;;  %v8281_v6 = vpop.f32.mrb[123].mxu1 }
 0x527   :  { %v6707_v49 = vadd.f32 %v6443_v33, %v12362_v27  ;;  %v12373_v33 = vld [vmem:[#allocation22_spill] sm:$0xff] }
 0x528   :  { %v4809_v44 = vpop.f32.mrb[124].mxu1  ;;  %v6685_v6 = vadd.f32 1.0, %v12373_v33 }
 0x529   :  { %v6731_v7 = vadd.f32 9.0, %v6707_v49  ;;  %v6444_v26 = vsub.f32 %v4809_v44, %v12364_v43  ;;  %v8284_v62 = vpop.f32.mrb[125].mxu1 }
 0x52a   :  { %v12378_v62 = vld [vmem:[#allocation27_spill] sm:$0xff] }
 0x52b   :  { %v11250_v30 = vmul.f32 %v6731_v7, %v6683_v53  ;;  %v6708_v37 = vadd.f32 %v6444_v26, %v12367_v42  ;;  %v12376_v53 = vld [vmem:[#allocation24_spill] sm:$0xff]  ;;  %v6686_v16 = vadd.f32 1.0, %v12378_v62  ;;  %v12379_v42 = vld [vmem:[#allocation30_spill] sm:$0xff] }
 0x52c   :  { %v4814_v25 = vpop.f32.mrb[126].mxu1  ;;  %v12377_v7 = vsub.f32 %v12375_v4, %v12376_v53  ;;  %v12390_v53 = vld [vmem:[#allocation37_spill] sm:$0xff] }
 0x52d   :  { %v6732_v21 = vadd.f32 9.0, %v6708_v37  ;;  %v6445_v41 = vsub.f32 %v4814_v25, %v12369_v28  ;;  %v8287_v57 = vpop.f32.mrb[127].mxu1  ;;  %8896 = vrcp.f32 %v11250_v30 }
 0x52f   :  { %v11257_v56 = vmul.f32 %v6732_v21, %v6684_v5  ;;  %v6709_v9 = vadd.f32 %v6445_v41, %v12372_v12  ;;  %v12381_v5 = vld [vmem:[#allocation137_spill] sm:$0xff] }
 0x530   :  { %v4884_v31 = vpop.f32.mrb[128].mxu1  ;;  %v12382_v21 = vld [vmem:[#allocation29_spill] sm:$0xff] }
 0x531   :  { %v6733_v32 = vadd.f32 9.0, %v6709_v9  ;;  %v6446_v27 = vsub.f32 %v4884_v31, %v12374_v11  ;;  %v8298_v49 = vpop.f32.mrb[129].mxu1  ;;  %v12383_v28 = vsub.f32 %v12381_v5, %v12382_v21  ;;  %v12385_v9 = vld [vmem:[#allocation35_spill] sm:$0xff]  ;;  %v12388_v11 = vld [vmem:[#allocation34_spill] sm:$0xff]  ;;  %8898 = vrcp.f32 %v11257_v56 }
 0x533   :  { %v11264_v44 = vmul.f32 %v6733_v32, %v6685_v6  ;;  %v6710_v43 = vadd.f32 %v6446_v27, %v12377_v7  ;;  %v12387_v32 = vld [vmem:[#allocation138_spill] sm:$0xff]  ;;  %v6688_v7 = vadd.f32 1.0, %v12390_v53 }
 0x534   :  { %v4889_v26 = vpop.f32.mrb[130].mxu1  ;;  %v12389_v27 = vsub.f32 %v12387_v32, %v12388_v11 }
 0x535   :  { %v6734_v18 = vadd.f32 9.0, %v6710_v43  ;;  %v6447_v37 = vsub.f32 %v4889_v26, %v12379_v42  ;;  %v8301_v25 = vpop.f32.mrb[131].mxu1  ;;  %v12391_v26 = vld [vmem:[#allocation40_spill] sm:$0xff]  ;;  %v12393_v42 = vld [vmem:[#allocation139_spill] sm:$0xff]  ;;  %8900 = vrcp.f32 %v11264_v44 }
 0x537   :  { %v11271_v55 = vmul.f32 %v6734_v18, %v6686_v16  ;;  %v6711_v41 = vadd.f32 %v6447_v37, %v12383_v28  ;;  %v12394_v37 = vld [vmem:[#allocation39_spill] sm:$0xff]  ;;  %v12396_v28 = vld [vmem:[#allocation42_spill] sm:$0xff] }
 0x538   :  { %v4894_v57 = vpop.f32.mrb[132].mxu1  ;;  %v12395_v25 = vsub.f32 %v12393_v42, %v12394_v37  ;;  %v12406_v42 = vld [vmem:[#allocation49_spill] sm:$0xff] }
 0x539   :  { %12380 = vst [vmem:[#allocation124_spill] sm:$0xff] %v11271_v55  ;;  %v6735_v12 = vadd.f32 9.0, %v6711_v41  ;;  %v6448_v31 = vsub.f32 %v4894_v57, %v12385_v9  ;;  %v8304_v33 = vpop.f32.mrb[133].mxu1  ;;  %v6689_v41 = vadd.f32 1.0, %v12396_v28 }
 0x53a   :  { %v12400_v33 = vld [vmem:[#allocation44_spill] sm:$0xff] }
 0x53b   :  { %v11278_v6 = vmul.f32 %v6735_v12, %v6687_v23  ;;  %v6712_v49 = vadd.f32 %v6448_v31, %v12389_v27  ;;  %v12399_v31 = vld [vmem:[#allocation140_spill] sm:$0xff] }
 0x53c   :  { %v4964_v4 = vpop.f32.mrb[134].mxu1  ;;  %v12401_v32 = vsub.f32 %v12399_v31, %v12400_v33  ;;  %v12411_v31 = vld [vmem:[#allocation142_spill] sm:$0xff] }
 0x53d   :  { %12386 = vst [vmem:[#allocation125_spill] sm:$0xff] %v11278_v6  ;;  %v6736_v43 = vadd.f32 9.0, %v6712_v49  ;;  %v6449_v62 = vsub.f32 %v4964_v4, %v12391_v26  ;;  %v8315_v16 = vpop.f32.mrb[135].mxu1  ;;  %v12402_v49 = vld [vmem:[#allocation47_spill] sm:$0xff]  ;;  %v12412_v33 = vld [vmem:[#allocation54_spill] sm:$0xff] }
 0x53e   :  { %v6690_v4 = vadd.f32 1.0, %v12402_v49  ;;  %v12405_v16 = vld [vmem:[#allocation141_spill] sm:$0xff] }
 0x53f   :  { %v11285_v18 = vmul.f32 %v6736_v43, %v6688_v7  ;;  %v6713_v5 = vadd.f32 %v6449_v62, %v12395_v25  ;;  %v12403_v7 = vld [vmem:[#allocation50_spill] sm:$0xff]  ;;  %v12407_v37 = vsub.f32 %v12405_v16, %v12406_v42  ;;  %v12416_v16 = vld [vmem:[#allocation63_spill] sm:$0xff] }
 0x540   :  { %v4969_v21 = vpop.f32.mrb[136].mxu1 }
 0x541   :  { %12392 = vst [vmem:[#allocation126_spill] sm:$0xff] %v11285_v18  ;;  %v6737_v57 = vadd.f32 9.0, %v6713_v5  ;;  %v6450_v23 = vsub.f32 %v4969_v21, %v12397_v45  ;;  %v8318_v12 = vpop.f32.mrb[137].mxu1  ;;  %v12408_v21 = vld [vmem:[#allocation52_spill] sm:$0xff]  ;;  %v12476_v18 = vld [vmem:[#allocation103_spill] sm:$0xff] }
 0x542   :  { %v6691_v28 = vadd.f32 1.0, %v12408_v21 }
 0x543   :  { %v11292_v9 = vmul.f32 %v6737_v57, %v6689_v41  ;;  %v6714_v11 = vadd.f32 %v6450_v23, %v12401_v32  ;;  %v12409_v57 = vld [vmem:[#allocation55_spill] sm:$0xff]  ;;  %v12413_v32 = vsub.f32 %v12411_v31, %v12412_v33  ;;  %v12422_v31 = vld [vmem:[#allocation62_spill] sm:$0xff] }
 0x544   :  { %v4974_v27 = vpop.f32.mrb[138].mxu1 }
 0x545   :  { %12398 = vst [vmem:[#allocation127_spill] sm:$0xff] %v11292_v9  ;;  %v6738_v53 = vadd.f32 9.0, %v6714_v11  ;;  %v6451_v43 = vsub.f32 %v4974_v27, %v12403_v7  ;;  %v8321_v26 = vpop.f32.mrb[139].mxu1  ;;  %v12436_v9 = vld [vmem:[#allocation5_spill] sm:$0xff] }
 0x546   :  { %v12415_v26 = vld [vmem:[#allocation61_spill] sm:$0xff] }
 0x547   :  { %v11299_v62 = vmul.f32 %v6738_v53, %v6690_v4  ;;  %v6715_v25 = vadd.f32 %v6451_v43, %v12407_v37  ;;  %v12414_v4 = vld [vmem:[#allocation57_spill] sm:$0xff] }
 0x548   :  { %v5044_v5 = vpop.f32.mrb[140].mxu1  ;;  %v6692_v53 = vadd.f32 1.0, %v12414_v4 }
 0x549   :  { %12404 = vst [vmem:[#allocation132_spill] sm:$0xff] %v11299_v62  ;;  %v6739_v41 = vadd.f32 9.0, %v6715_v25  ;;  %v6452_v45 = vsub.f32 %v5044_v5, %v12409_v57  ;;  %v8332_v23 = vpop.f32.mrb[141].mxu1  ;;  %v12418_v5 = vld [vmem:[#allocation143_spill] sm:$0xff] }
 0x54a   :  { %v12421_v23 = vld [vmem:[#allocation144_spill] sm:$0xff] }
 0x54b   :  { %v11306_v12 = vmul.f32 %v6739_v41, %v6691_v28  ;;  %v6716_v11 = vadd.f32 %v6452_v45, %v12413_v32  ;;  %v12419_v28 = vld [vmem:[#allocation60_spill] sm:$0xff]  ;;  %v12423_v45 = vsub.f32 %v12421_v23, %v12422_v31  ;;  %v12424_v32 = vld [vmem:[#allocation66_spill] sm:$0xff] }
 0x54c   :  { %v5049_v27 = vpop.f32.mrb[142].mxu1  ;;  %v5204_v49 = vpop.f32.mrb[150].mxu0  ;;  %v12420_v41 = vsub.f32 %v12418_v5, %v12419_v28  ;;  %v12430_v28 = vld [vmem:[#allocation145_spill] sm:$0xff]  ;;  %v12433_v31 = vld [vmem:[#allocation146_spill] sm:$0xff] }
 0x54d   :  { %12410 = vst [vmem:[#allocation122_spill] sm:$0xff] %v11306_v12  ;;  %v6740_v7 = vadd.f32 9.0, %v6716_v11  ;;  %v6453_v43 = vsub.f32 %v5049_v27, %v12415_v26  ;;  %v6458_v42 = vsub.f32 %v5204_v49, %v12416_v16  ;;  %v8335_v37 = vpop.f32.mrb[143].mxu1  ;;  %v8366_v25 = vpop.f32.mrb[151].mxu0  ;;  %v6693_v12 = vadd.f32 1.0, %v12424_v32  ;;  %v12425_v27 = vld [vmem:[#allocation67_spill] sm:$0xff] }
 0x54e   :  { %v6698_v26 = vadd.f32 1.0, %v12425_v27  ;;  %v12426_v16 = vld [vmem:[#allocation71_spill] sm:$0xff]  ;;  %v12427_v25 = vld [vmem:[#allocation73_spill] sm:$0xff] }
 0x54f   :  { %v11314_v21 = vmul.f32 %v6740_v7, %v6692_v53  ;;  %v6717_v57 = vadd.f32 %v6453_v43, %v12420_v41  ;;  %v6722_v33 = vadd.f32 %v6458_v42, %v12423_v45  ;;  %v12431_v42 = vld [vmem:[#allocation70_spill] sm:$0xff]  ;;  %v12434_v45 = vld [vmem:[#allocation72_spill] sm:$0xff] }
 0x550   :  { %v5054_v4 = vpop.f32.mrb[144].mxu1  ;;  %v5209_v11 = vpop.f32.mrb[152].mxu0  ;;  %v12432_v41 = vsub.f32 %v12430_v28, %v12431_v42  ;;  %v12442_v42 = vld [vmem:[#allocation79_spill] sm:$0xff] }
 0x551   :  { %12417 = vst [vmem:[#allocation128_spill] sm:$0xff] %v11314_v21  ;;  %v6741_v62 = vadd.f32 9.0, %v6717_v57  ;;  %v6746_v49 = vadd.f32 9.0, %v6722_v33  ;;  %v6454_v37 = vsub.f32 %v5054_v4, %v12426_v16  ;;  %v8338_v53 = vpop.f32.mrb[145].mxu1  ;;  %v8369_v7 = vpop.f32.mrb[153].mxu0  ;;  %v6459_v21 = vsub.f32 %v5209_v11, %v12427_v25  ;;  %v12438_v11 = vld [vmem:[#allocation82_spill] sm:$0xff] }
 0x552   :  { %v12435_v57 = vsub.f32 %v12433_v31, %v12434_v45  ;;  %v6694_v4 = vadd.f32 1.0, %v12436_v9  ;;  %v12437_v53 = vld [vmem:[#allocation80_spill] sm:$0xff]  ;;  %v12445_v45 = vld [vmem:[#allocation81_spill] sm:$0xff] }
 0x553   :  { %v11326_v5 = vmul.f32 %v6741_v62, %v6693_v12  ;;  %v11328_v43 = vmul.f32 %v6746_v49, %v6698_v26  ;;  %v6718_v23 = vadd.f32 %v6454_v37, %v12432_v41  ;;  %v12439_v49 = vld [vmem:[#allocation76_spill] sm:$0xff]  ;;  %v12441_v37 = vld [vmem:[#allocation147_spill] sm:$0xff] }
 0x554   :  { %v6723_v32 = vadd.f32 %v6459_v21, %v12435_v57  ;;  %v5124_v27 = vpop.f32.mrb[146].mxu1  ;;  %v5214_v33 = vpop.f32.mrb[154].mxu0  ;;  %v6699_v25 = vadd.f32 1.0, %v12439_v49  ;;  %v12443_v41 = vsub.f32 %v12441_v37, %v12442_v42  ;;  %v12444_v31 = vld [vmem:[#allocation148_spill] sm:$0xff]  ;;  %v12454_v42 = vld [vmem:[#allocation87_spill] sm:$0xff] }
 0x555   :  { %12428 = vst [vmem:[#allocation123_spill] sm:$0xff] %v11326_v5  ;;  %12429 = vst [vmem:[#allocation129_spill] sm:$0xff] %v11328_v43  ;;  %v6742_v16 = vadd.f32 9.0, %v6718_v23  ;;  %v6455_v7 = vsub.f32 %v5124_v27, %v12437_v53  ;;  %v6460_v62 = vsub.f32 %v5214_v33, %v12438_v11  ;;  %v8349_v12 = vpop.f32.mrb[147].mxu1  ;;  %v8372_v26 = vpop.f32.mrb[155].mxu0  ;;  %v12446_v57 = vsub.f32 %v12444_v31, %v12445_v45  ;;  %v12448_v27 = vld [vmem:[#allocation6_spill] sm:$0xff] }
 0x556   :  { %v6747_v43 = vadd.f32 9.0, %v6723_v32  ;;  %v6695_v53 = vadd.f32 1.0, %v12448_v27  ;;  %v12449_v12 = vld [vmem:[#allocation85_spill] sm:$0xff]  ;;  %v12450_v32 = vld [vmem:[#allocation88_spill] sm:$0xff]  ;;  %v12456_v31 = vld [vmem:[#allocation7_spill] sm:$0xff] }
 0x557   :  { %v11340_v28 = vmul.f32 %v6742_v16, %v6694_v4  ;;  %v6719_v21 = vadd.f32 %v6455_v7, %v12443_v41  ;;  %v6724_v9 = vadd.f32 %v6460_v62, %v12446_v57  ;;  %v6700_v26 = vadd.f32 1.0, %v12449_v12  ;;  %v12453_v7 = vld [vmem:[#allocation149_spill] sm:$0xff]  ;;  %v12458_v12 = vld [vmem:[#allocation95_spill] sm:$0xff] }
 0x558   :  { %v11348_v23 = vmul.f32 %v6747_v43, %v6699_v25  ;;  %v5129_v33 = vpop.f32.mrb[148].mxu1  ;;  %v12455_v41 = vsub.f32 %v12453_v7, %v12454_v42  ;;  %v6696_v45 = vadd.f32 1.0, %v12456_v31  ;;  %v12464_v42 = vld [vmem:[#allocation94_spill] sm:$0xff]  ;;  %v12473_v5 = vld [vmem:[#allocation101_spill] sm:$0xff] }
 0x559   :  { %12440 = vst [vmem:[#allocation130_spill] sm:$0xff] %v11340_v28  ;;  %v6743_v11 = vadd.f32 9.0, %v6719_v21  ;;  %v6748_v49 = vadd.f32 9.0, %v6724_v9  ;;  %v6456_v4 = vsub.f32 %v5129_v33, %v12450_v32  ;;  %v8352_v16 = vpop.f32.mrb[149].mxu1  ;;  %v12457_v21 = vld [vmem:[#allocation93_spill] sm:$0xff]  ;;  %v988_v32 = vpop.permute.xlu0 %987  ;;  %v12466_v31 = vld [vmem:[#allocation2_spill] sm:$0xff] }
 0x55a   :  { %12447 = vst [vmem:[#allocation131_spill] sm:$0xff] %v11348_v23 }
 0x55b   :  { %v11353_v28 = vmul.f32 %v6743_v11, %v6695_v53  ;;  %v11355_v37 = vmul.f32 %v6748_v49, %v6700_v26  ;;  %v6720_v62 = vadd.f32 %v6456_v4, %v12455_v41  ;;  %v992_v53 = vpop.permute.xlu1 %991  ;;  %v12460_v26 = vld [vmem:[#allocation150_spill] sm:$0xff]  ;;  %v12461_v49 = vld [vmem:[#allocation92_spill] sm:$0xff]  ;;  %v12463_v4 = vld [vmem:[#allocation151_spill] sm:$0xff] }
 0x55c   :  { %v5134_v43 = vpop.f32.mrb[150].mxu1  ;;  %v5364_v25 = vpop.f32.mrb[156].mxu0  ;;  %v12462_v16 = vsub.f32 %v12460_v26, %v12461_v49  ;;  %v12465_v41 = vsub.f32 %v12463_v4, %v12464_v42  ;;  %v12469_v49 = vld [vmem:[#allocation104_spill] sm:$0xff] }
 0x55d   :  { %12451 = vst [vmem:[#allocation10_spill] sm:$0xff] %v11353_v28  ;;  %12452 = vst [vmem:[#allocation133_spill] sm:$0xff] %v11355_v37  ;;  %v6744_v57 = vadd.f32 9.0, %v6720_v62  ;;  %v6457_v27 = vsub.f32 %v5134_v43, %v12457_v21  ;;  %v6464_v9 = vsub.f32 %v5364_v25, %v12458_v12  ;;  %v8355_v23 = vpop.f32.mrb[151].mxu1  ;;  %v8400_v33 = vpop.f32.mrb[157].mxu0  ;;  %v1083_v62 = vsub.f32 %v11054_v19, %v988_v32 }
 0x55e   :  { %v6697_v43 = vadd.f32 1.0, %v12466_v31  ;;  %v1085_v23 = vsub.f32 %v11058_v14, %v992_v53  ;;  %v12467_v33 = vld [vmem:[#allocation98_spill] sm:$0xff]  ;;  %v12472_v31 = vld [vmem:[#allocation152_spill] sm:$0xff] }
 0x55f   :  { %v11363_v11 = vmul.f32 %v6744_v57, %v6696_v45  ;;  %v6721_v7 = vadd.f32 %v6457_v27, %v12462_v16  ;;  %v6728_v37 = vadd.f32 %v6464_v9, %v12465_v41  ;;  %v6704_v45 = vadd.f32 1.0, %v12467_v33  ;;  %v990_v9 = vpop.permute.xlu0 %989  ;;  %v994_v42 = vpop.permute.xlu1 %993 }
 0x560   :  { %v5284_v21 = vpop.f32.mrb[152].mxu1  ;;  %v5369_v25 = vpop.f32.mrb[158].mxu0  ;;  %v1220_v4 = vand.u32 2147483647, %v1083_v62  ;;  %v12474_v53 = vsub.f32 %v12472_v31, %v12473_v5  ;;  %v1084_v33 = vsub.f32 %v11062_v38, %v990_v9  ;;  %v1086_v62 = vsub.f32 %v11066_v46, %v994_v42 }
 0x561   :  { %12459 = vst [vmem:[#allocation9_spill] sm:$0xff] %v11363_v11  ;;  %v6745_v12 = vadd.f32 9.0, %v6721_v7  ;;  %v6752_v57 = vadd.f32 9.0, %v6728_v37  ;;  %v12468_v11 = vld [vmem:[#allocation102_spill] sm:$0xff]  ;;  %v8383_v26 = vpop.f32.mrb[153].mxu1  ;;  %v8403_v27 = vpop.f32.mrb[159].mxu0  ;;  %v6465_v16 = vsub.f32 %v5369_v25, %v12469_v49 }
 0x562   :  { %v6461_v28 = vsub.f32 %v5284_v21, %v12468_v11  ;;  %v12475_v37 = vld [vmem:[#allocation153_spill] sm:$0xff]  ;;  %v1222_v25 = vand.u32 2147483647, %v1085_v23  ;;  %1284 = vrot.lane.b32.xlu0 %v1220_v4, %s9018_s18  ;;  %v12482_v4 = vld [vmem:[#allocation154_spill] sm:$0xff] }
 0x563   :  { %v11377_v32 = vmul.f32 %v6745_v12, %v6697_v43  ;;  %v11379_v41 = vmul.f32 %v6752_v57, %v6704_v45  ;;  %v12477_v11 = vsub.f32 %v12475_v37, %v12476_v18  ;;  %v12478_v43 = vld [vmem:[#allocation3_spill] sm:$0xff]  ;;  %v1221_v37 = vand.u32 2147483647, %v1084_v33  ;;  %v998_v23 = vpop.permute.xlu1 %997 }
 0x564   :  { %v6725_v7 = vadd.f32 %v6461_v28, %v12474_v53  ;;  %v5289_v26 = vpop.f32.mrb[154].mxu1  ;;  %v5374_v27 = vpop.f32.mrb[160].mxu0  ;;  %v6701_v12 = vadd.f32 1.0, %v12478_v43  ;;  %v12479_v57 = vld [vmem:[#allocation111_spill] sm:$0xff]  ;;  %v12480_v28 = vld [vmem:[#allocation113_spill] sm:$0xff] }
 0x565   :  { %12470 = vst [vmem:[#allocation12_spill] sm:$0xff] %v11377_v32  ;;  %12471 = vst [vmem:[#allocation15_spill] sm:$0xff] %v11379_v41  ;;  %v6729_v21 = vadd.f32 %v6465_v16, %v12477_v11  ;;  %v6462_v5 = vsub.f32 %v5289_v26, %v12479_v57  ;;  %v6466_v49 = vsub.f32 %v5374_v27, %v12480_v28  ;;  %v8386_v9 = vpop.f32.mrb[155].mxu1  ;;  %v8406_v31 = vpop.f32.mrb[161].mxu0  ;;  %v12481_v53 = vld [vmem:[#allocation107_spill] sm:$0xff]  ;;  %v12483_v32 = vld [vmem:[#allocation110_spill] sm:$0xff]  ;;  %1286 = vrot.lane.b32.xlu1 %v1221_v37, %s9018_s18 }
 0x566   :  { %v6749_v45 = vadd.f32 9.0, %v6725_v7  ;;  %v6705_v18 = vadd.f32 1.0, %v12481_v53  ;;  %v996_v11 = vpop.permute.xlu0 %995  ;;  %v12484_v42 = vsub.f32 %v12482_v4, %v12483_v32  ;;  %v12485_v43 = vld [vmem:[#allocation155_spill] sm:$0xff]  ;;  %v12486_v7 = vld [vmem:[#allocation112_spill] sm:$0xff]  ;;  %v1223_v33 = vand.u32 2147483647, %v1086_v62  ;;  %1288 = vrot.lane.b32.xlu0 %v1222_v25, %s9018_s18 }
 0x567   :  { %v6753_v16 = vadd.f32 9.0, %v6729_v21  ;;  %v12487_v55 = vsub.f32 %v12485_v43, %v12486_v7  ;;  %v1087_v27 = vsub.f32 %v11074_v47, %v996_v11  ;;  %v12488_v28 = vld [vmem:[#allocation4_spill] sm:$0xff]  ;;  %v12490_v53 = vld [vmem:[#allocation119_spill] sm:$0xff]  ;;  %v12494_v37 = vld [vmem:[#allocation118_spill] sm:$0xff] }
 0x568   :  { %v11394_v41 = vmul.f32 %v6749_v45, %v6701_v12  ;;  %v6726_v6 = vadd.f32 %v6462_v5, %v12484_v42  ;;  %v6702_v9 = vadd.f32 1.0, %v12488_v28  ;;  %v5294_v21 = vpop.f32.mrb[156].mxu1  ;;  %v1088_v12 = vsub.f32 %v11078_v24, %v998_v23  ;;  %v12489_v45 = vld [vmem:[#allocation116_spill] sm:$0xff] }
 0x569   :  { %v6730_v26 = vadd.f32 %v6466_v49, %v12487_v55  ;;  %v11403_v57 = vmul.f32 %v6753_v16, %v6705_v18  ;;  %v6706_v5 = vadd.f32 1.0, %v12489_v45  ;;  %v6463_v55 = vsub.f32 %v5294_v21, %v12490_v53  ;;  %v8389_v49 = vpop.f32.mrb[157].mxu1  ;;  %v1002_v16 = vpop.permute.xlu1 %1001  ;;  %v12493_v62 = vld [vmem:[#allocation156_spill] sm:$0xff]  ;;  %1290 = vrot.lane.b32.xlu1 %v1223_v33, %s9018_s18 }
 0x56a   :  { %v6750_v32 = vadd.f32 9.0, %v6726_v6  ;;  %v1224_v11 = vand.u32 2147483647, %v1087_v27  ;;  %v1000_v18 = vpop.permute.xlu0 %999  ;;  %v12495_v43 = vsub.f32 %v12493_v62, %v12494_v37  ;;  %v1225_v7 = vand.u32 2147483647, %v1088_v12  ;;  %v12496_v27 = vld [vmem:[#allocation121_spill] sm:$0xff] }
 0x56b   :  { %v6754_v31 = vadd.f32 9.0, %v6730_v26  ;;  %v1089_v23 = vsub.f32 %v11086_v39, %v1000_v18  ;;  %v1090_v26 = vsub.f32 %v11090_v54, %v1002_v16  ;;  %v6703_v28 = vadd.f32 1.0, %v12496_v27 }
 0x56c   :  { %v11411_v4 = vmul.f32 %v6750_v32, %v6702_v9  ;;  %v6727_v25 = vadd.f32 %v6463_v55, %v12495_v43  ;;  %v8417_v6 = vpop.f32.mrb[158].mxu1  ;;  %1292 = vrot.lane.b32.xlu0 %v1224_v11, %s9018_s18  ;;  %v12498_v11 = vmov 0.0|0.0  }
 0x56d   :  { %v11413_v42 = vmul.f32 %v6754_v31, %v6706_v5  ;;  %v5572_v21 = vpop.f32.mrb[159].mxu1  ;;  %v1226_v32 = vand.u32 2147483647, %v1089_v23  ;;  %v1006_v31 = vpop.permute.xlu1 %1005  ;;  %v1227_v12 = vand.u32 2147483647, %v1090_v26  ;;  %1294 = vrot.lane.b32.xlu1 %v1225_v7, %s9018_s18 }
 0x56e   :  { %12491 = vst [vmem:[#allocation134_spill] sm:$0xff] %v11411_v4  ;;  %v6751_v9 = vadd.f32 9.0, %v6727_v25  ;;  %v8832_v45 = vpack.c.bf16 %v8417_v6, %v5572_v21  ;;  %v1004_v5 = vpop.permute.xlu0 %1003  ;;  %v1092_v16 = vsub.f32 %v11102_v61, %v1006_v31 }
 0x56f   :  { %12492 = vst [vmem:[#allocation14_spill] sm:$0xff] %v11413_v42  ;;  %v1091_v55 = vsub.f32 %v11098_v13, %v1004_v5  ;;  %v258_v42 = vrot.slane %v11074_v47, 7 }
 0x570   :  { %v11423_v53 = vmul.f32 %v6751_v9, %v6703_v28  ;;  %v8420_v49 = vpop.f32.mrb[160].mxu1  ;;  %8833 = vmatpush3.bf16.msra.mxu0 %v8832_v45  ;;  %1296 = vrot.lane.b32.xlu0 %v1226_v32, %s9018_s18  ;;  %v1229_v7 = vand.u32 2147483647, %v1092_v16  ;;  %v11438_v32 = vld [vmem:[%s12061_s3] sm:$0xff] }
 0x571   :  { %v5582_v33 = vpop.f32.mrb[161].mxu1  ;;  %8834 = vmatprep.subr.bf16.mxu0 %v12498_v11  ;;  %v1228_v18 = vand.u32 2147483647, %v1091_v55  ;;  %v1010_v43 = vpop.permute.xlu1 %1009  ;;  %1298 = vrot.lane.b32.xlu1 %v1227_v12, %s9018_s18 }
 0x572   :  { %12497 = vst [vmem:[#allocation17_spill] sm:$0xff] %v11423_v53  ;;  %v8835_v62 = vpack.c.bf16 %v8420_v49, %v5582_v33  ;;  %v1008_v37 = vpop.permute.xlu0 %1007  ;;  %v1094_v26 = vsub.f32 %v11114_v0, %v1010_v43 }
 0x573   :  { %v1093_v25 = vsub.f32 %v11110_v35, %v1008_v37 }
 0x574   :  { %8836 = vmatpush3.bf16.msra.mxu0 %v8835_v62  ;;  %v8423_v23 = vpop.f32.mrb[162].mxu1  ;;  %1300 = vrot.lane.b32.xlu0 %v1228_v18, %s9018_s18  ;;  %v1231_v55 = vand.u32 2147483647, %v1094_v26  ;;  %v11452_v62 = vld [vmem:[%s12061_s3 + $0x8] sm:$0xff] }
 0x575   :  { %v5592_v6 = vpop.f32.mrb[163].mxu1  ;;  %8837 = vmatprep.subr.bf16.mxu0 %v12498_v11  ;;  %v1230_v28 = vand.u32 2147483647, %v1093_v25  ;;  %v1014_v21 = vpop.permute.xlu1 %1013  ;;  %1302 = vrot.lane.b32.xlu1 %v1229_v7, %s9018_s18 }
 0x576   :  { %v8838_v27 = vpack.c.bf16 %v8423_v23, %v5592_v6  ;;  %v1012_v9 = vpop.permute.xlu0 %1011  ;;  %v1096_v49 = vsub.f32 %v11126_v36, %v1014_v21 }
 0x577   :  { %8472 = vmatmul.mubr.msk.f32.vlgmr.msra.gmra.mrb[162].mxu0 %vm145_vm0, %v11438_v32  ;;  %v1095_v45 = vsub.f32 %v11122_v59, %v1012_v9  ;;  %v11466_v9 = vld [vmem:[%s12061_s3 + $0x10] sm:$0x3f] }
 0x578   :  { %8474 = vmatprep.mubr.msk.f32.mxu0 %vm9015_vm1, %v12304_v48  ;;  %v8426_v5 = vpop.f32.mrb[164].mxu1  ;;  %8839 = vmatpush3.bf16.msra.mxu0 %v8838_v27  ;;  %v1233_v23 = vand.u32 2147483647, %v1096_v49 }
 0x579   :  { %v5602_v31 = vpop.f32.mrb[165].mxu1  ;;  %8840 = vmatprep.subr.bf16.mxu0 %v12498_v11  ;;  %v1232_v33 = vand.u32 2147483647, %v1095_v45  ;;  %1304 = vrot.lane.b32.xlu0 %v1230_v28, %s9018_s18  ;;  %v1018_v16 = vpop.permute.xlu1 %1017 }
 0x57a   :  { %v8841_v12 = vpack.c.bf16 %v8426_v5, %v5602_v31  ;;  %v1016_v18 = vpop.permute.xlu0 %1015  ;;  %1306 = vrot.lane.b32.xlu1 %v1231_v55, %s9018_s18  ;;  %v1098_v6 = vsub.f32 %v11138_v8, %v1018_v16 }
 0x57b   :  { %8475 = vmatmul.mubr.msk.f32.gmra.mrb[164].mxu0 %vm145_vm0, %v11452_v62  ;;  %v1097_v37 = vsub.f32 %v11134_v29, %v1016_v18 }
 0x57c   :  { %8477 = vmatprep.mubr.msk.f32.mxu0 %vm9015_vm1, %v12304_v48  ;;  %8842 = vmatpush3.bf16.msra.mxu0 %v8841_v12  ;;  %v8429_v43 = vpop.f32.mrb[166].mxu1  ;;  %v1235_v31 = vand.u32 2147483647, %v1098_v6 }
 0x57d   :  { %v5612_v25 = vpop.f32.mrb[167].mxu1  ;;  %8843 = vmatprep.subr.bf16.mxu0 %v12498_v11  ;;  %v1234_v26 = vand.u32 2147483647, %v1097_v37  ;;  %1308 = vrot.lane.b32.xlu0 %v1232_v33, %s9018_s18  ;;  %v1022_v28 = vpop.permute.xlu1 %1021 }
 0x57e   :  { %v8844_v7 = vpack.c.bf16 %v8429_v43, %v5612_v25  ;;  %v1020_v27 = vpop.permute.xlu0 %1019  ;;  %1310 = vrot.lane.b32.xlu1 %v1233_v23, %s9018_s18  ;;  %v1100_v55 = vsub.f32 %v11150_v60, %v1022_v28 }
 0x57f   :  { %8478 = vmatmul.mubr.msk.f32.gmra.mrb[166].mxu0 %vm145_vm0, %v11466_v9  ;;  %v1099_v21 = vsub.f32 %v11146_v17, %v1020_v27 }
 0x580   :  { %8488 = vmatprep.mubr.msk.f32.mxu0 %vm9015_vm1, %v12304_v48  ;;  %v8432_v45 = vpop.f32.mrb[168].mxu1  ;;  %v1237_v25 = vand.u32 2147483647, %v1100_v55 }
 0x581   :  { %v5622_v5 = vpop.f32.mrb[169].mxu1  ;;  %v1236_v12 = vand.u32 2147483647, %v1099_v21  ;;  %1312 = vrot.lane.b32.xlu0 %v1234_v26, %s9018_s18  ;;  %v1026_v18 = vpop.permute.xlu1 %1025 }
 0x582   :  { %v8847_v49 = vpack.c.bf16 %v8432_v45, %v5622_v5  ;;  %v1024_v33 = vpop.permute.xlu0 %1023  ;;  %1314 = vrot.lane.b32.xlu1 %v1235_v31, %s9018_s18  ;;  %v1102_v23 = vsub.f32 %v11162_v40, %v1026_v18 }
 0x583   :  { %8489 = vmatmul.mubr.msk.f32.vlgmr.msra.gmra.mrb[168].mxu0 %vm145_vm0, %v11438_v32  ;;  %v1101_v16 = vsub.f32 %v11158_v34, %v1024_v33 }
 0x584   :  { %8491 = vmatprep.mubr.msk.f32.mxu0 %vm9015_vm1, %v12304_v48  ;;  %8845 = vmatpush3.bf16.msra.mxu0 %v8844_v7  ;;  %v8435_v37 = vpop.f32.mrb[170].mxu1  ;;  %v1239_v5 = vand.u32 2147483647, %v1102_v23 }
 0x585   :  { %8846 = vmatprep.subr.bf16.mxu0 %v12498_v11  ;;  %v5632_v43 = vpop.f32.mrb[171].mxu1  ;;  %v1238_v26 = vand.u32 2147483647, %v1101_v16  ;;  %1316 = vrot.lane.b32.xlu0 %v1236_v12, %s9018_s18  ;;  %v1030_v28 = vpop.permute.xlu1 %1029 }
 0x586   :  { %v8850_v6 = vpack.c.bf16 %v8435_v37, %v5632_v43  ;;  %v1028_v27 = vpop.permute.xlu0 %1027  ;;  %1318 = vrot.lane.b32.xlu1 %v1237_v25, %s9018_s18  ;;  %v1104_v31 = vsub.f32 %v11174_v52, %v1030_v28 }
 0x587   :  { %8492 = vmatmul.mubr.msk.f32.gmra.mrb[170].mxu0 %vm145_vm0, %v11452_v62  ;;  %v1103_v7 = vsub.f32 %v11170_v51, %v1028_v27 }
 0x588   :  { %8494 = vmatprep.mubr.msk.f32.mxu0 %vm9015_vm1, %v12304_v48  ;;  %8848 = vmatpush3.bf16.msra.mxu0 %v8847_v49  ;;  %v8438_v21 = vpop.f32.mrb[172].mxu1  ;;  %v1241_v43 = vand.u32 2147483647, %v1104_v31 }
 0x589   :  { %v5642_v45 = vpop.f32.mrb[173].mxu1  ;;  %8849 = vmatprep.subr.bf16.mxu0 %v12498_v11  ;;  %v1240_v12 = vand.u32 2147483647, %v1103_v7  ;;  %1320 = vrot.lane.b32.xlu0 %v1238_v26, %s9018_s18  ;;  %v1034_v18 = vpop.permute.xlu1 %1033 }
 0x58a   :  { %v8853_v55 = vpack.c.bf16 %v8438_v21, %v5642_v45  ;;  %v1032_v33 = vpop.permute.xlu0 %1031  ;;  %1322 = vrot.lane.b32.xlu1 %v1239_v5, %s9018_s18  ;;  %v1106_v25 = vsub.f32 %v11186_v10, %v1034_v18 }
 0x58b   :  { %8495 = vmatmul.mubr.msk.f32.gmra.mrb[172].mxu0 %vm145_vm0, %v11466_v9  ;;  %v1105_v49 = vsub.f32 %v11182_v22, %v1032_v33 }
 0x58c   :  { %8505 = vmatprep.mubr.msk.f32.mxu0 %vm9015_vm1, %v12304_v48  ;;  %v8441_v16 = vpop.f32.mrb[174].mxu1  ;;  %v1243_v5 = vand.u32 2147483647, %v1106_v25 }
 0x58d   :  { %v5652_v37 = vpop.f32.mrb[175].mxu1  ;;  %v1242_v27 = vand.u32 2147483647, %v1105_v49  ;;  %1324 = vrot.lane.b32.xlu0 %v1240_v12, %s9018_s18  ;;  %v1038_v28 = vpop.permute.xlu1 %1037 }
 0x58e   :  { %v8856_v23 = vpack.c.bf16 %v8441_v16, %v5652_v37  ;;  %v1036_v26 = vpop.permute.xlu0 %1035  ;;  %1326 = vrot.lane.b32.xlu1 %v1241_v43, %s9018_s18  ;;  %v1108_v31 = vsub.f32 %v11198_v2, %v1038_v28 }
 0x58f   :  { %8506 = vmatmul.mubr.msk.f32.vlgmr.msra.gmra.mrb[174].mxu0 %vm145_vm0, %v11438_v32  ;;  %v1107_v7 = vsub.f32 %v11194_v63, %v1036_v26 }
 0x590   :  { %v11505_v21 = vpop.f32.mrb[176].mxu1  ;;  %8508 = vmatprep.mubr.msk.f32.mxu0 %vm9015_vm1, %v12304_v48  ;;  %8851 = vmatpush3.bf16.msra.mxu0 %v8850_v6  ;;  %v1245_v43 = vand.u32 2147483647, %v1108_v31 }
 0x591   :  { %v11509_v45 = vpop.f32.mrb[177].mxu1  ;;  %8852 = vmatprep.subr.bf16.mxu0 %v12498_v11  ;;  %v1244_v33 = vand.u32 2147483647, %v1107_v7  ;;  %1328 = vrot.lane.b32.xlu0 %v1242_v27, %s9018_s18  ;;  %v1042_v49 = vpop.permute.xlu1 %1041 }
 0x592   :  { %v8859_v12 = vpack.c.bf16 %v11505_v21, %v11509_v45  ;;  %v1040_v18 = vpop.permute.xlu0 %1039  ;;  %1330 = vrot.lane.b32.xlu1 %v1243_v5, %s9018_s18  ;;  %v1110_v26 = vsub.f32 %v11210_v50, %v1042_v49 }
 0x593   :  { %8509 = vmatmul.mubr.msk.f32.gmra.mrb[176].mxu0 %vm145_vm0, %v11452_v62  ;;  %v1109_v6 = vsub.f32 %v11206_v58, %v1040_v18 }
 0x594   :  { %v8447_v16 = vpop.f32.mrb[178].mxu1  ;;  %8511 = vmatprep.mubr.msk.f32.mxu0 %vm9015_vm1, %v12304_v48  ;;  %8854 = vmatpush3.bf16.msra.mxu0 %v8853_v55  ;;  %v1247_v31 = vand.u32 2147483647, %v1110_v26  ;;  %v254_v26 = vrot.slane %v11058_v14, 7 }
 0x595   :  { %v5672_v37 = vpop.f32.mrb[179].mxu1  ;;  %8855 = vmatprep.subr.bf16.mxu0 %v12498_v11  ;;  %v1246_v27 = vand.u32 2147483647, %v1109_v6  ;;  %1332 = vrot.lane.b32.xlu0 %v1244_v33, %s9018_s18  ;;  %v1046_v7 = vpop.permute.xlu1 %1045  ;;  %v252_v6 = vrot.slane %v11062_v38, 7 }
 0x596   :  { %v8862_v25 = vpack.c.bf16 %v8447_v16, %v5672_v37  ;;  %v1044_v28 = vpop.permute.xlu0 %1043  ;;  %1334 = vrot.lane.b32.xlu1 %v1245_v43, %s9018_s18  ;;  %v1112_v33 = vsub.f32 %v11222_v20, %v1046_v7  ;;  %v251_v37 = vrot.slane %v11054_v19, 7 }
 0x597   :  { %8512 = vmatmul.mubr.msk.f32.gmra.mrb[178].mxu0 %vm145_vm0, %v11466_v9  ;;  %v1111_v45 = vsub.f32 %v11218_v3, %v1044_v28 }
 0x598   :  { %v8450_v21 = vpop.f32.mrb[180].mxu1  ;;  %8863 = vmatpush3.bf16.msra.mxu1 %v8862_v25  ;;  %8522 = vmatprep.mubr.msk.f32.mxu0 %vm9015_vm1, %v12304_v48  ;;  %v1249_v7 = vand.u32 2147483647, %v1112_v33 }
 0x599   :  { %v5682_v55 = vpop.f32.mrb[181].mxu1  ;;  %8864 = vmatprep.subr.bf16.mxu1 %v12498_v11  ;;  %1336 = vrot.lane.b32.xlu0 %v1246_v27, %s9018_s18  ;;  %v1050_v49 = vpop.permute.xlu1 %1049  ;;  %v1248_v25 = vand.u32 2147483647, %v1111_v45 }
 0x59a   :  { %v8865_v5 = vpack.c.bf16 %v8450_v21, %v5682_v55  ;;  %v1048_v18 = vpop.permute.xlu0 %1047  ;;  %1338 = vrot.lane.b32.xlu1 %v1247_v31, %s9018_s18  ;;  %v1114_v21 = vsub.f32 %v11234_v15, %v1050_v49  ;;  %v113_v55 = vand.u32 2147483647, %v11054_v19  ;;  %v256_v31 = vrot.slane %v11066_v46, 7 }
 0x59b   :  { %8523 = vmatmul.mubr.msk.f32.vlgmr.msra.gmra.mrb[180].mxu0 %vm145_vm0, %v11438_v32  ;;  %v1113_v27 = vsub.f32 %v11230_v1, %v1048_v18  ;;  %v255_v49 = vsel %vm250_vm2, %v252_v6, %v254_v26 }
 0x59c   :  { %8866 = vmatpush3.bf16.msra.mxu1 %v8865_v5  ;;  %8525 = vmatprep.mubr.msk.f32.mxu0 %vm9015_vm1, %v12304_v48  ;;  %v11540_v16 = vpop.f32.mrb[182].mxu1  ;;  %v253_v5 = vsel %vm250_vm2, %v251_v37, %v252_v6  ;;  %v1251_v53 = vand.u32 2147483647, %v1114_v21  ;;  %v346_v6 = vsub.f32 %v11054_v19, %v251_v37  ;;  %v259_v37 = vsel %vm250_vm2, %v256_v31, %v258_v42 }
 0x59d   :  { %8857 = vmatpush3.bf16.msra.mxu0 %v8856_v23  ;;  %v11543_v43 = vpop.f32.mrb[183].mxu1  ;;  %8879 = vmatprep.subr.bf16.mxu1 %v12498_v11  ;;  %v114_v23 = vand.u32 2147483647, %v11062_v38  ;;  %v1250_v18 = vand.u32 2147483647, %v1113_v27 }
 0x59e   :  { %v8868_v28 = vpack.c.bf16 %v11540_v16, %v11543_v43  ;;  %8858 = vmatprep.subr.bf16.mxu0 %v12498_v11  ;;  %1340 = vrot.lane.b32.xlu0 %v1248_v25, %s9018_s18  ;;  %v378_v16 = vlaneseq  ;;  %v347_v25 = vsub.f32 %v11062_v38, %v253_v5  ;;  %v115_v27 = vand.u32 2147483647, %v11058_v14 }
 0x59f   :  { %8526 = vmatmul.mubr.msk.f32.gmra.mrb[182].mxu0 %vm145_vm0, %v11452_v62  ;;  %8557 = vmatmul.mubr.msk.f32.vlgmr.msra.gmra.mrb[190].mxu1 %vm145_vm0, %v11438_v32  ;;  %v147_v4 = vsel %vm145_vm0, %v114_v23, 0.0 }
 0x5a0   :  { %v11559_v45 = vpop.f32.mrb[184].mxu1  ;;  %8528 = vmatprep.mubr.msk.f32.mxu0 %vm9015_vm1, %v12304_v48  ;;  %8559 = vmatprep.mubr.msk.f32.mxu1 %vm9015_vm1, %v12304_v48  ;;  %v861_v5 = vrot.slane %v347_v25, 1 }
 0x5a1   :  { %v5702_v33 = vpop.f32.mrb[185].mxu1  ;;  %8860 = vmatpush3.bf16.msra.mxu0 %v8859_v12  ;;  %1342 = vrot.lane.b32.xlu1 %v1249_v7, %s9018_s18  ;;  %v146_v12 = vsel %vm145_vm0, %v113_v55, 0.0  ;;  %v348_v7 = vsub.f32 %v11058_v14, %v255_v49  ;;  %v257_v55 = vsel %vm250_vm2, %v254_v26, %v256_v31  ;;  %v860_v14 = vrot.slane %v346_v6, 1 }
 0x5a2   :  { %v8871_v43 = vpack.c.bf16 %v11559_v45, %v5702_v33  ;;  %8867 = vmatprep.subr.bf16.mxu0 %v12498_v11  ;;  %1344 = vrot.lane.b32.xlu0 %v1250_v18, %s9018_s18  ;;  %v11589_v45 = vshrl.u32 %v378_v16, 7  ;;  %v148_v38 = vadd.f32 %v147_v4, %v146_v12  ;;  %v149_v33 = vsel %vm145_vm0, %v115_v27, 0.0 }
 0x5a3   :  { %8529 = vmatmul.mubr.msk.f32.gmra.mrb[184].mxu0 %vm145_vm0, %v11466_v9  ;;  %8560 = vmatmul.mubr.msk.f32.gmra.mrb[192].mxu1 %vm145_vm0, %v11452_v62  ;;  %v116_v26 = vand.u32 2147483647, %v11066_v46  ;;  %v863_v4 = vrot.slane %v348_v7, 1  ;;  %v350_v49 = vsub.f32 %v11074_v47, %v259_v37  ;;  %v260_v12 = vrot.slane %v11078_v24, 7 }
 0x5a4   :  { %v8459_v21 = vpop.f32.mrb[186].mxu1  ;;  %8539 = vmatprep.mubr.msk.f32.mxu0 %vm9015_vm1, %v12304_v48  ;;  %8562 = vmatprep.mubr.msk.f32.mxu1 %vm9015_vm1, %v12304_v48  ;;  %v382_v16 = vadd.s32 24, %v11589_v45  ;;  %v150_v25 = vadd.f32 %v149_v33, %v148_v38  ;;  %v117_v27 = vand.u32 2147483647, %v11074_v47  ;;  %v262_v37 = vrot.slane %v11086_v39, 7 }
 0x5a5   :  { %v5712_v23 = vpop.f32.mrb[187].mxu1  ;;  %1346 = vrot.lane.b32.xlu1 %v1251_v53, %s9018_s18  ;;  %v349_v53 = vsub.f32 %v11066_v46, %v257_v55  ;;  %v862_v46 = vsel %vm859_vm3, %v860_v14, %v861_v5  ;;  %v867_v55 = vrot.slane %v350_v49, 1  ;;  %v261_v38 = vsel %vm250_vm2, %v258_v42, %v260_v12 }
 0x5a6   :  { %v11591_v19 = vpack.c.bf16 %v8459_v21, %v5712_v23  ;;  %v864_v21 = vsel %vm859_vm3, %v861_v5, %v863_v4  ;;  %v436_v23 = vand.u32 31, %v382_v16  ;;  %v1115_v14 = vand.u32 2147483647, %v862_v46 }
 0x5a7   :  { %8540 = vmatmul.mubr.msk.f32.vlgmr.msra.gmra.mrb[186].mxu0 %vm145_vm0, %v11438_v32  ;;  %8563 = vmatmul.mubr.msk.f32.gmra.mrb[194].mxu1 %vm145_vm0, %v11466_v9  ;;  %v865_v7 = vrot.slane %v349_v53, 1  ;;  %v1116_v47 = vand.u32 2147483647, %v864_v21  ;;  %v153_v5 = vsel %vm145_vm0, %v117_v27, 0.0  ;;  %v264_v49 = vrot.slane %v11090_v54, 7 }
 0x5a8   :  { %v8462_v18 = vpop.f32.mrb[188].mxu1  ;;  %8881 = vmatpush3.bf16.msra.mxu1 %v11591_v19  ;;  %8542 = vmatprep.mubr.msk.f32.mxu0 %vm9015_vm1, %v12304_v48  ;;  %vm11635_vm4 = vcmp.eq.s32.totalorder %v436_v23, 31  ;;  %v1147_v16 = vsel %vm145_vm0, %v1115_v14, 0.0  ;;  %v266_v46 = vrot.slane %v11098_v13, 7 }
 0x5a9   :  { %v5722_v31 = vpop.f32.mrb[189].mxu1  ;;  %8880 = vmatprep.subr.bf16.mxu1 %v12498_v11  ;;  %8869 = vmatpush3.bf16.msra.mxu0 %v8868_v28  ;;  %v151_v28 = vsel %vm145_vm0, %v116_v26, 0.0  ;;  %v866_v42 = vsel %vm859_vm3, %v863_v4, %v865_v7  ;;  %v351_v26 = vsub.f32 %v11078_v24, %v261_v38  ;;  %v868_v53 = vsel %vm859_vm3, %v865_v7, %v867_v55 }
 0x5aa   :  { %v8877_v6 = vpack.c.bf16 %v8462_v18, %v5722_v31  ;;  %8593 = vmatprep.mubr.msk.f32.mxu1 %vm9015_vm1, %v12304_v48  ;;  %8870 = vmatprep.subr.bf16.mxu0 %v12498_v11  ;;  %v152_v33 = vadd.f32 %v151_v28, %v150_v25  ;;  %v263_v31 = vsel %vm250_vm2, %v260_v12, %v262_v37  ;;  %v1117_v4 = vand.u32 2147483647, %v866_v42 }
 0x5ab   :  { %8543 = vmatmul.mubr.msk.f32.gmra.mrb[188].mxu0 %vm145_vm0, %v11452_v62  ;;  %v119_v12 = vand.u32 2147483647, %v11086_v39  ;;  %v958_v27 = vsel %vm11635_vm4, 0.0, %v868_v53  ;;  %v869_v21 = vrot.slane %v351_v26, 1  ;;  %v352_v7 = vsub.f32 %v11086_v39, %v263_v31 }
 0x5ac   :  { %8882 = vmatpush3.bf16.msra.mxu1 %v8877_v6  ;;  %8545 = vmatprep.mubr.msk.f32.mxu0 %vm9015_vm1, %v12304_v48  ;;  %v154_v25 = vadd.f32 %v153_v5, %v152_v33  ;;  %v265_v23 = vsel %vm250_vm2, %v262_v37, %v264_v49  ;;  %v267_v33 = vsel %vm250_vm2, %v264_v49, %v266_v46  ;;  %v386_v42 = vadd.s32 56, %v11589_v45 }
 0x5ad   :  { %8872 = vmatpush3.bf16.msra.mxu0 %v8871_v43  ;;  %v118_v43 = vand.u32 2147483647, %v11078_v24  ;;  %v1148_v24 = vsel %vm145_vm0, %v1116_v47, 0.0  ;;  %v1150_v47 = vsel %vm145_vm0, %v1117_v4, 0.0  ;;  %v157_v5 = vsel %vm145_vm0, %v119_v12, 0.0 }
 0x5ae   :  { %8873 = vmatprep.subr.bf16.mxu0 %v12498_v11  ;;  %v1149_v38 = vadd.f32 %v1148_v24, %v1147_v16  ;;  %v870_v39 = vsel %vm859_vm3, %v867_v55, %v869_v21  ;;  %v353_v37 = vsub.f32 %v11090_v54, %v265_v23  ;;  %v268_v18 = vrot.slane %v11102_v61, 7 }
 0x5af   :  { %8546 = vmatmul.mubr.msk.f32.gmra.mrb[190].mxu0 %vm145_vm0, %v11466_v9  ;;  %8594 = vmatmul.mubr.msk.f32.vlgmr.msra.gmra.mrb[196].mxu1 %vm145_vm0, %v11452_v62  ;;  %v155_v28 = vsel %vm145_vm0, %v118_v43, 0.0  ;;  %v120_v43 = vand.u32 2147483647, %v11090_v54  ;;  %v1119_v31 = vand.u32 2147483647, %v870_v39  ;;  %v270_v4 = vrot.slane %v11110_v35, 7 }
 0x5b0   :  { %8573 = vmatprep.mubr.msk.f32.mxu0 %vm9015_vm1, %v12304_v48  ;;  %8596 = vmatprep.mubr.msk.f32.mxu1 %vm9015_vm1, %v12304_v48  ;;  %v156_v14 = vadd.f32 %v155_v28, %v154_v25  ;;  %v1151_v26 = vadd.f32 %v1150_v47, %v1149_v38  ;;  %v873_v55 = vrot.slane %v353_v37, 1  ;;  %v121_v16 = vand.u32 2147483647, %v11098_v13 }
 0x5b1   :  { %v464_v25 = vand.u32 31, %v386_v42  ;;  %v1154_v12 = vsel %vm145_vm0, %v1119_v31, 0.0  ;;  %v122_v23 = vand.u32 2147483647, %v11102_v61  ;;  %v123_v37 = vand.u32 2147483647, %v11110_v35 }
 0x5b2   :  { %v158_v49 = vadd.f32 %v157_v5, %v156_v14  ;;  %v272_v14 = vrot.slane %v11114_v0, 7 }
 0x5b3   :  { %8574 = vmatmul.mubr.msk.f32.vlgmr.msra.gmra.mrb[192].mxu0 %vm145_vm0, %v11438_v32  ;;  %8597 = vmatmul.mubr.msk.f32.gmra.mrb[198].mxu1 %vm145_vm0, %v11466_v9  ;;  %vm11687_vm5 = vcmp.eq.s32.totalorder %v464_v25, 31 }
 0x5b4   :  { %8576 = vmatprep.mubr.msk.f32.mxu0 %vm9015_vm1, %v12304_v48  ;;  %8875 = vmatpush3.bf16.msra.mxu0 %v11591_v19  ;;  %v1118_v19 = vand.u32 2147483647, %v958_v27 }
 0x5b5   :  { %8876 = vmatprep.subr.bf16.mxu0 %v12498_v11  ;;  %v871_v11 = vrot.slane %v352_v7, 1 }
 0x5b6   :  { %v1152_v53 = vsel %vm145_vm0, %v1118_v19, 0.0 }
 0x5b7   :  { %8577 = vmatmul.mubr.msk.f32.gmra.mrb[194].mxu0 %vm145_vm0, %v11452_v62  ;;  %v354_v62 = vsub.f32 %v11098_v13, %v267_v33  ;;  %v872_v54 = vsel %vm859_vm3, %v869_v21, %v871_v11  ;;  %v1153_v28 = vadd.f32 %v1152_v53, %v1151_v26  ;;  %v161_v21 = vsel %vm145_vm0, %v121_v16, 0.0 }
 0x5b8   :  { %8579 = vmatprep.mubr.msk.f32.mxu0 %vm9015_vm1, %v12304_v48  ;;  %8878 = vmatpush3.bf16.msra.mxu0 %v8877_v6  ;;  %v159_v6 = vsel %vm145_vm0, %v120_v43, 0.0  ;;  %v1120_v27 = vand.u32 2147483647, %v872_v54  ;;  %v274_v43 = vrot.slane %v11122_v59, 7 }
 0x5b9   :  { %v875_v24 = vrot.slane %v354_v62, 1  ;;  %v160_v7 = vadd.f32 %v159_v6, %v158_v49  ;;  %v1155_v33 = vadd.f32 %v1154_v12, %v1153_v28  ;;  %v273_v62 = vsel %vm250_vm2, %v270_v4, %v272_v14 }
 0x5ba   :  { %v1156_v47 = vsel %vm145_vm0, %v1120_v27, 0.0  ;;  %v275_v49 = vsel %vm250_vm2, %v272_v14, %v274_v43  ;;  %v165_v6 = vsel %vm145_vm0, %v123_v37, 0.0  ;;  %v357_v16 = vsub.f32 %v11114_v0, %v273_v62 }
 0x5bb   :  { %8580 = vmatmul.mubr.msk.f32.gmra.mrb[196].mxu0 %vm145_vm0, %v11466_v9  ;;  %v269_v9 = vsel %vm250_vm2, %v266_v46, %v268_v18  ;;  %v876_v38 = vsel %vm859_vm3, %v873_v55, %v875_v24  ;;  %v162_v5 = vadd.f32 %v161_v21, %v160_v7  ;;  %v1157_v26 = vadd.f32 %v1156_v47, %v1155_v33 }
 0x5bc   :  { %8590 = vmatprep.mubr.msk.f32.mxu0 %vm9015_vm1, %v12304_v48  ;;  %v874_v48 = vsel %vm859_vm3, %v871_v11, %v873_v55  ;;  %v355_v46 = vsub.f32 %v11102_v61, %v269_v9  ;;  %v962_v39 = vsel %vm11687_vm5, 0.0, %v876_v38  ;;  %v163_v11 = vsel %vm145_vm0, %v122_v23, 0.0 }
 0x5bd   :  { %v1121_v19 = vand.u32 2147483647, %v874_v48  ;;  %v1122_v53 = vand.u32 2147483647, %v962_v39  ;;  %v164_v31 = vadd.f32 %v163_v11, %v162_v5  ;;  %v124_v55 = vand.u32 2147483647, %v11114_v0 }
 0x5be   :  { %v877_v42 = vrot.slane %v355_v46, 1  ;;  %v276_v28 = vrot.slane %v11126_v36, 7  ;;  %v125_v7 = vand.u32 2147483647, %v11122_v59  ;;  %v881_v0 = vrot.slane %v357_v16, 1 }
 0x5bf   :  { %8591 = vmatmul.mubr.msk.f32.vlgmr.msra.gmra.mrb[198].mxu0 %vm145_vm0, %v11438_v32  ;;  %v271_v32 = vsel %vm250_vm2, %v268_v18, %v270_v4  ;;  %v1158_v18 = vsel %vm145_vm0, %v1121_v19, 0.0  ;;  %v390_v4 = vadd.s32 88, %v11589_v45  ;;  %v1160_v12 = vsel %vm145_vm0, %v1122_v53, 0.0 }
 0x5c0   :  { %v356_v61 = vsub.f32 %v11110_v35, %v271_v32  ;;  %v878_v25 = vsel %vm859_vm3, %v875_v24, %v877_v42  ;;  %v358_v35 = vsub.f32 %v11122_v59, %v275_v49  ;;  %v1159_v9 = vadd.f32 %v1158_v18, %v1157_v26 }
 0x5c1   :  { %v166_v27 = vadd.f32 %v165_v6, %v164_v31  ;;  %v1123_v48 = vand.u32 2147483647, %v878_v25  ;;  %v167_v13 = vsel %vm145_vm0, %v124_v55, 0.0  ;;  %v492_v23 = vand.u32 31, %v390_v4 }
 0x5c2   :  { %v879_v54 = vrot.slane %v356_v61, 1  ;;  %v883_v24 = vrot.slane %v358_v35, 1  ;;  %v277_v38 = vsel %vm250_vm2, %v274_v43, %v276_v28  ;;  %v1161_v46 = vadd.f32 %v1160_v12, %v1159_v9 }
 0x5c3   :  { %v168_v14 = vadd.f32 %v167_v13, %v166_v27  ;;  %v278_v33 = vrot.slane %v11134_v29, 7  ;;  %v1162_v47 = vsel %vm145_vm0, %v1123_v48, 0.0  ;;  %v169_v59 = vsel %vm145_vm0, %v125_v7, 0.0 }
 0x5c4   :  { %v880_v21 = vsel %vm859_vm3, %v877_v42, %v879_v54  ;;  %v882_v19 = vsel %vm859_vm3, %v879_v54, %v881_v0  ;;  %v126_v5 = vand.u32 2147483647, %v11126_v36  ;;  %v359_v39 = vsub.f32 %v11126_v36, %v277_v38 }
 0x5c5   :  { %v1124_v32 = vand.u32 2147483647, %v880_v21  ;;  %vm11724_vm6 = vcmp.eq.s32.totalorder %v492_v23, 31  ;;  %v884_v43 = vsel %vm859_vm3, %v881_v0, %v883_v24  ;;  %v280_v37 = vrot.slane %v11138_v8, 7 }
 0x5c6   :  { %v1163_v61 = vadd.f32 %v1162_v47, %v1161_v46  ;;  %v1125_v42 = vand.u32 2147483647, %v882_v19  ;;  %v170_v62 = vadd.f32 %v169_v59, %v168_v14  ;;  %v279_v26 = vsel %vm250_vm2, %v276_v28, %v278_v33 }
 0x5c7   :  { %v1164_v18 = vsel %vm145_vm0, %v1124_v32, 0.0  ;;  %v171_v53 = vsel %vm145_vm0, %v126_v5, 0.0  ;;  %v282_v31 = vrot.slane %v11146_v17, 7  ;;  %v966_v36 = vsel %vm11724_vm6, 0.0, %v884_v43 }
 0x5c8   :  { %v885_v49 = vrot.slane %v359_v39, 1  ;;  %v127_v6 = vand.u32 2147483647, %v11134_v29  ;;  %v360_v55 = vsub.f32 %v11134_v29, %v279_v26  ;;  %v281_v16 = vsel %vm250_vm2, %v278_v33, %v280_v37 }
 0x5c9   :  { %v1165_v25 = vadd.f32 %v1164_v18, %v1163_v61  ;;  %v1166_v35 = vsel %vm145_vm0, %v1125_v42, 0.0  ;;  %v172_v4 = vadd.f32 %v171_v53, %v170_v62  ;;  %v1126_v28 = vand.u32 2147483647, %v966_v36 }
 0x5ca   :  { %v128_v9 = vand.u32 2147483647, %v11138_v8  ;;  %v283_v12 = vsel %vm250_vm2, %v280_v37, %v282_v31  ;;  %v886_v7 = vsel %vm859_vm3, %v883_v24, %v885_v49  ;;  %v173_v48 = vsel %vm145_vm0, %v127_v6, 0.0 }
 0x5cb   :  { %v361_v29 = vsub.f32 %v11138_v8, %v281_v16  ;;  %v887_v0 = vrot.slane %v360_v55, 1  ;;  %v394_v23 = vadd.s32 120, %v11589_v45  ;;  %v1167_v32 = vadd.f32 %v1166_v35, %v1165_v25 }
 0x5cc   :  { %v362_v14 = vsub.f32 %v11146_v17, %v283_v12  ;;  %v1168_v47 = vsel %vm145_vm0, %v1126_v28, 0.0  ;;  %v174_v24 = vadd.f32 %v173_v48, %v172_v4  ;;  %v175_v19 = vsel %vm145_vm0, %v128_v9, 0.0 }
 0x5cd   :  { %v129_v8 = vand.u32 2147483647, %v11146_v17  ;;  %v1127_v59 = vand.u32 2147483647, %v886_v7  ;;  %v889_v5 = vrot.slane %v361_v29, 1  ;;  %v284_v39 = vrot.slane %v11150_v60, 7 }
 0x5ce   :  { %v888_v61 = vsel %vm859_vm3, %v885_v49, %v887_v0  ;;  %v520_v42 = vand.u32 31, %v394_v23  ;;  %v891_v18 = vrot.slane %v362_v14, 1  ;;  %v1169_v36 = vadd.f32 %v1168_v47, %v1167_v32 }
 0x5cf   :  { %v176_v6 = vadd.f32 %v175_v19, %v174_v24  ;;  %v177_v17 = vsel %vm145_vm0, %v129_v8, 0.0  ;;  %v1128_v55 = vand.u32 2147483647, %v888_v61  ;;  %v285_v16 = vsel %vm250_vm2, %v282_v31, %v284_v39 }
 0x5d0   :  { %v890_v49 = vsel %vm859_vm3, %v887_v0, %v889_v5  ;;  %vm11761_vm8 = vcmp.eq.s32.totalorder %v520_v42, 31  ;;  %v130_v28 = vand.u32 2147483647, %v11150_v60  ;;  %v286_v7 = vrot.slane %v11158_v34, 7 }
 0x5d1   :  { %v178_v29 = vadd.f32 %v177_v17, %v176_v6  ;;  %v1172_v0 = vsel %vm145_vm0, %v1128_v55, 0.0  ;;  %v1129_v23 = vand.u32 2147483647, %v890_v49  ;;  %v132_v61 = vand.u32 2147483647, %v11162_v40 }
 0x5d2   :  { %v179_v14 = vsel %vm145_vm0, %v130_v28, 0.0  ;;  %v287_v19 = vsel %vm250_vm2, %v284_v39, %v286_v7  ;;  %vm6886_vm1 = vcmp.eq.s32.totalorder %v11589_v45, 1 }
 0x5d3   :  { %v364_v39 = vsub.f32 %v11158_v34, %v287_v19  ;;  %v183_v28 = vsel %vm145_vm0, %v132_v61, 0.0 }
 0x5d4   :  { %v1285_v54 = vpop.permute.xlu0 %1284 }
 0x5d5   :  { %v1381_v27 = vsel %vm1380_vm7, %v1285_v54, 0.0  ;;  %v1170_v54 = vsel %vm145_vm0, %v1127_v59, 0.0 }
 0x5d7   :  { %v1287_v21 = vpop.permute.xlu1 %1286 }
 0x5d8   :  { %v1289_v13 = vpop.permute.xlu0 %1288  ;;  %v1382_v38 = vsel %vm1380_vm7, %v1287_v21, 0.0  ;;  %v363_v21 = vsub.f32 %v11150_v60, %v285_v16  ;;  %v288_v60 = vrot.slane %v11162_v40, 7 }
 0x5d9   :  { %v1384_v46 = vsel %vm1380_vm7, %v1289_v13, 0.0  ;;  %v1383_v33 = vadd.f32 %v1382_v38, %v1381_v27  ;;  %v892_v27 = vsel %vm859_vm3, %v889_v5, %v891_v18  ;;  %v1171_v13 = vadd.f32 %v1170_v54, %v1169_v36 }
 0x5da   :  { %v970_v32 = vsel %vm11761_vm8, 0.0, %v892_v27  ;;  %v893_v5 = vrot.slane %v363_v21, 1  ;;  %v289_v6 = vsel %vm250_vm2, %v286_v7, %v288_v60 }
 0x5db   :  { %v1385_v11 = vadd.f32 %v1384_v46, %v1383_v33  ;;  %v1291_v43 = vpop.permute.xlu1 %1290  ;;  %v131_v33 = vand.u32 2147483647, %v11158_v34  ;;  %v895_v34 = vrot.slane %v364_v39, 1 }
 0x5dc   :  { %v1386_v62 = vsel %vm1380_vm7, %v1291_v43, 0.0  ;;  %v1173_v43 = vadd.f32 %v1172_v0, %v1171_v13  ;;  %v894_v55 = vsel %vm859_vm3, %v891_v18, %v893_v5  ;;  %v398_v18 = vadd.s32 152, %v11589_v45 }
 0x5dd   :  { %v1387_v53 = vadd.f32 %v1386_v62, %v1385_v11  ;;  %v290_v11 = vrot.slane %v11170_v51, 7  ;;  %v1174_v62 = vsel %vm145_vm0, %v1129_v23, 0.0  ;;  %v292_v13 = vrot.slane %v11174_v52, 7 }
 0x5de   :  { %v1293_v37 = vpop.permute.xlu0 %1292  ;;  %v1175_v49 = vadd.f32 %v1174_v62, %v1173_v43  ;;  %v548_v19 = vand.u32 31, %v398_v18  ;;  %v134_v62 = vand.u32 2147483647, %v11174_v52 }
 0x5df   :  { %v1388_v26 = vsel %vm1380_vm7, %v1293_v37, 0.0  ;;  %v1295_v35 = vpop.permute.xlu1 %1294  ;;  %v180_v37 = vadd.f32 %v179_v14, %v178_v29  ;;  %v291_v16 = vsel %vm250_vm2, %v288_v60, %v290_v11  ;;  %v293_v43 = vsel %vm250_vm2, %v290_v11, %v292_v13 }
 0x5e0   :  { %v1389_v25 = vadd.f32 %v1388_v26, %v1387_v53  ;;  %v1390_v9 = vsel %vm1380_vm7, %v1295_v35, 0.0  ;;  %v1130_v26 = vand.u32 2147483647, %v970_v32  ;;  %v181_v53 = vsel %vm145_vm0, %v131_v33, 0.0 }
 0x5e1   :  { %v182_v4 = vadd.f32 %v181_v53, %v180_v37  ;;  %v294_v37 = vrot.slane %v11182_v22, 7  ;;  %vm11808_vm9 = vcmp.eq.s32.totalorder %v548_v19, 31 }
 0x5e2   :  { %v1297_v12 = vpop.permute.xlu0 %1296  ;;  %v1391_v48 = vadd.f32 %v1390_v9, %v1389_v25  ;;  %v1176_v9 = vsel %vm145_vm0, %v1130_v26, 0.0 }
 0x5e3   :  { %v1392_v31 = vsel %vm1380_vm7, %v1297_v12, 0.0  ;;  %v1299_v46 = vpop.permute.xlu1 %1298  ;;  %v365_v12 = vsub.f32 %v11162_v40, %v289_v6  ;;  %v896_v40 = vsel %vm859_vm3, %v893_v5, %v895_v34  ;;  %v184_v32 = vadd.f32 %v183_v28, %v182_v4 }
 0x5e4   :  { %v1393_v38 = vadd.f32 %v1392_v31, %v1391_v48  ;;  %v1394_v47 = vsel %vm1380_vm7, %v1299_v46, 0.0  ;;  %v1131_v48 = vand.u32 2147483647, %v894_v55  ;;  %v366_v31 = vsub.f32 %v11170_v51, %v291_v16 }
 0x5e5   :  { %v133_v46 = vand.u32 2147483647, %v11170_v51  ;;  %v897_v14 = vrot.slane %v365_v12, 1 }
 0x5e6   :  { %v1301_v24 = vpop.permute.xlu0 %1300  ;;  %v1395_v8 = vadd.f32 %v1394_v47, %v1393_v38  ;;  %v1177_v38 = vadd.f32 %v1176_v9, %v1175_v49  ;;  %v899_v60 = vrot.slane %v366_v31, 1  ;;  %v187_v9 = vsel %vm145_vm0, %v134_v62, 0.0 }
 0x5e7   :  { %v1396_v59 = vsel %vm1380_vm7, %v1301_v24, 0.0  ;;  %v1303_v36 = vpop.permute.xlu1 %1302  ;;  %v1178_v24 = vsel %vm145_vm0, %v1131_v48, 0.0  ;;  %v185_v5 = vsel %vm145_vm0, %v133_v46, 0.0  ;;  %v898_v53 = vsel %vm859_vm3, %v895_v34, %v897_v14 }
 0x5e8   :  { %v1397_v42 = vadd.f32 %v1396_v59, %v1395_v8  ;;  %v1398_v17 = vsel %vm1380_vm7, %v1303_v36, 0.0  ;;  %v1179_v26 = vadd.f32 %v1178_v24, %v1177_v38  ;;  %v900_v11 = vsel %vm859_vm3, %v897_v14, %v899_v60 }
 0x5e9   :  { %v186_v16 = vadd.f32 %v185_v5, %v184_v32  ;;  %v1133_v28 = vand.u32 2147483647, %v898_v53  ;;  %v135_v34 = vand.u32 2147483647, %v11182_v22  ;;  %v974_v12 = vsel %vm11808_vm9, 0.0, %v900_v11 }
 0x5ea   :  { %v1399_v25 = vadd.f32 %v1398_v17, %v1397_v42  ;;  %v1132_v42 = vand.u32 2147483647, %v896_v40  ;;  %v367_v17 = vsub.f32 %v11174_v52, %v293_v43  ;;  %v296_v52 = vrot.slane %v11186_v10, 7 }
 0x5eb   :  { %v1305_v54 = vpop.permute.xlu0 %1304  ;;  %v1182_v46 = vsel %vm145_vm0, %v1133_v28, 0.0  ;;  %v1134_v40 = vand.u32 2147483647, %v974_v12  ;;  %v300_v32 = vrot.slane %v11198_v2, 7  ;;  %v188_v14 = vadd.f32 %v187_v9, %v186_v16 }
 0x5ec   :  { %v1400_v35 = vsel %vm1380_vm7, %v1305_v54, 0.0  ;;  %v1307_v7 = vpop.permute.xlu1 %1306  ;;  %v1180_v4 = vsel %vm145_vm0, %v1132_v42, 0.0  ;;  %v11824_v31 = vrot.slane %v367_v17, 1  ;;  %v189_v19 = vsel %vm145_vm0, %v135_v34, 0.0 }
 0x5ed   :  { %v1401_v27 = vadd.f32 %v1400_v35, %v1399_v25  ;;  %v1402_v29 = vsel %vm1380_vm7, %v1307_v7, 0.0  ;;  %v295_v25 = vsel %vm250_vm2, %v292_v13, %v294_v37  ;;  %v1181_v13 = vadd.f32 %v1180_v4, %v1179_v26 }
 0x5ee   :  { %v368_v18 = vsub.f32 %v11182_v22, %v295_v25  ;;  %v138_v17 = vand.u32 2147483647, %v11198_v2  ;;  %v304_v16 = vrot.slane %v11210_v50, 7  ;;  %v139_v4 = vand.u32 2147483647, %v11206_v58 }
 0x5ef   :  { %v1309_v21 = vpop.permute.xlu0 %1308  ;;  %v1403_v0 = vadd.f32 %v1402_v29, %v1401_v27  ;;  %v298_v27 = vrot.slane %v11194_v63, 7 }
 0x5f0   :  { %v1404_v23 = vsel %vm1380_vm7, %v1309_v21, 0.0  ;;  %v1311_v47 = vpop.permute.xlu1 %1310  ;;  %v195_v28 = vsel %vm145_vm0, %v138_v17, 0.0 }
 0x5f1   :  { %v1405_v33 = vadd.f32 %v1404_v23, %v1403_v0  ;;  %v1406_v8 = vsel %vm1380_vm7, %v1311_v47, 0.0  ;;  %v136_v0 = vand.u32 2147483647, %v11186_v10  ;;  %v299_v47 = vsel %vm250_vm2, %v296_v52, %v298_v27 }
 0x5f2   :  { %v370_v53 = vsub.f32 %v11194_v63, %v299_v47 }
 0x5f3   :  { %v1313_v59 = vpop.permute.xlu0 %1312  ;;  %v1407_v61 = vadd.f32 %v1406_v8, %v1405_v33  ;;  %v297_v33 = vsel %vm250_vm2, %v294_v37, %v296_v52  ;;  %v11837_v8 = vsel %vm859_vm3, %v899_v60, %v11824_v31  ;;  %v137_v37 = vand.u32 2147483647, %v11194_v63 }
 0x5f4   :  { %v1408_v51 = vsel %vm1380_vm7, %v1313_v59, 0.0  ;;  %v1315_v36 = vpop.permute.xlu1 %1314  ;;  %v11839_v59 = vrot.slane %v368_v18, 1  ;;  %v191_v62 = vsel %vm145_vm0, %v136_v0, 0.0  ;;  %v369_v26 = vsub.f32 %v11186_v10, %v297_v33 }
 0x5f5   :  { %v1409_v39 = vadd.f32 %v1408_v51, %v1407_v61  ;;  %v1410_v54 = vsel %vm1380_vm7, %v1315_v36, 0.0  ;;  %v190_v51 = vadd.f32 %v189_v19, %v188_v14  ;;  %v302_v60 = vrot.slane %v11206_v58, 7 }
 0x5f6   :  { %v301_v36 = vsel %vm250_vm2, %v298_v27, %v300_v32  ;;  %v905_v9 = vrot.slane %v369_v26, 1  ;;  %v402_v52 = vadd.s32 184, %v11589_v45  ;;  %v11861_v27 = vrot.slane %v370_v53, 1 }
 0x5f7   :  { %v1317_v55 = vpop.permute.xlu0 %1316  ;;  %v1411_v35 = vadd.f32 %v1410_v54, %v1409_v39  ;;  %v192_v39 = vadd.f32 %v191_v62, %v190_v51  ;;  %v193_v54 = vsel %vm145_vm0, %v137_v37, 0.0  ;;  %v371_v34 = vsub.f32 %v11198_v2, %v301_v36 }
 0x5f8   :  { %v1412_v49 = vsel %vm1380_vm7, %v1317_v55, 0.0  ;;  %v1319_v48 = vpop.permute.xlu1 %1318  ;;  %v1135_v55 = vand.u32 2147483647, %v11837_v8  ;;  %v140_v18 = vand.u32 2147483647, %v11210_v50  ;;  %v1184_v14 = vsel %vm145_vm0, %v1134_v40, 0.0 }
 0x5f9   :  { %v1413_v7 = vadd.f32 %v1412_v49, %v1411_v35  ;;  %v1414_v29 = vsel %vm1380_vm7, %v1319_v48, 0.0  ;;  %v194_v25 = vadd.f32 %v193_v54, %v192_v39  ;;  %v11870_v19 = vrot.slane %v371_v34, 1 }
 0x5fa   :  { %v576_v51 = vand.u32 31, %v402_v52  ;;  %v142_v37 = vand.u32 2147483647, %v11222_v20  ;;  %v303_v53 = vsel %vm250_vm2, %v300_v32, %v302_v60  ;;  %v144_v32 = vand.u32 2147483647, %v11234_v15 }
 0x5fb   :  { %v1321_v21 = vpop.permute.xlu0 %1320  ;;  %v1415_v23 = vadd.f32 %v1414_v29, %v1413_v7  ;;  %v196_v12 = vadd.f32 %v195_v28, %v194_v25  ;;  %v197_v29 = vsel %vm145_vm0, %v139_v4, 0.0  ;;  %v310_v28 = vrot.slane %v11230_v1, 7 }
 0x5fc   :  { %v1416_v38 = vsel %vm1380_vm7, %v1321_v21, 0.0  ;;  %v1323_v24 = vpop.permute.xlu1 %1322  ;;  %v203_v17 = vsel %vm145_vm0, %v142_v37, 0.0  ;;  %vm11889_vm10 = vcmp.eq.s32.totalorder %v576_v51, 31  ;;  %v312_v34 = vrot.slane %v11234_v15, 7 }
 0x5fd   :  { %v1417_v22 = vadd.f32 %v1416_v38, %v1415_v23  ;;  %v1418_v43 = vsel %vm1380_vm7, %v1323_v24, 0.0  ;;  %v198_v23 = vadd.f32 %v197_v29, %v196_v12  ;;  %v1183_v38 = vadd.f32 %v1182_v46, %v1181_v13 }
 0x5fe   :  { %v199_v24 = vsel %vm145_vm0, %v140_v18, 0.0  ;;  %v11878_v46 = vsel %vm859_vm3, %v11824_v31, %v11839_v59  ;;  %v305_v31 = vsel %vm250_vm2, %v302_v60, %v304_v16  ;;  %v406_v60 = vadd.s32 216, %v11589_v45 }
 0x5ff   :  { %v1325_v61 = vpop.permute.xlu0 %1324  ;;  %v1419_v42 = vadd.f32 %v1418_v43, %v1417_v22  ;;  %v141_v22 = vand.u32 2147483647, %v11218_v3  ;;  %v200_v43 = vadd.f32 %v199_v24, %v198_v23  ;;  %v1185_v39 = vadd.f32 %v1184_v14, %v1183_v38 }
 0x600   :  { %v1420_v5 = vsel %vm1380_vm7, %v1325_v61, 0.0  ;;  %v1327_v11 = vpop.permute.xlu1 %1326  ;;  %v306_v61 = vrot.slane %v11218_v3, 7  ;;  %v207_v12 = vsel %vm145_vm0, %v144_v32, 0.0  ;;  %v372_v52 = vsub.f32 %v11206_v58, %v303_v53 }
 0x601   :  { %v1421_v6 = vadd.f32 %v1420_v5, %v1419_v42  ;;  %v1422_v10 = vsel %vm1380_vm7, %v1327_v11, 0.0  ;;  %v201_v13 = vsel %vm145_vm0, %v141_v22, 0.0  ;;  %v143_v11 = vand.u32 2147483647, %v11230_v1 }
 0x602   :  { %v202_v26 = vadd.f32 %v201_v13, %v200_v43  ;;  %v906_v38 = vsel %vm859_vm3, %v11839_v59, %v905_v9  ;;  %v1136_v14 = vand.u32 2147483647, %v11878_v46  ;;  %v1186_v58 = vsel %vm145_vm0, %v1135_v55, 0.0 }
 0x603   :  { %v1329_v63 = vpop.permute.xlu0 %1328  ;;  %v1423_v35 = vadd.f32 %v1422_v10, %v1421_v6  ;;  %v307_v10 = vsel %vm250_vm2, %v304_v16, %v306_v61  ;;  %v205_v25 = vsel %vm145_vm0, %v143_v11, 0.0  ;;  %v604_v22 = vand.u32 31, %v406_v60  ;;  %v8897_v11 = vpop.eup %8896 }
 0x604   :  { %v1424_v49 = vsel %vm1380_vm7, %v1329_v63, 0.0  ;;  %v1331_v48 = vpop.permute.xlu1 %1330  ;;  %v204_v54 = vadd.f32 %v203_v17, %v202_v26  ;;  %v374_v29 = vsub.f32 %v11218_v3, %v307_v10  ;;  %v1137_v51 = vand.u32 2147483647, %v906_v38 }
 0x605   :  { %v1425_v7 = vadd.f32 %v1424_v49, %v1423_v35  ;;  %v1426_v21 = vsel %vm1380_vm7, %v1331_v48, 0.0  ;;  %v308_v35 = vrot.slane %v11222_v20, 7  ;;  %v910_v46 = vsel %vm859_vm3, %v11861_v27, %v11870_v19 }
 0x606   :  { %v206_v4 = vadd.f32 %v205_v25, %v204_v54  ;;  %v915_v55 = vrot.slane %v374_v29, 1  ;;  %v410_v26 = vadd.s32 248, %v11589_v45  ;;  %vm11928_vm11 = vcmp.eq.s32.totalorder %v604_v22, 31 }
 0x607   :  { %v1333_v0 = vpop.permute.xlu0 %1332  ;;  %v1427_v33 = vadd.f32 %v1426_v21, %v1425_v7  ;;  %v373_v7 = vsub.f32 %v11210_v50, %v305_v31  ;;  %v908_v21 = vsel %vm859_vm3, %v905_v9, %v11861_v27  ;;  %v309_v23 = vsel %vm250_vm2, %v306_v61, %v308_v35 }
 0x608   :  { %v1428_v47 = vsel %vm1380_vm7, %v1333_v0, 0.0  ;;  %v1335_v5 = vpop.permute.xlu1 %1334  ;;  %v208_v18 = vadd.f32 %v207_v12, %v206_v4  ;;  %v311_v3 = vsel %vm250_vm2, %v308_v35, %v310_v28  ;;  %v911_v61 = vrot.slane %v372_v52, 1 }
 0x609   :  { %v1429_v42 = vadd.f32 %v1428_v47, %v1427_v33  ;;  %v1430_v40 = vsel %vm1380_vm7, %v1335_v5, 0.0  ;;  %v313_v47 = vsel %vm250_vm2, %v310_v28, %v312_v34  ;;  %v978_v59 = vsel %vm11889_vm10, 0.0, %v908_v21 }
 0x60a   :  { %209 = vadd.xlane.f32.xlu0 %v208_v18  ;;  %v375_v8 = vsub.f32 %v11222_v20, %v309_v23  ;;  %v913_v9 = vrot.slane %v373_v7, 1  ;;  %v376_v37 = vsub.f32 %v11230_v1, %v311_v3  ;;  %v377_v13 = vsub.f32 %v11234_v15, %v313_v47 }
 0x60b   :  { %v1337_v62 = vpop.permute.xlu0 %1336  ;;  %v1431_v36 = vadd.f32 %v1430_v40, %v1429_v42  ;;  %v1138_v53 = vand.u32 2147483647, %v978_v59  ;;  %v1187_v20 = vadd.f32 %v1186_v58, %v1185_v39  ;;  %v912_v1 = vsel %vm859_vm3, %v11870_v19, %v911_v61 }
 0x60c   :  { %v1432_v6 = vsel %vm1380_vm7, %v1337_v62, 0.0  ;;  %v1339_v49 = vpop.permute.xlu1 %1338  ;;  %v916_v15 = vsel %vm859_vm3, %v913_v9, %v915_v55  ;;  %v1139_v27 = vand.u32 2147483647, %v910_v46  ;;  %v1188_v17 = vsel %vm145_vm0, %v1136_v14, 0.0  ;;  %v12514_v46 = vld [vmem:[#allocation8_spill] sm:$0xff] }
 0x60d   :  { %v1433_v2 = vadd.f32 %v1432_v6, %v1431_v36  ;;  %v1434_v16 = vsel %vm1380_vm7, %v1339_v49, 0.0  ;;  %v1190_v54 = vsel %vm145_vm0, %v1137_v51, 0.0  ;;  %v914_v39 = vsel %vm859_vm3, %v911_v61, %v913_v9  ;;  %v12513_v51 = vld [vmem:[#allocation11_spill] sm:$0xff] }
 0x60e   :  { %v917_v10 = vrot.slane %v375_v8, 1  ;;  %v1189_v63 = vadd.f32 %v1188_v17, %v1187_v20  ;;  %v1192_v32 = vsel %vm145_vm0, %v1138_v53, 0.0  ;;  %v919_v25 = vrot.slane %v376_v37, 1 }
 0x60f   :  { %v1435_v48 = vadd.f32 %v1434_v16, %v1433_v2  ;;  %v1140_v2 = vand.u32 2147483647, %v912_v1  ;;  %v982_v19 = vsel %vm11928_vm11, 0.0, %v916_v15  ;;  %v632_v49 = vand.u32 31, %v410_v26  ;;  %v12515_v26 = vld [vmem:[#allocation16_spill] sm:$0xff]  ;;  %v12516_v1 = vld [vmem:[#allocation13_spill] sm:$0xff] }
 0x610   :  { %v1341_v0 = vpop.permute.xlu0 %1340  ;;  %v1191_v35 = vadd.f32 %v1190_v54, %v1189_v63  ;;  %v1141_v4 = vand.u32 2147483647, %v914_v39  ;;  %v1194_v28 = vsel %vm145_vm0, %v1139_v27, 0.0  ;;  %v918_v34 = vsel %vm859_vm3, %v915_v55, %v917_v10  ;;  %v12517_v54 = vld [vmem:[#allocation21_spill] sm:$0xff]  ;;  %v12518_v39 = vld [vmem:[#allocation124_spill] sm:$0xff] }
 0x611   :  { %v1436_v50 = vsel %vm1380_vm7, %v1341_v0, 0.0  ;;  %v921_v60 = vrot.slane %v377_v13, 1  ;;  %v1142_v12 = vand.u32 2147483647, %v982_v19  ;;  %v1196_v52 = vsel %vm145_vm0, %v1140_v2, 0.0  ;;  %v8899_v2 = vpop.eup %8898 }
 0x612   :  { %v1437_v24 = vadd.f32 %v1436_v50, %v1435_v48  ;;  %v1193_v16 = vadd.f32 %v1192_v32, %v1191_v35  ;;  %v920_v7 = vsel %vm859_vm3, %v917_v10, %v919_v25  ;;  %vm826_vm12 = vcmp.eq.s32.totalorder %v632_v49, 31  ;;  %v12520_v49 = vld [vmem:[#allocation26_spill] sm:$0xff] }
 0x613   :  { %v1343_v33 = vpop.permute.xlu1 %1342  ;;  %v1143_v18 = vand.u32 2147483647, %v918_v34  ;;  %v1198_v29 = vsel %vm145_vm0, %v1141_v4, 0.0  ;;  %v922_v21 = vsel %vm859_vm3, %v919_v25, %v921_v60  ;;  %v1144_v23 = vand.u32 2147483647, %v920_v7  ;;  %v12519_v25 = vld [vmem:[#allocation18_spill] sm:$0xff]  ;;  %v8901_v7 = vpop.eup %8900 }
 0x614   :  { %v1438_v43 = vsel %vm1380_vm7, %v1343_v33, 0.0  ;;  %v1345_v5 = vpop.permute.xlu0 %1344  ;;  %v1195_v48 = vadd.f32 %v1194_v28, %v1193_v16  ;;  %v1200_v38 = vsel %vm145_vm0, %v1142_v12, 0.0  ;;  %v986_v14 = vsel %vm826_vm12, 0.0, %v921_v60  ;;  %v12521_v34 = vld [vmem:[#allocation125_spill] sm:$0xff] }
 0x615   :  { %v1439_v42 = vadd.f32 %v1438_v43, %v1437_v24  ;;  %v1440_v40 = vsel %vm1380_vm7, %v1345_v5, 0.0  ;;  %v1145_v50 = vand.u32 2147483647, %v922_v21  ;;  %v1202_v33 = vsel %vm145_vm0, %v1143_v18, 0.0 }
 0x616   :  { %v1197_v0 = vadd.f32 %v1196_v52, %v1195_v48  ;;  %v1146_v47 = vand.u32 2147483647, %v986_v14  ;;  %v1204_v22 = vsel %vm145_vm0, %v1144_v23, 0.0  ;;  %v6564_v15 = vadd.f32 1.0, %v12516_v1 }
 0x617   :  { %v1347_v62 = vpop.permute.xlu1 %1346  ;;  %v1441_v36 = vadd.f32 %v1440_v40, %v1439_v42  ;;  %v1206_v43 = vsel %vm145_vm0, %v1145_v50, 0.0  ;;  %v6563_v40 = vadd.f32 1.0, %v12514_v46  ;;  %8902 = vrcp.f32 %v12518_v39  ;;  %v12524_v50 = vld [vmem:[#allocation126_spill] sm:$0xff] }
 0x618   :  { %v1442_v6 = vsel %vm1380_vm7, %v1347_v62, 0.0  ;;  %v1199_v58 = vadd.f32 %v1198_v29, %v1197_v0  ;;  %v1209_v59 = vsel %vm1208_vm13, %v1146_v47, 0.0  ;;  %v6565_v44 = vadd.f32 1.0, %v12519_v25  ;;  %v12522_v29 = vld [vmem:[#allocation23_spill] sm:$0xff]  ;;  %v12532_v25 = vld [vmem:[#allocation46_spill] sm:$0xff] }
 0x619   :  { %v1443_v31 = vadd.f32 %v1442_v6, %v1441_v36  ;;  %8904 = vrcp.f32 %v12521_v34  ;;  %v6566_v21 = vadd.f32 1.0, %v12522_v29  ;;  %vm6887_vm0 = vcmp.eq.s32.totalorder %v11589_v45, 2 }
 0x61a   :  { %v1201_v3 = vadd.f32 %v1200_v38, %v1199_v58  ;;  %v12523_v38 = vld [vmem:[#allocation31_spill] sm:$0xff]  ;;  %8906 = vrcp.f32 %v12524_v50  ;;  %v12537_v50 = vld [vmem:[#allocation48_spill] sm:$0xff]  ;;  %vm6885_vm2 = vcmp.eq.s32.totalorder %v11589_v45, 0 }
 0x61b   :  { %1444 = vadd.xlane.f32.xlu0 %v1443_v31 }
 0x61c   :  { %v1203_v24 = vadd.f32 %v1202_v33, %v1201_v3 }
 0x61e   :  { %v1205_v61 = vadd.f32 %v1204_v22, %v1203_v24 }
 0x620   :  { %v1207_v8 = vadd.f32 %v1206_v43, %v1205_v61  ;;  %v12525_v61 = vld [vmem:[#allocation28_spill] sm:$0xff] }
 0x621   :  { %v8903_v22 = vpop.eup %8902 }
 0x622   :  { %v1210_v9 = vadd.f32 %v1209_v59, %v1207_v8  ;;  %v6567_v59 = vadd.f32 1.0, %v12525_v61  ;;  %v12539_v61 = vld [vmem:[#allocation56_spill] sm:$0xff] }
 0x624   :  { %1211 = vadd.xlane.f32.xlu1 %v1210_v9 }
 0x64a   :  { %v5797_v55 = vpop.f32.mrb[162].mxu0 }
 0x64b   :  { %v6491_v42 = vsub.f32 %v5797_v55, %v12513_v51  ;;  %v8473_v5 = vpop.f32.mrb[163].mxu0  ;;  %v12526_v55 = vld [vmem:[#allocation36_spill] sm:$0xff] }
 0x64c   :  { %v12527_v5 = vld [vmem:[#allocation127_spill] sm:$0xff] }
 0x64d   :  { %v6587_v37 = vmul.f32 2.0, %v6491_v42  ;;  %8908 = vrcp.f32 %v12527_v5 }
 0x64e   :  { %v5802_v13 = vpop.f32.mrb[164].mxu0 }
 0x64f   :  { %v6611_v62 = vadd.f32 9.0, %v6587_v37  ;;  %v6492_v53 = vsub.f32 %v5802_v13, %v12515_v26  ;;  %v8476_v20 = vpop.f32.mrb[165].mxu0 }
 0x651   :  { %v6635_v36 = vmul.f32 %v6611_v62, %v6563_v40  ;;  %v6588_v6 = vmul.f32 2.0, %v6492_v53  ;;  %v8905_v40 = vpop.eup %8904  ;;  %v12528_v53 = vld [vmem:[#allocation33_spill] sm:$0xff] }
 0x652   :  { %v5807_v30 = vpop.f32.mrb[166].mxu0  ;;  %v6568_v20 = vadd.f32 1.0, %v12528_v53 }
 0x653   :  { %v6803_v27 = vmul.f32 %v8897_v11, %v6635_v36  ;;  %v6612_v17 = vadd.f32 9.0, %v6588_v6  ;;  %v6493_v56 = vsub.f32 %v5807_v30, %v12517_v54  ;;  %v8479_v31 = vpop.f32.mrb[167].mxu0  ;;  %v12529_v11 = vld [vmem:[#allocation41_spill] sm:$0xff] }
 0x655   :  { %v6636_v10 = vmul.f32 %v6612_v17, %v6564_v15  ;;  %v6589_v63 = vmul.f32 2.0, %v6493_v56  ;;  %v6828_v60 = vsel %vm6827_vm14, %v6803_v27, 0.0  ;;  %v12530_v15 = vld [vmem:[#allocation132_spill] sm:$0xff]  ;;  %v8907_v56 = vpop.eup %8906 }
 0x656   :  { %v5877_v32 = vpop.f32.mrb[168].mxu0  ;;  %8910 = vrcp.f32 %v12530_v15 }
 0x657   :  { %v6804_v19 = vmul.f32 %v8899_v2, %v6636_v10  ;;  %v6613_v35 = vadd.f32 9.0, %v6589_v63  ;;  %v6494_v4 = vsub.f32 %v5877_v32, %v12520_v49  ;;  %v8490_v28 = vpop.f32.mrb[169].mxu0  ;;  %v12531_v10 = vld [vmem:[#allocation38_spill] sm:$0xff]  ;;  %v8909_v34 = vpop.eup %8908 }
 0x658   :  { %v6569_v63 = vadd.f32 1.0, %v12531_v10  ;;  %v12546_v10 = vld [vmem:[#allocation58_spill] sm:$0xff] }
 0x659   :  { %v6829_v16 = vsel %vm6827_vm14, %v6804_v19, 0.0  ;;  %v6637_v12 = vmul.f32 %v6613_v35, %v6565_v44  ;;  %v6590_v52 = vmul.f32 2.0, %v6494_v4  ;;  %v12533_v35 = vld [vmem:[#allocation122_spill] sm:$0xff] }
 0x65a   :  { %v6830_v48 = vadd.f32 %v6829_v16, %v6828_v60  ;;  %v5882_v18 = vpop.f32.mrb[170].mxu0  ;;  %8912 = vrcp.f32 %v12533_v35 }
 0x65b   :  { %v6805_v0 = vmul.f32 %v8901_v7, %v6637_v12  ;;  %v6614_v23 = vadd.f32 9.0, %v6590_v52  ;;  %v6495_v14 = vsub.f32 %v5882_v18, %v12523_v38  ;;  %v8493_v58 = vpop.f32.mrb[171].mxu0  ;;  %v12534_v12 = vld [vmem:[#allocation43_spill] sm:$0xff] }
 0x65c   :  { %v6570_v52 = vadd.f32 1.0, %v12534_v12  ;;  %v12535_v18 = vld [vmem:[#allocation51_spill] sm:$0xff] }
 0x65d   :  { %v6832_v33 = vsel %vm6831_vm15, %v6805_v0, 0.0  ;;  %v6638_v3 = vmul.f32 %v6614_v23, %v6566_v21  ;;  %v6591_v47 = vmul.f32 2.0, %v6495_v14  ;;  %v12536_v0 = vld [vmem:[#allocation128_spill] sm:$0xff] }
 0x65e   :  { %v6833_v24 = vadd.f32 %v6832_v33, %v6830_v48  ;;  %v5887_v43 = vpop.f32.mrb[172].mxu0  ;;  %8914 = vrcp.f32 %v12536_v0  ;;  %v6571_v33 = vadd.f32 1.0, %v12537_v50 }
 0x65f   :  { %v6806_v8 = vmul.f32 %v8903_v22, %v6638_v3  ;;  %v6615_v9 = vadd.f32 9.0, %v6591_v47  ;;  %v6496_v51 = vsub.f32 %v5887_v43, %v12526_v55  ;;  %v8496_v42 = vpop.f32.mrb[173].mxu0  ;;  %v12538_v22 = vld [vmem:[#allocation123_spill] sm:$0xff] }
 0x660   :  { %v8911_v58 = vpop.eup %8910  ;;  %8916 = vrcp.f32 %v12538_v22 }
 0x661   :  { %v6834_v37 = vsel %vm6827_vm14, %v6806_v8, 0.0  ;;  %v6639_v13 = vmul.f32 %v6615_v9, %v6567_v59  ;;  %v6592_v46 = vmul.f32 2.0, %v6496_v51  ;;  %v12540_v9 = vld [vmem:[#allocation129_spill] sm:$0xff] }
 0x662   :  { %v6835_v62 = vadd.f32 %v6834_v37, %v6833_v24  ;;  %v5957_v26 = vpop.f32.mrb[174].mxu0  ;;  %8918 = vrcp.f32 %v12540_v9  ;;  %v12541_v37 = vld [vmem:[#allocation53_spill] sm:$0xff] }
 0x663   :  { %v6807_v36 = vmul.f32 %v8905_v40, %v6639_v13  ;;  %v6616_v6 = vadd.f32 9.0, %v6592_v46  ;;  %v6497_v30 = vsub.f32 %v5957_v26, %v12529_v11  ;;  %v8507_v1 = vpop.f32.mrb[175].mxu0  ;;  %v6572_v13 = vadd.f32 1.0, %v12541_v37  ;;  %v12542_v46 = vld [vmem:[#allocation130_spill] sm:$0xff]  ;;  %v12544_v11 = vld [vmem:[#allocation65_spill] sm:$0xff] }
 0x664   :  { %v8913_v5 = vpop.eup %8912  ;;  %8920 = vrcp.f32 %v12542_v46 }
 0x665   :  { %v6836_v27 = vsel %vm6827_vm14, %v6807_v36, 0.0  ;;  %v6640_v17 = vmul.f32 %v6616_v6, %v6568_v20  ;;  %v6593_v54 = vmul.f32 2.0, %v6497_v30  ;;  %v12543_v36 = vld [vmem:[#allocation64_spill] sm:$0xff] }
 0x666   :  { %v6837_v31 = vadd.f32 %v6836_v27, %v6835_v62  ;;  %v5962_v39 = vpop.f32.mrb[176].mxu0  ;;  %v12545_v27 = vld [vmem:[#allocation131_spill] sm:$0xff] }
 0x667   :  { %v6808_v2 = vmul.f32 %v8907_v56, %v6640_v17  ;;  %v6617_v32 = vadd.f32 9.0, %v6593_v54  ;;  %v6498_v44 = vsub.f32 %v5962_v39, %v12532_v25  ;;  %v8510_v19 = vpop.f32.mrb[177].mxu0  ;;  %8922 = vrcp.f32 %v12545_v27  ;;  %v12548_v25 = vld [vmem:[#allocation10_spill] sm:$0xff] }
 0x668   :  { %v8915_v39 = vpop.eup %8914  ;;  %8924 = vrcp.f32 %v12548_v25 }
 0x669   :  { %v6838_v49 = vsel %vm6831_vm15, %v6808_v2, 0.0  ;;  %v6641_v4 = vmul.f32 %v6617_v32, %v6569_v63  ;;  %v6594_v28 = vmul.f32 2.0, %v6498_v44  ;;  %v6573_v63 = vadd.f32 1.0, %v12546_v10  ;;  %v12547_v2 = vld [vmem:[#allocation59_spill] sm:$0xff]  ;;  %v12560_v10 = vld [vmem:[#allocation78_spill] sm:$0xff] }
 0x66a   :  { %v6839_v60 = vadd.f32 %v6838_v49, %v6837_v31  ;;  %v5967_v16 = vpop.f32.mrb[178].mxu0  ;;  %v6578_v32 = vadd.f32 1.0, %v12547_v2 }
 0x66b   :  { %v6809_v7 = vmul.f32 %v8909_v34, %v6641_v4  ;;  %v6618_v48 = vadd.f32 9.0, %v6594_v28  ;;  %v6499_v29 = vsub.f32 %v5967_v16, %v12535_v18  ;;  %v8513_v21 = vpop.f32.mrb[179].mxu0  ;;  %v12549_v34 = vld [vmem:[#allocation74_spill] sm:$0xff]  ;;  %v8917_v18 = vpop.eup %8916 }
 0x66d   :  { %v6840_v23 = vsel %vm6827_vm14, %v6809_v7, 0.0  ;;  %v6642_v38 = vmul.f32 %v6618_v48, %v6570_v52  ;;  %v6595_v14 = vmul.f32 2.0, %v6499_v29  ;;  %v12550_v52 = vld [vmem:[#allocation133_spill] sm:$0xff]  ;;  %v12551_v7 = vld [vmem:[#allocation75_spill] sm:$0xff] }
 0x66e   :  { %v6841_v3 = vadd.f32 %v6840_v23, %v6839_v60  ;;  %v6037_v47 = vpop.f32.mrb[180].mxu0  ;;  %8926 = vrcp.f32 %v12550_v52 }
 0x66f   :  { %v6810_v24 = vmul.f32 %v8911_v58, %v6642_v38  ;;  %v6619_v43 = vadd.f32 9.0, %v6595_v14  ;;  %v6500_v59 = vsub.f32 %v6037_v47, %v12539_v61  ;;  %v8524_v8 = vpop.f32.mrb[181].mxu0  ;;  %v8919_v38 = vpop.eup %8918  ;;  %v12552_v14 = vld [vmem:[#allocation68_spill] sm:$0xff]  ;;  %v12553_v61 = vld [vmem:[#allocation83_spill] sm:$0xff] }
 0x670   :  { %v6574_v58 = vadd.f32 1.0, %v12552_v14 }
 0x671   :  { %v6842_v55 = vsel %vm6827_vm14, %v6810_v24, 0.0  ;;  %v6643_v51 = vmul.f32 %v6619_v43, %v6571_v33  ;;  %v6596_v42 = vmul.f32 2.0, %v6500_v59 }
 0x672   :  { %v6843_v40 = vadd.f32 %v6842_v55, %v6841_v3  ;;  %v6042_v62 = vpop.f32.mrb[182].mxu0  ;;  %v6197_v26 = vpop.f32.mrb[190].mxu1 }
 0x673   :  { %v6811_v53 = vmul.f32 %v8913_v5, %v6643_v51  ;;  %v6620_v20 = vadd.f32 9.0, %v6596_v42  ;;  %v6501_v6 = vsub.f32 %v6042_v62, %v12543_v36  ;;  %v6506_v30 = vsub.f32 %v6197_v26, %v12544_v11  ;;  %v8527_v1 = vpop.f32.mrb[183].mxu0  ;;  %v8558_v15 = vpop.f32.mrb[191].mxu1  ;;  %v12554_v51 = vld [vmem:[#allocation69_spill] sm:$0xff] }
 0x674   :  { %v8921_v55 = vpop.eup %8920  ;;  %v6579_v42 = vadd.f32 1.0, %v12554_v51  ;;  %v12555_v5 = vld [vmem:[#allocation9_spill] sm:$0xff]  ;;  %v12558_v15 = vld [vmem:[#allocation12_spill] sm:$0xff]  ;;  %v12567_v51 = vld [vmem:[#allocation106_spill] sm:$0xff] }
 0x675   :  { %v6844_v17 = vsel %vm6831_vm15, %v6811_v53, 0.0  ;;  %v6644_v54 = vmul.f32 %v6620_v20, %v6572_v13  ;;  %v6597_v56 = vmul.f32 2.0, %v6501_v6  ;;  %v6602_v31 = vmul.f32 2.0, %v6506_v30  ;;  %v12556_v13 = vld [vmem:[#allocation84_spill] sm:$0xff]  ;;  %v8923_v53 = vpop.eup %8922  ;;  %v12557_v20 = vld [vmem:[#allocation77_spill] sm:$0xff] }
 0x676   :  { %v6845_v44 = vadd.f32 %v6844_v17, %v6843_v40  ;;  %v6047_v19 = vpop.f32.mrb[184].mxu0  ;;  %v6202_v35 = vpop.f32.mrb[192].mxu1  ;;  %8928 = vrcp.f32 %v12555_v5  ;;  %v6575_v36 = vadd.f32 1.0, %v12557_v20 }
 0x677   :  { %v6812_v49 = vmul.f32 %v8915_v39, %v6644_v54  ;;  %v6621_v4 = vadd.f32 9.0, %v6597_v56  ;;  %v6626_v28 = vadd.f32 9.0, %v6602_v31  ;;  %v6502_v60 = vsub.f32 %v6047_v19, %v12549_v34  ;;  %v8530_v16 = vpop.f32.mrb[185].mxu0  ;;  %v8561_v12 = vpop.f32.mrb[193].mxu1  ;;  %v12559_v54 = vld [vmem:[#allocation89_spill] sm:$0xff] }
 0x678   :  { %v6507_v48 = vsub.f32 %v6202_v35, %v12551_v7  ;;  %8930 = vrcp.f32 %v12558_v15  ;;  %v8925_v39 = vpop.eup %8924  ;;  %v12562_v7 = vld [vmem:[#allocation96_spill] sm:$0xff] }
 0x679   :  { %v6846_v29 = vsel %vm6827_vm14, %v6812_v49, 0.0  ;;  %v6645_v21 = vmul.f32 %v6621_v4, %v6573_v63  ;;  %v6650_v0 = vmul.f32 %v6626_v28, %v6578_v32  ;;  %v6598_v23 = vmul.f32 2.0, %v6502_v60  ;;  %v8927_v35 = vpop.eup %8926  ;;  %v12561_v49 = vld [vmem:[#allocation86_spill] sm:$0xff] }
 0x67a   :  { %v6847_v50 = vadd.f32 %v6846_v29, %v6845_v44  ;;  %v6603_v33 = vmul.f32 2.0, %v6507_v48  ;;  %v6117_v3 = vpop.f32.mrb[186].mxu0  ;;  %v6207_v47 = vpop.f32.mrb[194].mxu1  ;;  %v6580_v63 = vadd.f32 1.0, %v12560_v10  ;;  %8932 = vrcp.f32 %v11403_v57  ;;  %v12563_v48 = vld [vmem:[#allocation105_spill] sm:$0xff] }
 0x67b   :  { %v6813_v22 = vmul.f32 %v8917_v18, %v6645_v21  ;;  %v12004_v24 = vmul.f32 %v8919_v38, %v6650_v0  ;;  %v6622_v43 = vadd.f32 9.0, %v6598_v23  ;;  %v6503_v59 = vsub.f32 %v6117_v3, %v12553_v61  ;;  %v8541_v8 = vpop.f32.mrb[187].mxu0  ;;  %v8564_v9 = vpop.f32.mrb[195].mxu1  ;;  %v12564_v0 = vld [vmem:[#allocation14_spill] sm:$0xff] }
 0x67c   :  { %v6627_v37 = vadd.f32 9.0, %v6603_v33  ;;  %v6508_v46 = vsub.f32 %v6207_v47, %v12556_v13  ;;  %v6576_v4 = vadd.f32 1.0, %v12561_v49  ;;  %8934 = vrcp.f32 %v11394_v41  ;;  %v12565_v33 = vld [vmem:[#allocation90_spill] sm:$0xff]  ;;  %v12566_v47 = vld [vmem:[#allocation100_spill] sm:$0xff] }
 0x67d   :  { %v6848_v40 = vsel %vm6827_vm14, %v6813_v22, 0.0  ;;  %v6646_v62 = vmul.f32 %v6622_v43, %v6574_v58  ;;  %v6599_v26 = vmul.f32 2.0, %v6503_v59  ;;  %8936 = vrcp.f32 %v12564_v0  ;;  %v12568_v13 = vld [vmem:[#allocation134_spill] sm:$0xff]  ;;  %v12576_v0 = vld [vmem:[#allocation15_spill] sm:$0xff] }
 0x67e   :  { %v6849_v6 = vadd.f32 %v6848_v40, %v6847_v50  ;;  %v6651_v11 = vmul.f32 %v6627_v37, %v6579_v42  ;;  %v6604_v30 = vmul.f32 2.0, %v6508_v46  ;;  %v6122_v1 = vpop.f32.mrb[188].mxu0  ;;  %v6577_v3 = vadd.f32 1.0, %v12565_v33  ;;  %v12569_v46 = vld [vmem:[#allocation114_spill] sm:$0xff] }
 0x67f   :  { %v6814_v27 = vmul.f32 %v8921_v55, %v6646_v62  ;;  %v6623_v17 = vadd.f32 9.0, %v6599_v26  ;;  %v6504_v56 = vsub.f32 %v6122_v1, %v12559_v54  ;;  %v8544_v31 = vpop.f32.mrb[189].mxu0  ;;  %v6585_v22 = vadd.f32 1.0, %v12566_v47 }
 0x680   :  { %v12016_v2 = vmul.f32 %v8923_v53, %v6651_v11  ;;  %v6628_v32 = vadd.f32 9.0, %v6604_v30  ;;  %v8929_v50 = vpop.eup %8928  ;;  %8938 = vrcp.f32 %v12568_v13  ;;  %v12570_v11 = vld [vmem:[#allocation99_spill] sm:$0xff] }
 0x681   :  { %v6850_v25 = vsel %vm6831_vm15, %v6814_v27, 0.0  ;;  %v6647_v44 = vmul.f32 %v6623_v17, %v6575_v36  ;;  %v6600_v19 = vmul.f32 2.0, %v6504_v56  ;;  %v6581_v30 = vadd.f32 1.0, %v12570_v11  ;;  %v12571_v31 = vld [vmem:[#allocation115_spill] sm:$0xff] }
 0x682   :  { %v6851_v28 = vadd.f32 %v6850_v25, %v6849_v6  ;;  %v6652_v34 = vmul.f32 %v6628_v32, %v6580_v63  ;;  %v6127_v60 = vpop.f32.mrb[190].mxu0  ;;  %v6362_v16 = vpop.f32.mrb[196].mxu1  ;;  %v12572_v32 = vld [vmem:[#allocation109_spill] sm:$0xff] }
 0x683   :  { %v6815_v12 = vmul.f32 %v8925_v39, %v6647_v44  ;;  %v6624_v52 = vadd.f32 9.0, %v6600_v19  ;;  %v6505_v57 = vsub.f32 %v6127_v60, %v12562_v7  ;;  %v6513_v18 = vsub.f32 %v6362_v16, %v12563_v48  ;;  %v8547_v29 = vpop.f32.mrb[191].mxu0  ;;  %v8595_v21 = vpop.f32.mrb[197].mxu1  ;;  %v12573_v44 = vld [vmem:[#allocation17_spill] sm:$0xff] }
 0x684   :  { %v6820_v23 = vmul.f32 %v8927_v35, %v6652_v34  ;;  %v8931_v62 = vpop.eup %8930  ;;  %v6586_v25 = vadd.f32 1.0, %v12572_v32  ;;  %8940 = vrcp.f32 %v12573_v44  ;;  %v12574_v34 = vld [vmem:[#allocation108_spill] sm:$0xff]  ;;  %v6858_v7 = vsel %vm6827_vm14, %v12004_v24, 0.0 }
 0x685   :  { %v6852_v38 = vsel %vm6827_vm14, %v6815_v12, 0.0  ;;  %v6648_v14 = vmul.f32 %v6624_v52, %v6576_v4  ;;  %v6601_v58 = vmul.f32 2.0, %v6505_v57  ;;  %v6609_v41 = vmul.f32 2.0, %v6513_v18  ;;  %v8933_v6 = vpop.eup %8932  ;;  %v12575_v18 = vld [vmem:[#allocation120_spill] sm:$0xff] }
 0x686   :  { %v6853_v43 = vadd.f32 %v6852_v38, %v6851_v28  ;;  %v6277_v61 = vpop.f32.mrb[192].mxu0  ;;  %v6367_v59 = vpop.f32.mrb[198].mxu1  ;;  %v6582_v60 = vadd.f32 1.0, %v12574_v34  ;;  %8942 = vrcp.f32 %v12576_v0  ;;  %v6862_v24 = vsel %vm6831_vm15, %v6820_v23, 0.0 }
 0x687   :  { %v6816_v8 = vmul.f32 %v8929_v50, %v6648_v14  ;;  %v6625_v9 = vadd.f32 9.0, %v6601_v58  ;;  %v6633_v55 = vadd.f32 9.0, %v6609_v41  ;;  %v6509_v42 = vsub.f32 %v6277_v61, %v12567_v51  ;;  %v8575_v5 = vpop.f32.mrb[193].mxu0  ;;  %v8598_v37 = vpop.f32.mrb[199].mxu1 }
 0x688   :  { %v6514_v40 = vsub.f32 %v6367_v59, %v12569_v46  ;;  %v8935_v63 = vpop.eup %8934  ;;  %v6860_v58 = vsel %vm6827_vm14, %v12016_v2, 0.0  ;;  %v12579_v46 = vld [vmem:[#allocation91_spill] sm:$0xff] }
 0x689   :  { %v6854_v26 = vsel %vm6827_vm14, %v6816_v8, 0.0  ;;  %v6649_v53 = vmul.f32 %v6625_v9, %v6577_v3  ;;  %v6657_v20 = vmul.f32 %v6633_v55, %v6585_v22  ;;  %v6605_v36 = vmul.f32 2.0, %v6509_v42  ;;  %v8937_v28 = vpop.eup %8936  ;;  %v12577_v3 = vld [vmem:[#allocation117_spill] sm:$0xff] }
 0x68a   :  { %v6855_v1 = vadd.f32 %v6854_v26, %v6853_v43  ;;  %v6610_v15 = vmul.f32 2.0, %v6514_v40  ;;  %v6282_v27 = vpop.f32.mrb[194].mxu0  ;;  %v8939_v33 = vpop.eup %8938  ;;  %v6583_v47 = vadd.f32 1.0, %v12577_v3  ;;  %v12578_v8 = vld [vmem:[#allocation97_spill] sm:$0xff]  ;;  %v6584_v40 = vadd.f32 1.0, %v12579_v46 }
 0x68b   :  { %v6817_v17 = vmul.f32 %v8931_v62, %v6649_v53  ;;  %v6825_v54 = vmul.f32 %v8933_v6, %v6657_v20  ;;  %v6629_v56 = vadd.f32 9.0, %v6605_v36  ;;  %v6510_v39 = vsub.f32 %v6282_v27, %v12571_v31  ;;  %v8578_v10 = vpop.f32.mrb[195].mxu0 }
 0x68c   :  { %v6634_v19 = vadd.f32 9.0, %v6610_v15 }
 0x68d   :  { %v6856_v35 = vsel %vm6831_vm15, %v6817_v17, 0.0  ;;  %v6653_v49 = vmul.f32 %v6629_v56, %v6581_v30  ;;  %v6606_v4 = vmul.f32 2.0, %v6510_v39  ;;  %v6872_v27 = vsel %vm6827_vm14, %v6825_v54, 0.0 }
 0x68e   :  { %v6857_v16 = vadd.f32 %v6856_v35, %v6855_v1  ;;  %v6658_v12 = vmul.f32 %v6634_v19, %v6586_v25  ;;  %v6287_v52 = vpop.f32.mrb[196].mxu0  ;;  %v8941_v2 = vpop.eup %8940 }
 0x68f   :  { %v6821_v57 = vmul.f32 %v8935_v63, %v6653_v49  ;;  %v6630_v48 = vadd.f32 9.0, %v6606_v4  ;;  %v6511_v29 = vsub.f32 %v6287_v52, %v12575_v18  ;;  %v8581_v21 = vpop.f32.mrb[197].mxu0 }
 0x690   :  { %v6859_v38 = vadd.f32 %v6858_v7, %v6857_v16  ;;  %v6826_v14 = vmul.f32 %v8937_v28, %v6658_v12  ;;  %v8943_v6 = vpop.eup %8942 }
 0x691   :  { %v6654_v41 = vmul.f32 %v6630_v48, %v6582_v60  ;;  %v6607_v50 = vmul.f32 2.0, %v6511_v29  ;;  %v6864_v42 = vsel %vm6827_vm14, %v6821_v57, 0.0 }
 0x692   :  { %v6861_v22 = vadd.f32 %v6860_v58, %v6859_v38  ;;  %v6357_v43 = vpop.f32.mrb[198].mxu0  ;;  %v6874_v56 = vsel %vm6831_vm15, %v6826_v14, 0.0 }
 0x693   :  { %v6822_v61 = vmul.f32 %v8939_v33, %v6654_v41  ;;  %v6631_v59 = vadd.f32 9.0, %v6607_v50  ;;  %v6512_v9 = vsub.f32 %v6357_v43, %v12578_v8  ;;  %v8592_v55 = vpop.f32.mrb[199].mxu0 }
 0x694   :  { %v6863_v51 = vadd.f32 %v6862_v24, %v6861_v22 }
 0x695   :  { %v6655_v5 = vmul.f32 %v6631_v59, %v6583_v47  ;;  %v6608_v37 = vmul.f32 2.0, %v6512_v9  ;;  %v6866_v62 = vsel %vm6827_vm14, %v6822_v61, 0.0 }
 0x696   :  { %v6865_v13 = vadd.f32 %v6864_v42, %v6863_v51 }
 0x697   :  { %v6823_v26 = vmul.f32 %v8941_v2, %v6655_v5  ;;  %v6632_v53 = vadd.f32 9.0, %v6608_v37  ;;  %v210_v31 = vpop.xlane.xlu0 %209 }
 0x698   :  { %v6867_v20 = vadd.f32 %v6866_v62, %v6865_v13  ;;  %v211_v10 = vrot.slane %v210_v31, 4 }
 0x699   :  { %v6868_v23 = vsel %vm6831_vm15, %v6823_v26, 0.0  ;;  %v6656_v36 = vmul.f32 %v6632_v53, %v6584_v40 }
 0x69a   :  { %v6869_v11 = vadd.f32 %v6868_v23, %v6867_v20  ;;  %v212_v63 = vadd.f32 %v211_v10, %v210_v31 }
 0x69b   :  { %v6824_v30 = vmul.f32 %v8943_v6, %v6656_v36 }
 0x69c   :  { %v213_v32 = vrot.slane %v212_v63, 2 }
 0x69d   :  { %v6870_v1 = vsel %vm6827_vm14, %v6824_v30, 0.0 }
 0x69e   :  { %v6871_v15 = vadd.f32 %v6870_v1, %v6869_v11  ;;  %v214_v25 = vadd.f32 %v213_v32, %v212_v63 }
 0x6a0   :  { %v6873_v17 = vadd.f32 %v6872_v27, %v6871_v15  ;;  %v215_v44 = vrot.slane %v214_v25, 1 }
 0x6a2   :  { %v6875_v39 = vadd.f32 %v6874_v56, %v6873_v17  ;;  %v216_v19 = vadd.f32 %v215_v44, %v214_v25 }
 0x6a4   :  { %6876 = vadd.xlane.f32.xlu0 %v6875_v39  ;;  %8883 = vpush %v216_v19 }
 0x6a8   :  { %v1445_v35 = vpop.xlane.xlu0 %1444 }
 0x6a9   :  { %v1446_v49 = vrot.slane %v1445_v35, 4 }
 0x6ab   :  { %v1447_v4 = vadd.f32 %v1446_v49, %v1445_v35 }
 0x6ad   :  { %v1448_v28 = vrot.slane %v1447_v4, 2 }
 0x6af   :  { %v1449_v54 = vadd.f32 %v1448_v28, %v1447_v4 }
 0x6b1   :  { %v1212_v34 = vpop.xlane.xlu1 %1211  ;;  %v1450_v52 = vrot.slane %v1449_v54, 1 }
 0x6b2   :  { %v1213_v60 = vrot.slane %v1212_v34, 4 }
 0x6b3   :  { %v1451_v48 = vadd.f32 %v1450_v52, %v1449_v54 }
 0x6b4   :  { %v1214_v16 = vadd.f32 %v1213_v60, %v1212_v34 }
 0x6b6   :  { %v1215_v12 = vrot.slane %v1214_v16, 2 }
 0x6b8   :  { %v1216_v7 = vadd.f32 %v1215_v12, %v1214_v16 }
 0x6ba   :  { %v1217_v57 = vrot.slane %v1216_v7, 1 }
 0x6bc   :  { %v1218_v18 = vadd.f32 %v1217_v57, %v1216_v7 }
 0x6be   :  { %8885 = vpush %v1218_v18 }
 0x6bf   :  { %8887 = vpush %v1451_v48 }
 0x6d5   :  { %s8884_s3 = spop %8883 }
 0x6d6   :  { %v6892_v47 = vstv %s8884_s3 }
 0x6ef   :  { %s8886_s25 = spop %8885 }
 0x6f0   :  { %s8888_s2 = spop %8887 }
 0x6f1   :  { %s1453_s26 = sadd.f32 %s8888_s2, %s8886_s25 }
 0x6f3   :  { %v6890_v33 = vstv %s1453_s26 }
 0x731   :  { %v6877_v29 = vpop.xlane.xlu0 %6876 }
 0x732   :  { %v6878_v21 = vrot.slane %v6877_v29, 4 }
 0x734   :  { %v6879_v0 = vadd.f32 %v6878_v21, %v6877_v29 }
 0x736   :  { %v6880_v38 = vrot.slane %v6879_v0, 2 }
 0x738   :  { %v6881_v14 = vadd.f32 %v6880_v38, %v6879_v0 }
 0x73a   :  { %v6882_v58 = vrot.slane %v6881_v14, 1 }
 0x73c   :  { %v6883_v41 = vadd.f32 %v6882_v58, %v6881_v14 }
 0x73e   :  { %8889 = vpush %v6883_v41 }
 0x76f   :  { %s8890_s27 = spop %8889 }
 0x770   :  { %v6888_v50 = vstv %s8890_s27 }
 0x771   :  { %v6889_v3 = vsel %vm6887_vm0, %v6888_v50, 0.0 }
 0x772   :  { %v6891_v22 = vsel %vm6886_vm1, %v6890_v33, %v6889_v3 }
 0x773   :  { %v6893_v43 = vsel %vm6885_vm2, %v6892_v47, %v6891_v22 }
 0x774   :  { %6894 = vst [vmem:[%s12063_s4] sm:$0xff] %v6893_v43 }

</bundles_post_ra>
